<compile_context>
chip_gen: v5e
topology: v5e:2x2
jax: 0.10.0
libtpu: 0.0.40
codegen_flags: <defaults>
</compile_context>

<pallas_src>
import functools

import jax
import jax.numpy as jnp
from jax.experimental import pallas as pl
from jax.experimental.pallas import tpu as pltpu


# --------------------------------------------------------------------------
# one-time, host-side parameter preprocessing (hoisted out of the forward)
# --------------------------------------------------------------------------

def prepare_params(params, Ny, Nx, conv_base_channel):
    h, w = Ny // 4, Nx // 4
    C4 = conv_base_channel * 4

    def deconv_w(w_t):
        # torch ConvTranspose2d weight (Cin, Cout, kH, kW) -> im2col conv weight
        # (9*Cin, Cout): spatial flip + reorder to (kH, kW, Cin, Cout) tap-major.
        cin, cout = w_t.shape[0], w_t.shape[1]
        w_flip = w_t[:, :, ::-1, ::-1]
        return jnp.transpose(w_flip, (2, 3, 0, 1)).reshape(9 * cin, cout)

    # permute fc weight/bias columns from NCHW-flat (c, y, x) to NHWC-flat (y, x, c)
    fc_w = (params["fc_w"].reshape(-1, C4, h, w)
            .transpose(0, 2, 3, 1).reshape(-1, h * w * C4))
    fc_b = (params["fc_b"].reshape(C4, h, w)
            .transpose(1, 2, 0).reshape(1, h * w * C4))

    return {
        "fc_w": fc_w, "fc_b": fc_b,
        "w1": deconv_w(params["d1_w"]), "b1": params["d1_b"].reshape(1, -1),
        "g1": params["bn1_g"].reshape(1, -1), "be1": params["bn1_b"].reshape(1, -1),
        "w2": deconv_w(params["d2_w"]), "b2": params["d2_b"].reshape(1, -1),
        "g2": params["bn2_g"].reshape(1, -1), "be2": params["bn2_b"].reshape(1, -1),
        "w3": deconv_w(params["d3_w"]), "b3": params["d3_b"].reshape(1, -1),
        # identity for the in-kernel (pix, C) -> (C, pix) transpose: precomputed here
        # instead of two 256x256 broadcasted_iotas inside the kernel (perf item 4a).
        "eye": jnp.eye(Ny * Nx, dtype=jnp.float32),
    }


# --------------------------------------------------------------------------
# fused decoder kernel
# --------------------------------------------------------------------------

def _make_decoder_kernel(B, h, w, C4, C2, C1, Nch):
    f32 = jnp.float32

    def conv3x3(xpad, H, W, w_ref, b_ref):
        # xpad: (B, H+2, W+2, Cin) VALUE.  One im2col matmul covering all 9 taps.
        Cin = xpad.shape[-1]
        taps = [xpad[:, dy:dy + H, dx:dx + W, :]
                for dy in range(3) for dx in range(3)]
        patches = jnp.concatenate(taps, axis=-1).reshape(B * H * W, 9 * Cin)
        return (jnp.dot(patches, w_ref[...], preferred_element_type=f32)
                + b_ref[...])

    def bn_relu(x, g_ref, be_ref):
        # training-mode BatchNorm2d (biased var, eps=1e-5) + ReLU.
        # Two-pass centered variance: cannot go negative -> rsqrt cannot NaN.
        n = x.shape[0]
        mean = jnp.sum(x, axis=0, keepdims=True) * (1.0 / n)
        xc = x - mean
        var = jnp.sum(xc * xc, axis=0, keepdims=True) * (1.0 / n)
        scale = g_ref[...] * jax.lax.rsqrt(var + 1e-5)
        return jnp.maximum(xc * scale + be_ref[...], 0.0)

    def interleave_rows(x):
        # (B, H, W, C) -> (B, 2H, W, C): data on even rows, zeros on odd rows.
        # Pure leading-dim regroup (last two dims untouched) -> no relayout hazards.
        Bv, H, W, C = x.shape
        x5 = x.reshape(Bv, H, 1, W, C)
        x5 = jnp.concatenate([x5, jnp.zeros_like(x5)], axis=2)
        return x5.reshape(Bv, 2 * H, W, C)

    def pad_rows(x):
        # (B, R, W, C) -> (B, R+2, W, C): one zero row on top and bottom.
        zrow = jnp.zeros((B, 1) + x.shape[2:], f32)
        return jnp.concatenate([zrow, x, zrow], axis=1)

    def pad_and_interleave_cols(x, W, stride):
        # x: (B, R, W, C) -> (B, R, stride*W + 2, C):
        #   column 0 / last column(s) zero (conv padding ring + output_padding), data
        #   column j lands at 1 + stride*j, zero columns in between (stride-2 deconv).
        # Built as ONE register concat of column slices: no scratch buffer, no
        # per-column masked stores (perf items 2 & 3).
        zc = jnp.zeros(x.shape[:2] + (1, x.shape[3]), f32)
        cols = [zc]
        for j in range(W):
            cols.append(x[:, :, j:j + 1, :])
            cols.extend([zc] * (stride - 1))
        cols.append(zc)
        return jnp.concatenate(cols, axis=2)

    def kernel(z_ref, fcw_ref, fcb_ref,
               w1_ref, b1_ref, g1_ref, be1_ref,
               w2_ref, b2_ref, g2_ref, be2_ref,
               w3_ref, b3_ref, eye_ref, o_ref):
        # ---------------- fc (single matmul, output already NHWC-ordered) ----------
        zf = (jnp.dot(z_ref[...], fcw_ref[...], preferred_element_type=f32)
              + fcb_ref[...])                                    # (B, h*w*C4)

        # Assemble the zero-padded deconv1 input entirely in registers (no masked
        # scatter stores, no scratch zero-fill/reload).  zf lanes are (y, x, c) so
        # each spatial site is a contiguous lane slice.
        # TODO(synk): a single zf.reshape(B, h, w, C4) slab (perf item 1) is tighter
        #             still; the slab-concat below is the lowering-portable form.
        zcol1 = jnp.zeros((B, 1, 1, C4), f32)
        row_list = []
        for yy in range(h):
            cols = [zcol1]
            for xx in range(w):
                c0 = (yy * w + xx) * C4
                cols.append(zf[:, c0:c0 + C4].reshape(B, 1, 1, C4))
            cols.append(zcol1)
            row_list.append(jnp.concatenate(cols, axis=2))       # (B, 1, w+2, C4)
        zrow1 = jnp.zeros((B, 1, w + 2, C4), f32)
        xpad1 = jnp.concatenate([zrow1] + row_list + [zrow1], axis=1)  # (B,h+2,w+2,C4)

        # ---------------- deconv1 (stride 1) + BN + ReLU ---------------------------
        y1 = bn_relu(conv3x3(xpad1, h, w, w1_ref, b1_ref), g1_ref, be1_ref)

        # ---------------- deconv2 (stride 2) + BN + ReLU ---------------------------
        x2 = interleave_rows(y1.reshape(B, h, w, C2))            # (B, 2h, w, C2)
        xpad2 = pad_and_interleave_cols(pad_rows(x2), w, 2)      # (B, 2h+2, 2w+2, C2)
        y2 = bn_relu(conv3x3(xpad2, 2 * h, 2 * w, w2_ref, b2_ref), g2_ref, be2_ref)

        # ---------------- deconv3 (stride 2), no norm / activation -----------------
        x3 = interleave_rows(y2.reshape(B, 2 * h, 2 * w, C1))    # (B, 4h, 2w, C1)
        xpad3 = pad_and_interleave_cols(pad_rows(x3), 2 * w, 2)  # (B, 4h+2, 4w+2, C1)
        y3 = conv3x3(xpad3, 4 * h, 4 * w, w3_ref, b3_ref)        # (B*Ny*Nx, Nch)

        # ------------- lane-dense NCHW store: (pix, C) -> (C, pix) on the MXU ------
        # eye is a precomputed kernel input (no in-kernel iota / vreg blow-up); the
        # B per-batch results are stacked and written with ONE full, unmasked store.
        P = 16 * h * w                                           # Ny * Nx
        y3b = y3.reshape(B, P, Nch)
        outs = [jax.lax.dot_general(                             # y3b[b].T via MXU
                    y3b[b], eye_ref[...], (((0,), (0,)), ((), ())),
                    preferred_element_type=f32)                  # (Nch, P)
                for b in range(B)]
        o_ref[...] = jnp.stack(outs, axis=0)                     # (B, Nch, P)

    return kernel


# --------------------------------------------------------------------------
# forward
# --------------------------------------------------------------------------

@functools.partial(jax.jit,
                   static_argnames=("Ny", "Nx", "conv_base_channel", "Nchannel"))
def parameter_decoder_forward(z, prepped, *, Ny, Nx, conv_base_channel, Nchannel):
    B = z.shape[0]
    h, w = Ny // 4, Nx // 4
    C4, C2, C1 = conv_base_channel * 4, conv_base_channel * 2, conv_base_channel

    kernel = _make_decoder_kernel(B, h, w, C4, C2, C1, Nchannel)

    out = pl.pallas_call(
        kernel,
        out_shape=jax.ShapeDtypeStruct((B, Nchannel, Ny * Nx), jnp.float32),
        # all operands are tiny and are brought whole into VMEM (no grid); headroom
        # left well below every generation's physical VMEM (v7x: 64 MiB).
        compiler_params=pltpu.CompilerParams(vmem_limit_bytes=32 * 1024 * 1024),
    )(z, prepped["fc_w"], prepped["fc_b"],
      prepped["w1"], prepped["b1"], prepped["g1"], prepped["be1"],
      prepped["w2"], prepped["b2"], prepped["g2"], prepped["be2"],
      prepped["w3"], prepped["b3"], prepped["eye"])

    # free metadata reshape only — the kernel already stored channel-major (NCHW) data
    return out.reshape(B, Nchannel, Ny, Nx)


# --------------------------------------------------------------------------
# main
# --------------------------------------------------------------------------

if __name__ == "__main__":
    B, Ny, Nx, Nchannel = 2, 16, 16, 3
    latent_dim, cbc = 8, 4            # conv_base_channel
    C4, C2, C1 = cbc * 4, cbc * 2, cbc
    flat_size = (Ny // 4) * (Nx // 4) * C4

    key = jax.random.PRNGKey(0)
    ks = jax.random.split(key, 12)
    f32 = jnp.float32
    params = {
        "fc_w": 0.1 * jax.random.normal(ks[0], (latent_dim, flat_size), f32),
        "fc_b": 0.1 * jax.random.normal(ks[1], (flat_size,), f32),
        # ConvTranspose2d weights in PyTorch layout (Cin, Cout, kH, kW)
        "d1_w": 0.1 * jax.random.normal(ks[2], (C4, C2, 3, 3), f32),
        "d1_b": 0.1 * jax.random.normal(ks[3], (C2,), f32),
        "d2_w": 0.1 * jax.random.normal(ks[4], (C2, C1, 3, 3), f32),
        "d2_b": 0.1 * jax.random.normal(ks[5], (C1,), f32),
        "d3_w": 0.1 * jax.random.normal(ks[6], (C1, Nchannel, 3, 3), f32),
        "d3_b": 0.1 * jax.random.normal(ks[7], (Nchannel,), f32),
        "bn1_g": 1.0 + 0.05 * jax.random.normal(ks[8], (C2,), f32),
        "bn1_b": 0.05 * jax.random.normal(ks[9], (C2,), f32),
        "bn2_g": 1.0 + 0.05 * jax.random.normal(ks[10], (C1,), f32),
        "bn2_b": 0.05 * jax.random.normal(ks[11], (C1,), f32),
    }

    prepped = prepare_params(params, Ny, Nx, cbc)      # hoisted, done once
    z = jax.random.normal(jax.random.PRNGKey(42), (B, latent_dim), f32)

    out = parameter_decoder_forward(z, prepped, Ny=Ny, Nx=Nx,
                                    conv_base_channel=cbc, Nchannel=Nchannel)
    out = jax.block_until_ready(out)
    assert out.shape == (B, Nchannel, Ny, Nx), out.shape
    assert bool(jnp.all(jnp.isfinite(out)))
    print("KERNEL_OK")
</pallas_src>

<mosaic_0001>
module attributes {stable_mosaic.version = 11 : i64} {
  func.func @kernel(%arg0: memref<2x8xf32, #tpu.memory_space<vmem>>, %arg1: memref<8x256xf32, #tpu.memory_space<vmem>>, %arg2: memref<1x256xf32, #tpu.memory_space<vmem>>, %arg3: memref<144x8xf32, #tpu.memory_space<vmem>>, %arg4: memref<1x8xf32, #tpu.memory_space<vmem>>, %arg5: memref<1x8xf32, #tpu.memory_space<vmem>>, %arg6: memref<1x8xf32, #tpu.memory_space<vmem>>, %arg7: memref<72x4xf32, #tpu.memory_space<vmem>>, %arg8: memref<1x4xf32, #tpu.memory_space<vmem>>, %arg9: memref<1x4xf32, #tpu.memory_space<vmem>>, %arg10: memref<1x4xf32, #tpu.memory_space<vmem>>, %arg11: memref<36x3xf32, #tpu.memory_space<vmem>>, %arg12: memref<1x3xf32, #tpu.memory_space<vmem>>, %arg13: memref<256x256xf32, #tpu.memory_space<vmem>>, %arg14: memref<2x3x256xf32, #tpu.memory_space<vmem>>) attributes {dimension_semantics = [], scalar_prefetch = 0 : i64, scratch_operands = 0 : i64, tpu.core_type = #tpu.core_type<tc>} {
    %c0 = arith.constant 0 : index
    %c0_0 = arith.constant 0 : index
    %0 = vector.load %arg0[%c0, %c0_0] : memref<2x8xf32, #tpu.memory_space<vmem>>, vector<2x8xf32>
    %c0_1 = arith.constant 0 : index
    %c0_2 = arith.constant 0 : index
    %1 = vector.load %arg1[%c0_1, %c0_2] : memref<8x256xf32, #tpu.memory_space<vmem>>, vector<8x256xf32>
    %cst = arith.constant dense<0.000000e+00> : vector<2x256xf32>
    %2 = tpu.matmul %0, %1, %cst {dimension_numbers = #tpu.dot_dimension_numbers<[1], [0], [0], [1], [0, 0, 1, 1], [], []>} : vector<2x8xf32>, vector<8x256xf32>, vector<2x256xf32> -> vector<2x256xf32>
    %c0_3 = arith.constant 0 : index
    %c0_4 = arith.constant 0 : index
    %3 = vector.load %arg2[%c0_3, %c0_4] : memref<1x256xf32, #tpu.memory_space<vmem>>, vector<1x256xf32>
    %4 = vector.broadcast %3 : vector<1x256xf32> to vector<2x256xf32>
    %5 = arith.addf %2, %4 : vector<2x256xf32>
    %cst_5 = arith.constant 0.000000e+00 : f32
    %6 = vector.broadcast %cst_5 : f32 to vector<2x1x1x16xf32>
    %7 = vector.extract_strided_slice %5 {offsets = [0, 0], sizes = [2, 16], strides = [1, 1]} : vector<2x256xf32> to vector<2x16xf32>
    %8 = vector.shape_cast %7 : vector<2x16xf32> to vector<2x1x1x16xf32>
    %9 = vector.extract_strided_slice %5 {offsets = [0, 16], sizes = [2, 16], strides = [1, 1]} : vector<2x256xf32> to vector<2x16xf32>
    %10 = vector.shape_cast %9 : vector<2x16xf32> to vector<2x1x1x16xf32>
    %11 = vector.extract_strided_slice %5 {offsets = [0, 32], sizes = [2, 16], strides = [1, 1]} : vector<2x256xf32> to vector<2x16xf32>
    %12 = vector.shape_cast %11 : vector<2x16xf32> to vector<2x1x1x16xf32>
    %13 = vector.extract_strided_slice %5 {offsets = [0, 48], sizes = [2, 16], strides = [1, 1]} : vector<2x256xf32> to vector<2x16xf32>
    %14 = vector.shape_cast %13 : vector<2x16xf32> to vector<2x1x1x16xf32>
    %15 = tpu.concatenate %6, %8, %10, %12, %14, %6 in 2 : vector<2x1x1x16xf32>, vector<2x1x1x16xf32>, vector<2x1x1x16xf32>, vector<2x1x1x16xf32>, vector<2x1x1x16xf32>, vector<2x1x1x16xf32> -> vector<2x1x6x16xf32>
    %16 = vector.extract_strided_slice %5 {offsets = [0, 64], sizes = [2, 16], strides = [1, 1]} : vector<2x256xf32> to vector<2x16xf32>
    %17 = vector.shape_cast %16 : vector<2x16xf32> to vector<2x1x1x16xf32>
    %18 = vector.extract_strided_slice %5 {offsets = [0, 80], sizes = [2, 16], strides = [1, 1]} : vector<2x256xf32> to vector<2x16xf32>
    %19 = vector.shape_cast %18 : vector<2x16xf32> to vector<2x1x1x16xf32>
    %20 = vector.extract_strided_slice %5 {offsets = [0, 96], sizes = [2, 16], strides = [1, 1]} : vector<2x256xf32> to vector<2x16xf32>
    %21 = vector.shape_cast %20 : vector<2x16xf32> to vector<2x1x1x16xf32>
    %22 = vector.extract_strided_slice %5 {offsets = [0, 112], sizes = [2, 16], strides = [1, 1]} : vector<2x256xf32> to vector<2x16xf32>
    %23 = vector.shape_cast %22 : vector<2x16xf32> to vector<2x1x1x16xf32>
    %24 = tpu.concatenate %6, %17, %19, %21, %23, %6 in 2 : vector<2x1x1x16xf32>, vector<2x1x1x16xf32>, vector<2x1x1x16xf32>, vector<2x1x1x16xf32>, vector<2x1x1x16xf32>, vector<2x1x1x16xf32> -> vector<2x1x6x16xf32>
    %25 = vector.extract_strided_slice %5 {offsets = [0, 128], sizes = [2, 16], strides = [1, 1]} : vector<2x256xf32> to vector<2x16xf32>
    %26 = vector.shape_cast %25 : vector<2x16xf32> to vector<2x1x1x16xf32>
    %27 = vector.extract_strided_slice %5 {offsets = [0, 144], sizes = [2, 16], strides = [1, 1]} : vector<2x256xf32> to vector<2x16xf32>
    %28 = vector.shape_cast %27 : vector<2x16xf32> to vector<2x1x1x16xf32>
    %29 = vector.extract_strided_slice %5 {offsets = [0, 160], sizes = [2, 16], strides = [1, 1]} : vector<2x256xf32> to vector<2x16xf32>
    %30 = vector.shape_cast %29 : vector<2x16xf32> to vector<2x1x1x16xf32>
    %31 = vector.extract_strided_slice %5 {offsets = [0, 176], sizes = [2, 16], strides = [1, 1]} : vector<2x256xf32> to vector<2x16xf32>
    %32 = vector.shape_cast %31 : vector<2x16xf32> to vector<2x1x1x16xf32>
    %33 = tpu.concatenate %6, %26, %28, %30, %32, %6 in 2 : vector<2x1x1x16xf32>, vector<2x1x1x16xf32>, vector<2x1x1x16xf32>, vector<2x1x1x16xf32>, vector<2x1x1x16xf32>, vector<2x1x1x16xf32> -> vector<2x1x6x16xf32>
    %34 = vector.extract_strided_slice %5 {offsets = [0, 192], sizes = [2, 16], strides = [1, 1]} : vector<2x256xf32> to vector<2x16xf32>
    %35 = vector.shape_cast %34 : vector<2x16xf32> to vector<2x1x1x16xf32>
    %36 = vector.extract_strided_slice %5 {offsets = [0, 208], sizes = [2, 16], strides = [1, 1]} : vector<2x256xf32> to vector<2x16xf32>
    %37 = vector.shape_cast %36 : vector<2x16xf32> to vector<2x1x1x16xf32>
    %38 = vector.extract_strided_slice %5 {offsets = [0, 224], sizes = [2, 16], strides = [1, 1]} : vector<2x256xf32> to vector<2x16xf32>
    %39 = vector.shape_cast %38 : vector<2x16xf32> to vector<2x1x1x16xf32>
    %40 = vector.extract_strided_slice %5 {offsets = [0, 240], sizes = [2, 16], strides = [1, 1]} : vector<2x256xf32> to vector<2x16xf32>
    %41 = vector.shape_cast %40 : vector<2x16xf32> to vector<2x1x1x16xf32>
    %42 = tpu.concatenate %6, %35, %37, %39, %41, %6 in 2 : vector<2x1x1x16xf32>, vector<2x1x1x16xf32>, vector<2x1x1x16xf32>, vector<2x1x1x16xf32>, vector<2x1x1x16xf32>, vector<2x1x1x16xf32> -> vector<2x1x6x16xf32>
    %cst_6 = arith.constant 0.000000e+00 : f32
    %43 = vector.broadcast %cst_6 : f32 to vector<2x1x6x16xf32>
    %44 = tpu.concatenate %43, %15, %24, %33, %42, %43 in 1 : vector<2x1x6x16xf32>, vector<2x1x6x16xf32>, vector<2x1x6x16xf32>, vector<2x1x6x16xf32>, vector<2x1x6x16xf32>, vector<2x1x6x16xf32> -> vector<2x6x6x16xf32>
    %45 = vector.extract_strided_slice %44 {offsets = [0, 0, 0, 0], sizes = [2, 4, 4, 16], strides = [1, 1, 1, 1]} : vector<2x6x6x16xf32> to vector<2x4x4x16xf32>
    %46 = vector.extract_strided_slice %44 {offsets = [0, 0, 1, 0], sizes = [2, 4, 4, 16], strides = [1, 1, 1, 1]} : vector<2x6x6x16xf32> to vector<2x4x4x16xf32>
    %47 = vector.extract_strided_slice %44 {offsets = [0, 0, 2, 0], sizes = [2, 4, 4, 16], strides = [1, 1, 1, 1]} : vector<2x6x6x16xf32> to vector<2x4x4x16xf32>
    %48 = vector.extract_strided_slice %44 {offsets = [0, 1, 0, 0], sizes = [2, 4, 4, 16], strides = [1, 1, 1, 1]} : vector<2x6x6x16xf32> to vector<2x4x4x16xf32>
    %49 = vector.extract_strided_slice %44 {offsets = [0, 1, 1, 0], sizes = [2, 4, 4, 16], strides = [1, 1, 1, 1]} : vector<2x6x6x16xf32> to vector<2x4x4x16xf32>
    %50 = vector.extract_strided_slice %44 {offsets = [0, 1, 2, 0], sizes = [2, 4, 4, 16], strides = [1, 1, 1, 1]} : vector<2x6x6x16xf32> to vector<2x4x4x16xf32>
    %51 = vector.extract_strided_slice %44 {offsets = [0, 2, 0, 0], sizes = [2, 4, 4, 16], strides = [1, 1, 1, 1]} : vector<2x6x6x16xf32> to vector<2x4x4x16xf32>
    %52 = vector.extract_strided_slice %44 {offsets = [0, 2, 1, 0], sizes = [2, 4, 4, 16], strides = [1, 1, 1, 1]} : vector<2x6x6x16xf32> to vector<2x4x4x16xf32>
    %53 = vector.extract_strided_slice %44 {offsets = [0, 2, 2, 0], sizes = [2, 4, 4, 16], strides = [1, 1, 1, 1]} : vector<2x6x6x16xf32> to vector<2x4x4x16xf32>
    %54 = tpu.concatenate %45, %46, %47, %48, %49, %50, %51, %52, %53 in 3 : vector<2x4x4x16xf32>, vector<2x4x4x16xf32>, vector<2x4x4x16xf32>, vector<2x4x4x16xf32>, vector<2x4x4x16xf32>, vector<2x4x4x16xf32>, vector<2x4x4x16xf32>, vector<2x4x4x16xf32>, vector<2x4x4x16xf32> -> vector<2x4x4x144xf32>
    %55 = vector.shape_cast %54 : vector<2x4x4x144xf32> to vector<32x144xf32>
    %c0_7 = arith.constant 0 : index
    %c0_8 = arith.constant 0 : index
    %56 = vector.load %arg3[%c0_7, %c0_8] : memref<144x8xf32, #tpu.memory_space<vmem>>, vector<144x8xf32>
    %cst_9 = arith.constant dense<0.000000e+00> : vector<32x8xf32>
    %57 = tpu.matmul %55, %56, %cst_9 {dimension_numbers = #tpu.dot_dimension_numbers<[1], [0], [0], [1], [0, 0, 1, 1], [], []>} : vector<32x144xf32>, vector<144x8xf32>, vector<32x8xf32> -> vector<32x8xf32>
    %c0_10 = arith.constant 0 : index
    %c0_11 = arith.constant 0 : index
    %58 = vector.load %arg4[%c0_10, %c0_11] : memref<1x8xf32, #tpu.memory_space<vmem>>, vector<1x8xf32>
    %59 = vector.broadcast %58 : vector<1x8xf32> to vector<32x8xf32>
    %60 = arith.addf %57, %59 : vector<32x8xf32>
    %cst_12 = arith.constant dense<0.000000e+00> : vector<8xf32>
    %61 = vector.multi_reduction <add>, %60, %cst_12 [0] : vector<32x8xf32> to vector<8xf32>
    %62 = vector.shape_cast %61 : vector<8xf32> to vector<1x8xf32>
    %cst_13 = arith.constant 3.125000e-02 : f32
    %63 = vector.broadcast %cst_13 : f32 to vector<1x8xf32>
    %64 = arith.mulf %62, %63 : vector<1x8xf32>
    %65 = vector.broadcast %64 : vector<1x8xf32> to vector<32x8xf32>
    %66 = arith.subf %60, %65 : vector<32x8xf32>
    %67 = arith.mulf %66, %66 : vector<32x8xf32>
    %cst_14 = arith.constant dense<0.000000e+00> : vector<8xf32>
    %68 = vector.multi_reduction <add>, %67, %cst_14 [0] : vector<32x8xf32> to vector<8xf32>
    %69 = vector.shape_cast %68 : vector<8xf32> to vector<1x8xf32>
    %cst_15 = arith.constant 3.125000e-02 : f32
    %70 = vector.broadcast %cst_15 : f32 to vector<1x8xf32>
    %71 = arith.mulf %69, %70 : vector<1x8xf32>
    %c0_16 = arith.constant 0 : index
    %c0_17 = arith.constant 0 : index
    %72 = vector.load %arg5[%c0_16, %c0_17] : memref<1x8xf32, #tpu.memory_space<vmem>>, vector<1x8xf32>
    %cst_18 = arith.constant 9.99999974E-6 : f32
    %73 = vector.broadcast %cst_18 : f32 to vector<1x8xf32>
    %74 = arith.addf %71, %73 : vector<1x8xf32>
    %75 = math.rsqrt %74 : vector<1x8xf32>
    %76 = arith.mulf %72, %75 : vector<1x8xf32>
    %77 = vector.broadcast %76 : vector<1x8xf32> to vector<32x8xf32>
    %78 = arith.mulf %66, %77 : vector<32x8xf32>
    %c0_19 = arith.constant 0 : index
    %c0_20 = arith.constant 0 : index
    %79 = vector.load %arg6[%c0_19, %c0_20] : memref<1x8xf32, #tpu.memory_space<vmem>>, vector<1x8xf32>
    %80 = vector.broadcast %79 : vector<1x8xf32> to vector<32x8xf32>
    %81 = arith.addf %78, %80 : vector<32x8xf32>
    %cst_21 = arith.constant 0.000000e+00 : f32
    %82 = vector.broadcast %cst_21 : f32 to vector<32x8xf32>
    %83 = arith.maximumf %81, %82 : vector<32x8xf32>
    %84 = vector.shape_cast %83 : vector<32x8xf32> to vector<2x4x4x8xf32>
    %85 = vector.shape_cast %84 : vector<2x4x4x8xf32> to vector<2x4x1x4x8xf32>
    %cst_22 = arith.constant 0.000000e+00 : f32
    %86 = vector.broadcast %cst_22 : f32 to vector<2x4x1x4x8xf32>
    %87 = tpu.concatenate %85, %86 in 2 : vector<2x4x1x4x8xf32>, vector<2x4x1x4x8xf32> -> vector<2x4x2x4x8xf32>
    %88 = vector.shape_cast %87 : vector<2x4x2x4x8xf32> to vector<2x8x4x8xf32>
    %cst_23 = arith.constant 0.000000e+00 : f32
    %89 = vector.broadcast %cst_23 : f32 to vector<2x1x4x8xf32>
    %90 = tpu.concatenate %89, %88, %89 in 1 : vector<2x1x4x8xf32>, vector<2x8x4x8xf32>, vector<2x1x4x8xf32> -> vector<2x10x4x8xf32>
    %cst_24 = arith.constant 0.000000e+00 : f32
    %91 = vector.broadcast %cst_24 : f32 to vector<2x10x1x8xf32>
    %92 = vector.extract_strided_slice %90 {offsets = [0, 0, 0, 0], sizes = [2, 10, 1, 8], strides = [1, 1, 1, 1]} : vector<2x10x4x8xf32> to vector<2x10x1x8xf32>
    %93 = vector.extract_strided_slice %90 {offsets = [0, 0, 1, 0], sizes = [2, 10, 1, 8], strides = [1, 1, 1, 1]} : vector<2x10x4x8xf32> to vector<2x10x1x8xf32>
    %94 = vector.extract_strided_slice %90 {offsets = [0, 0, 2, 0], sizes = [2, 10, 1, 8], strides = [1, 1, 1, 1]} : vector<2x10x4x8xf32> to vector<2x10x1x8xf32>
    %95 = vector.extract_strided_slice %90 {offsets = [0, 0, 3, 0], sizes = [2, 10, 1, 8], strides = [1, 1, 1, 1]} : vector<2x10x4x8xf32> to vector<2x10x1x8xf32>
    %96 = tpu.concatenate %91, %92, %91, %93, %91, %94, %91, %95, %91, %91 in 2 : vector<2x10x1x8xf32>, vector<2x10x1x8xf32>, vector<2x10x1x8xf32>, vector<2x10x1x8xf32>, vector<2x10x1x8xf32>, vector<2x10x1x8xf32>, vector<2x10x1x8xf32>, vector<2x10x1x8xf32>, vector<2x10x1x8xf32>, vector<2x10x1x8xf32> -> vector<2x10x10x8xf32>
    %97 = vector.extract_strided_slice %96 {offsets = [0, 0, 0, 0], sizes = [2, 8, 8, 8], strides = [1, 1, 1, 1]} : vector<2x10x10x8xf32> to vector<2x8x8x8xf32>
    %98 = vector.extract_strided_slice %96 {offsets = [0, 0, 1, 0], sizes = [2, 8, 8, 8], strides = [1, 1, 1, 1]} : vector<2x10x10x8xf32> to vector<2x8x8x8xf32>
    %99 = vector.extract_strided_slice %96 {offsets = [0, 0, 2, 0], sizes = [2, 8, 8, 8], strides = [1, 1, 1, 1]} : vector<2x10x10x8xf32> to vector<2x8x8x8xf32>
    %100 = vector.extract_strided_slice %96 {offsets = [0, 1, 0, 0], sizes = [2, 8, 8, 8], strides = [1, 1, 1, 1]} : vector<2x10x10x8xf32> to vector<2x8x8x8xf32>
    %101 = vector.extract_strided_slice %96 {offsets = [0, 1, 1, 0], sizes = [2, 8, 8, 8], strides = [1, 1, 1, 1]} : vector<2x10x10x8xf32> to vector<2x8x8x8xf32>
    %102 = vector.extract_strided_slice %96 {offsets = [0, 1, 2, 0], sizes = [2, 8, 8, 8], strides = [1, 1, 1, 1]} : vector<2x10x10x8xf32> to vector<2x8x8x8xf32>
    %103 = vector.extract_strided_slice %96 {offsets = [0, 2, 0, 0], sizes = [2, 8, 8, 8], strides = [1, 1, 1, 1]} : vector<2x10x10x8xf32> to vector<2x8x8x8xf32>
    %104 = vector.extract_strided_slice %96 {offsets = [0, 2, 1, 0], sizes = [2, 8, 8, 8], strides = [1, 1, 1, 1]} : vector<2x10x10x8xf32> to vector<2x8x8x8xf32>
    %105 = vector.extract_strided_slice %96 {offsets = [0, 2, 2, 0], sizes = [2, 8, 8, 8], strides = [1, 1, 1, 1]} : vector<2x10x10x8xf32> to vector<2x8x8x8xf32>
    %106 = tpu.concatenate %97, %98, %99, %100, %101, %102, %103, %104, %105 in 3 : vector<2x8x8x8xf32>, vector<2x8x8x8xf32>, vector<2x8x8x8xf32>, vector<2x8x8x8xf32>, vector<2x8x8x8xf32>, vector<2x8x8x8xf32>, vector<2x8x8x8xf32>, vector<2x8x8x8xf32>, vector<2x8x8x8xf32> -> vector<2x8x8x72xf32>
    %107 = vector.shape_cast %106 : vector<2x8x8x72xf32> to vector<128x72xf32>
    %c0_25 = arith.constant 0 : index
    %c0_26 = arith.constant 0 : index
    %108 = vector.load %arg7[%c0_25, %c0_26] : memref<72x4xf32, #tpu.memory_space<vmem>>, vector<72x4xf32>
    %cst_27 = arith.constant dense<0.000000e+00> : vector<128x4xf32>
    %109 = tpu.matmul %107, %108, %cst_27 {dimension_numbers = #tpu.dot_dimension_numbers<[1], [0], [0], [1], [0, 0, 1, 1], [], []>} : vector<128x72xf32>, vector<72x4xf32>, vector<128x4xf32> -> vector<128x4xf32>
    %c0_28 = arith.constant 0 : index
    %c0_29 = arith.constant 0 : index
    %110 = vector.load %arg8[%c0_28, %c0_29] : memref<1x4xf32, #tpu.memory_space<vmem>>, vector<1x4xf32>
    %111 = vector.broadcast %110 : vector<1x4xf32> to vector<128x4xf32>
    %112 = arith.addf %109, %111 : vector<128x4xf32>
    %cst_30 = arith.constant dense<0.000000e+00> : vector<4xf32>
    %113 = vector.multi_reduction <add>, %112, %cst_30 [0] : vector<128x4xf32> to vector<4xf32>
    %114 = vector.shape_cast %113 : vector<4xf32> to vector<1x4xf32>
    %cst_31 = arith.constant 7.812500e-03 : f32
    %115 = vector.broadcast %cst_31 : f32 to vector<1x4xf32>
    %116 = arith.mulf %114, %115 : vector<1x4xf32>
    %117 = vector.broadcast %116 : vector<1x4xf32> to vector<128x4xf32>
    %118 = arith.subf %112, %117 : vector<128x4xf32>
    %119 = arith.mulf %118, %118 : vector<128x4xf32>
    %cst_32 = arith.constant dense<0.000000e+00> : vector<4xf32>
    %120 = vector.multi_reduction <add>, %119, %cst_32 [0] : vector<128x4xf32> to vector<4xf32>
    %121 = vector.shape_cast %120 : vector<4xf32> to vector<1x4xf32>
    %cst_33 = arith.constant 7.812500e-03 : f32
    %122 = vector.broadcast %cst_33 : f32 to vector<1x4xf32>
    %123 = arith.mulf %121, %122 : vector<1x4xf32>
    %c0_34 = arith.constant 0 : index
    %c0_35 = arith.constant 0 : index
    %124 = vector.load %arg9[%c0_34, %c0_35] : memref<1x4xf32, #tpu.memory_space<vmem>>, vector<1x4xf32>
    %cst_36 = arith.constant 9.99999974E-6 : f32
    %125 = vector.broadcast %cst_36 : f32 to vector<1x4xf32>
    %126 = arith.addf %123, %125 : vector<1x4xf32>
    %127 = math.rsqrt %126 : vector<1x4xf32>
    %128 = arith.mulf %124, %127 : vector<1x4xf32>
    %129 = vector.broadcast %128 : vector<1x4xf32> to vector<128x4xf32>
    %130 = arith.mulf %118, %129 : vector<128x4xf32>
    %c0_37 = arith.constant 0 : index
    %c0_38 = arith.constant 0 : index
    %131 = vector.load %arg10[%c0_37, %c0_38] : memref<1x4xf32, #tpu.memory_space<vmem>>, vector<1x4xf32>
    %132 = vector.broadcast %131 : vector<1x4xf32> to vector<128x4xf32>
    %133 = arith.addf %130, %132 : vector<128x4xf32>
    %cst_39 = arith.constant 0.000000e+00 : f32
    %134 = vector.broadcast %cst_39 : f32 to vector<128x4xf32>
    %135 = arith.maximumf %133, %134 : vector<128x4xf32>
    %136 = vector.shape_cast %135 : vector<128x4xf32> to vector<2x8x8x4xf32>
    %137 = vector.shape_cast %136 : vector<2x8x8x4xf32> to vector<2x8x1x8x4xf32>
    %cst_40 = arith.constant 0.000000e+00 : f32
    %138 = vector.broadcast %cst_40 : f32 to vector<2x8x1x8x4xf32>
    %139 = tpu.concatenate %137, %138 in 2 : vector<2x8x1x8x4xf32>, vector<2x8x1x8x4xf32> -> vector<2x8x2x8x4xf32>
    %140 = vector.shape_cast %139 : vector<2x8x2x8x4xf32> to vector<2x16x8x4xf32>
    %cst_41 = arith.constant 0.000000e+00 : f32
    %141 = vector.broadcast %cst_41 : f32 to vector<2x1x8x4xf32>
    %142 = tpu.concatenate %141, %140, %141 in 1 : vector<2x1x8x4xf32>, vector<2x16x8x4xf32>, vector<2x1x8x4xf32> -> vector<2x18x8x4xf32>
    %cst_42 = arith.constant 0.000000e+00 : f32
    %143 = vector.broadcast %cst_42 : f32 to vector<2x18x1x4xf32>
    %144 = vector.extract_strided_slice %142 {offsets = [0, 0, 0, 0], sizes = [2, 18, 1, 4], strides = [1, 1, 1, 1]} : vector<2x18x8x4xf32> to vector<2x18x1x4xf32>
    %145 = vector.extract_strided_slice %142 {offsets = [0, 0, 1, 0], sizes = [2, 18, 1, 4], strides = [1, 1, 1, 1]} : vector<2x18x8x4xf32> to vector<2x18x1x4xf32>
    %146 = vector.extract_strided_slice %142 {offsets = [0, 0, 2, 0], sizes = [2, 18, 1, 4], strides = [1, 1, 1, 1]} : vector<2x18x8x4xf32> to vector<2x18x1x4xf32>
    %147 = vector.extract_strided_slice %142 {offsets = [0, 0, 3, 0], sizes = [2, 18, 1, 4], strides = [1, 1, 1, 1]} : vector<2x18x8x4xf32> to vector<2x18x1x4xf32>
    %148 = vector.extract_strided_slice %142 {offsets = [0, 0, 4, 0], sizes = [2, 18, 1, 4], strides = [1, 1, 1, 1]} : vector<2x18x8x4xf32> to vector<2x18x1x4xf32>
    %149 = vector.extract_strided_slice %142 {offsets = [0, 0, 5, 0], sizes = [2, 18, 1, 4], strides = [1, 1, 1, 1]} : vector<2x18x8x4xf32> to vector<2x18x1x4xf32>
    %150 = vector.extract_strided_slice %142 {offsets = [0, 0, 6, 0], sizes = [2, 18, 1, 4], strides = [1, 1, 1, 1]} : vector<2x18x8x4xf32> to vector<2x18x1x4xf32>
    %151 = vector.extract_strided_slice %142 {offsets = [0, 0, 7, 0], sizes = [2, 18, 1, 4], strides = [1, 1, 1, 1]} : vector<2x18x8x4xf32> to vector<2x18x1x4xf32>
    %152 = tpu.concatenate %143, %144, %143, %145, %143, %146, %143, %147, %143, %148, %143, %149, %143, %150, %143, %151 in 2 : vector<2x18x1x4xf32>, vector<2x18x1x4xf32>, vector<2x18x1x4xf32>, vector<2x18x1x4xf32>, vector<2x18x1x4xf32>, vector<2x18x1x4xf32>, vector<2x18x1x4xf32>, vector<2x18x1x4xf32>, vector<2x18x1x4xf32>, vector<2x18x1x4xf32>, vector<2x18x1x4xf32>, vector<2x18x1x4xf32>, vector<2x18x1x4xf32>, vector<2x18x1x4xf32>, vector<2x18x1x4xf32>, vector<2x18x1x4xf32> -> vector<2x18x16x4xf32>
    %153 = tpu.concatenate %143, %143 in 2 : vector<2x18x1x4xf32>, vector<2x18x1x4xf32> -> vector<2x18x2x4xf32>
    %154 = tpu.concatenate %152, %153 in 2 : vector<2x18x16x4xf32>, vector<2x18x2x4xf32> -> vector<2x18x18x4xf32>
    %155 = vector.extract_strided_slice %154 {offsets = [0, 0, 0, 0], sizes = [2, 16, 16, 4], strides = [1, 1, 1, 1]} : vector<2x18x18x4xf32> to vector<2x16x16x4xf32>
    %156 = vector.extract_strided_slice %154 {offsets = [0, 0, 1, 0], sizes = [2, 16, 16, 4], strides = [1, 1, 1, 1]} : vector<2x18x18x4xf32> to vector<2x16x16x4xf32>
    %157 = vector.extract_strided_slice %154 {offsets = [0, 0, 2, 0], sizes = [2, 16, 16, 4], strides = [1, 1, 1, 1]} : vector<2x18x18x4xf32> to vector<2x16x16x4xf32>
    %158 = vector.extract_strided_slice %154 {offsets = [0, 1, 0, 0], sizes = [2, 16, 16, 4], strides = [1, 1, 1, 1]} : vector<2x18x18x4xf32> to vector<2x16x16x4xf32>
    %159 = vector.extract_strided_slice %154 {offsets = [0, 1, 1, 0], sizes = [2, 16, 16, 4], strides = [1, 1, 1, 1]} : vector<2x18x18x4xf32> to vector<2x16x16x4xf32>
    %160 = vector.extract_strided_slice %154 {offsets = [0, 1, 2, 0], sizes = [2, 16, 16, 4], strides = [1, 1, 1, 1]} : vector<2x18x18x4xf32> to vector<2x16x16x4xf32>
    %161 = vector.extract_strided_slice %154 {offsets = [0, 2, 0, 0], sizes = [2, 16, 16, 4], strides = [1, 1, 1, 1]} : vector<2x18x18x4xf32> to vector<2x16x16x4xf32>
    %162 = vector.extract_strided_slice %154 {offsets = [0, 2, 1, 0], sizes = [2, 16, 16, 4], strides = [1, 1, 1, 1]} : vector<2x18x18x4xf32> to vector<2x16x16x4xf32>
    %163 = vector.extract_strided_slice %154 {offsets = [0, 2, 2, 0], sizes = [2, 16, 16, 4], strides = [1, 1, 1, 1]} : vector<2x18x18x4xf32> to vector<2x16x16x4xf32>
    %164 = tpu.concatenate %155, %156, %157, %158, %159, %160, %161, %162, %163 in 3 : vector<2x16x16x4xf32>, vector<2x16x16x4xf32>, vector<2x16x16x4xf32>, vector<2x16x16x4xf32>, vector<2x16x16x4xf32>, vector<2x16x16x4xf32>, vector<2x16x16x4xf32>, vector<2x16x16x4xf32>, vector<2x16x16x4xf32> -> vector<2x16x16x36xf32>
    %165 = vector.shape_cast %164 : vector<2x16x16x36xf32> to vector<512x36xf32>
    %c0_43 = arith.constant 0 : index
    %c0_44 = arith.constant 0 : index
    %166 = vector.load %arg11[%c0_43, %c0_44] : memref<36x3xf32, #tpu.memory_space<vmem>>, vector<36x3xf32>
    %cst_45 = arith.constant dense<0.000000e+00> : vector<512x3xf32>
    %167 = tpu.matmul %165, %166, %cst_45 {dimension_numbers = #tpu.dot_dimension_numbers<[1], [0], [0], [1], [0, 0, 1, 1], [], []>} : vector<512x36xf32>, vector<36x3xf32>, vector<512x3xf32> -> vector<512x3xf32>
    %c0_46 = arith.constant 0 : index
    %c0_47 = arith.constant 0 : index
    %168 = vector.load %arg12[%c0_46, %c0_47] : memref<1x3xf32, #tpu.memory_space<vmem>>, vector<1x3xf32>
    %169 = vector.broadcast %168 : vector<1x3xf32> to vector<512x3xf32>
    %170 = arith.addf %167, %169 : vector<512x3xf32>
    %171 = vector.shape_cast %170 : vector<512x3xf32> to vector<2x256x3xf32>
    %172 = vector.extract_strided_slice %171 {offsets = [0, 0, 0], sizes = [1, 256, 3], strides = [1, 1, 1]} : vector<2x256x3xf32> to vector<1x256x3xf32>
    %173 = vector.shape_cast %172 : vector<1x256x3xf32> to vector<256x3xf32>
    %c0_48 = arith.constant 0 : index
    %c0_49 = arith.constant 0 : index
    %174 = vector.load %arg13[%c0_48, %c0_49] : memref<256x256xf32, #tpu.memory_space<vmem>>, vector<256x256xf32>
    %cst_50 = arith.constant dense<0.000000e+00> : vector<3x256xf32>
    %175 = tpu.matmul %173, %174, %cst_50 {dimension_numbers = #tpu.dot_dimension_numbers<[0], [0], [1], [1], [0, 1, 1, 1], [], []>} : vector<256x3xf32>, vector<256x256xf32>, vector<3x256xf32> -> vector<3x256xf32>
    %176 = vector.extract_strided_slice %171 {offsets = [1, 0, 0], sizes = [1, 256, 3], strides = [1, 1, 1]} : vector<2x256x3xf32> to vector<1x256x3xf32>
    %177 = vector.shape_cast %176 : vector<1x256x3xf32> to vector<256x3xf32>
    %c0_51 = arith.constant 0 : index
    %c0_52 = arith.constant 0 : index
    %178 = vector.load %arg13[%c0_51, %c0_52] : memref<256x256xf32, #tpu.memory_space<vmem>>, vector<256x256xf32>
    %cst_53 = arith.constant dense<0.000000e+00> : vector<3x256xf32>
    %179 = tpu.matmul %177, %178, %cst_53 {dimension_numbers = #tpu.dot_dimension_numbers<[0], [0], [1], [1], [0, 1, 1, 1], [], []>} : vector<256x3xf32>, vector<256x256xf32>, vector<3x256xf32> -> vector<3x256xf32>
    %180 = vector.shape_cast %175 : vector<3x256xf32> to vector<1x3x256xf32>
    %181 = vector.shape_cast %179 : vector<3x256xf32> to vector<1x3x256xf32>
    %182 = tpu.concatenate %180, %181 in 0 : vector<1x3x256xf32>, vector<1x3x256xf32> -> vector<2x3x256xf32>
    %c0_54 = arith.constant 0 : index
    %c0_55 = arith.constant 0 : index
    %c0_56 = arith.constant 0 : index
    %183 = vector.load %arg14[%c0_54, %c0_55, %c0_56] : memref<2x3x256xf32, #tpu.memory_space<vmem>>, vector<2x3x256xf32>
    tpu.vector_store %arg14[%c0_54, %c0_55, %c0_56], %182 {strides = array<i32>} : memref<2x3x256xf32, #tpu.memory_space<vmem>>, vector<2x3x256xf32>,
    return
  }
}

</mosaic_0001>

<bundles_post_ra>
// kernel: parameter_decoder_forward.1
= control target key start
LH: loop header
LB: loop body
LE: loop exit
PB: predicated region body
PF: predicated region fallthrough
CT: control target
= control target key end

     0   :  { %19 = vsyncpa [#allocation3], 0  ;;  %s4479_s16 = smov [#allocation2]   ;;  %s4480_s18 = smov 256   ;;  %s8832_s0 = inlined_call_operand.vmem [shape: f32[2,8], index: 0, kind: input, shape index: {}]   ;;  %s8833_s1 = inlined_call_operand.vmem [shape: f32[8,256], index: 1, kind: input, shape index: {}]   ;;  %s8834_s2 = inlined_call_operand.vmem [shape: f32[1,256], index: 2, kind: input, shape index: {}]   ;;  %s8835_s3 = inlined_call_operand.vmem [shape: f32[144,8], index: 3, kind: input, shape index: {}]   ;;  %s8836_s4 = inlined_call_operand.vmem [shape: f32[1,8], index: 4, kind: input, shape index: {}]   ;;  %s8837_s5 = inlined_call_operand.vmem [shape: f32[1,8], index: 5, kind: input, shape index: {}]   ;;  %s8838_s6 = inlined_call_operand.vmem [shape: f32[1,8], index: 6, kind: input, shape index: {}]   ;;  %s8839_s7 = inlined_call_operand.vmem [shape: f32[72,4], index: 7, kind: input, shape index: {}]   ;;  %s8840_s8 = inlined_call_operand.vmem [shape: f32[1,4], index: 8, kind: input, shape index: {}]   ;;  %s8841_s9 = inlined_call_operand.vmem [shape: f32[1,4], index: 9, kind: input, shape index: {}]   ;;  %s8842_s10 = inlined_call_operand.vmem [shape: f32[1,4], index: 10, kind: input, shape index: {}]   ;;  %s8843_s11 = inlined_call_operand.vmem [shape: f32[36,3], index: 11, kind: input, shape index: {}]   ;;  %s8844_s12 = inlined_call_operand.vmem [shape: f32[1,3], index: 12, kind: input, shape index: {}]   ;;  %s8845_s13 = inlined_call_operand.hbm [shape: f32[256,256], index: 13, kind: input, shape index: {}]   ;;  %s8846_s14 = inlined_call_operand.vmem [shape: f32[2,3,256], index: 14, kind: output, shape index: {}]  }
   0x1   :  { %s50_s15 = sshll.u32 %s8845_s13, 4  ;;  %s52_s17 = sshll.u32 %s4479_s16, 4  ;;  %s51_s15 = int_to_ptr.hbm [resolvable:$true] %s50_s15  ;;  %s53_s17 = int_to_ptr.vmem [resolvable:$true] %s52_s17 }
   0x2   :  { %s4481_s19 = smov 16  }
   0x3   :  { %58 = dma.hbm_to_vmem [thread:$0]  %s51_s15, 8192, %s53_s17, [#allocation3], %s4480_s18, %s4480_s18, %s4481_s19  }
   0x4   :  { %4477 = dma.done.wait [#allocation3], 8192  }
   0x5   :  { %4478 = vsyncadd [#allocation3], 4294959104  ;;  %vm140_vm0 = vcmask 1040384   ;;  %vm143_vm1 = vcmask 1041408   ;;  %v4482_v0 = vmov 0.0   ;;  %s4483_s13 = smov 96  }
   0x6   :  { %v4580_v1 = vrot.slane %v4482_v0, 2  ;;  %v715_v2 = vrot.slane %v4482_v0, 7  ;;  %v733_v3 = vrot.slane %v4482_v0, 6  ;;  %404 = vrot.lane.b32.xlu2 %v4482_v0, %s4483_s13  ;;  %vm146_vm2 = vcmask 1042432   ;;  %s4484_s20 = smov 32   ;;  %v64_v9 = vld [vmem:[%s8833_s1] sm:$0xff] }
   0x7   :  { %vm149_vm3 = vcmask 1043456   ;;  %v751_v4 = vrot.slane %v4482_v0, 5  ;;  %vm152_vm4 = vcmask 1044480   ;;  %vm72_vm5 = vcmask 64512   ;;  %v63_v10 = vld [vmem:[%s8832_s0] sm:$0x3]  ;;  %91 = vmatpush.msra.mxu0 %v64_v9 }
   0x8   :  { %8955 = vst [vmem:[#allocation5_spill] sm:$0xff] %v4580_v1  ;;  %v783_v5 = vsel %vm140_vm0, 0.0, %v715_v2  ;;  %299 = vrot.lane.b32.xlu0 %v4580_v1, %s4484_s20  ;;  %v769_v7 = vrot.slane %v4482_v0, 4  ;;  %vm828_vm6 = vcmask 1045504   ;;  %v65_v11 = vld [vmem:[%s8833_s1 + $0x8] sm:$0xff]  ;;  %vm838_vm7 = vcmask 1046528   ;;  %4169 = vmatmul.msk.f32.vlgmr.msra.gmra.mxu0 %vm72_vm5, %v63_v10 }
   0x9   :  { %v792_v6 = vsel %vm143_vm1, %v783_v5, 0.0  ;;  %111 = vmatpush.msra.mxu0 %v65_v11  ;;  %v4607_v15 = vrot.slane %v4482_v0, 1  ;;  %s4485_s0 = smov 112   ;;  %v66_v20 = vld [vmem:[%s8834_s2] sm:$0x3]  ;;  %s4486_s28 = smov 48  }
   0xa   :  { %v801_v8 = vsel %vm146_vm2, %v792_v6, %v733_v3  ;;  %v68_v21 = vperm.slane %v66_v20, 0  ;;  %s4487_s29 = smov 80   ;;  %s4488_s30 = smov 64   ;;  %v69_v27 = vperm.slane %v66_v20, 1  ;;  %vm440_vm8 = vcmask 130048  }
   0xb   :  { %v810_v12 = vsel %vm149_vm3, %v801_v8, 0.0  ;;  %8956 = vst [vmem:[#allocation6_spill] sm:$0xff] %v4607_v15  ;;  %s4489_s18 = smov 8   ;;  %vm448_vm9 = vcmask 261120   ;;  %vm456_vm10 = vcmask 392192   ;;  %vm474_vm11 = vcmask 654336  }
   0xc   :  { %v819_v13 = vsel %vm152_vm4, %v810_v12, %v751_v4  ;;  %vm465_vm12 = vcmask 523264   ;;  %vm483_vm13 = vcmask 785408   ;;  %vm492_vm14 = vcmask 916480   ;;  %s4491_s23 = smov 40   ;;  %s4492_s24 = smov 24  }
   0xd   :  { %v829_v14 = vsel %vm828_vm6, %v819_v13, 0.0  ;;  %s4494_s26 = smov 12   ;;  %s4496_s1 = smov 20  }
   0xe   :  { %v4610_v16 = vsel %vm838_vm7, %v829_v14, %v769_v7 }
   0xf   :  { %8957 = vst [vmem:[#allocation7_spill] sm:$0xff] %v4610_v16  ;;  %v902_v17 = vrot.slane %v4610_v16, 2 }
  0x10   :  { %4170 = vmatmul.msk.f32.vlgmr.msra.gmra.mxu0 %vm72_vm5, %v63_v10 }
  0x11   :  { %v4617_v18 = vsel %vm828_vm6, %v902_v17, %v4580_v1 }
  0x12   :  { %v4366_v19 = vpack.i.bf16 %v4617_v18, %v4607_v15 }
  0x14   :  { %4367 = vrot.lane.b32.xlu1 %v4366_v19, %s4481_s19 }
  0x1c   :  { %425 = vrot.lane.b32.xlu1 %v4607_v15, %s4485_s0 }
  0x60   :  { %v4680_v36 = vpop.permute.xlu2 %404 }
  0x7a   :  { %v4678_v35 = vpop.permute.xlu0 %299 }
  0x85   :  { %v93_v22 = vpop.f32.mrf.mxu0 }
  0x86   :  { %v94_v23 = vadd.f32 %v93_v22, %v68_v21  ;;  %v4674_v33 = vpop.permute.xlu1 %4367 }
  0x88   :  { %v118_v24 = vperm.slane %v94_v23, 0  ;;  %v117_v25 = vrot.slane %v94_v23, 1 }
  0x8a   :  { %161 = vrot.lane.b32.xlu2 %v118_v24, %s4486_s28  ;;  %134 = vrot.lane.b32.xlu1 %v118_v24, %s4487_s29  ;;  %v119_v26 = vperm.slane %v117_v25, 0  ;;  %v141_v40 = vsel %vm140_vm0, 0.0, %v118_v24 }
  0x8b   :  { %122 = vrot.lane.b32.xlu0 %v118_v24, %s4485_s0 }
  0x8c   :  { %v142_v57 = vsel %vm140_vm0, 0.0, %v119_v26 }
  0x8d   :  { %v113_v28 = vpop.f32.mrf.mxu0 }
  0x8e   :  { %v114_v29 = vadd.f32 %v113_v28, %v69_v27  ;;  %v4676_v34 = vpop.permute.xlu1 %425 }
  0x90   :  { %v4640_v30 = vperm.slane %v114_v29, 0  ;;  %v190_v31 = vrot.slane %v114_v29, 1 }
  0x92   :  { %167 = vrot.lane.b32.xlu2 %v118_v24, %s4484_s20  ;;  %155 = vrot.lane.b32.xlu1 %v118_v24, %s4488_s30  ;;  %v4658_v32 = vperm.slane %v190_v31, 0 }
  0x93   :  { %128 = vrot.lane.b32.xlu0 %v118_v24, %s4483_s13 }
  0x9a   :  { %136 = vrot.lane.b32.xlu1 %v119_v26, %s4487_s29  ;;  %124 = vrot.lane.b32.xlu2 %v119_v26, %s4485_s0 }
  0x9b   :  { %173 = vrot.lane.b32.xlu0 %v118_v24, %s4481_s19  ;;  %v213_v24 = vsel %vm140_vm0, 0.0, %v4640_v30 }
  0xa2   :  { %169 = vrot.lane.b32.xlu1 %v119_v26, %s4484_s20  ;;  %157 = vrot.lane.b32.xlu2 %v119_v26, %s4488_s30 }
  0xa3   :  { %130 = vrot.lane.b32.xlu0 %v119_v26, %s4483_s13 }
  0xaa   :  { %195 = vrot.lane.b32.xlu1 %v4640_v30, %s4485_s0  ;;  %175 = vrot.lane.b32.xlu2 %v119_v26, %s4481_s19 }
  0xab   :  { %163 = vrot.lane.b32.xlu0 %v119_v26, %s4486_s28 }
  0xb2   :  { %223 = vrot.lane.b32.xlu1 %v4640_v30, %s4488_s30  ;;  %201 = vrot.lane.b32.xlu2 %v4640_v30, %s4483_s13 }
  0xb3   :  { %207 = vrot.lane.b32.xlu0 %v4640_v30, %s4487_s29 }
  0xba   :  { %241 = vrot.lane.b32.xlu1 %v4640_v30, %s4481_s19  ;;  %229 = vrot.lane.b32.xlu2 %v4640_v30, %s4486_s28 }
  0xbb   :  { %235 = vrot.lane.b32.xlu0 %v4640_v30, %s4484_s20 }
  0xc2   :  { %203 = vrot.lane.b32.xlu1 %v4658_v32, %s4483_s13  ;;  %209 = vrot.lane.b32.xlu2 %v4658_v32, %s4487_s29 }
  0xc3   :  { %197 = vrot.lane.b32.xlu0 %v4658_v32, %s4485_s0 }
  0xca   :  { %231 = vrot.lane.b32.xlu1 %v4658_v32, %s4486_s28  ;;  %237 = vrot.lane.b32.xlu2 %v4658_v32, %s4484_s20 }
  0xcb   :  { %225 = vrot.lane.b32.xlu0 %v4658_v32, %s4488_s30 }
  0xd3   :  { %243 = vrot.lane.b32.xlu0 %v4658_v32, %s4481_s19 }
  0xe4   :  { %v162_v39 = vpop.permute.xlu2 %161 }
  0xec   :  { %v168_v47 = vpop.permute.xlu2 %167 }
  0xf4   :  { %v125_v56 = vpop.permute.xlu2 %124 }
  0xf5   :  { %v145_v58 = vsel %vm143_vm1, %v142_v57, %v125_v56 }
  0xfc   :  { %v135_v37 = vpop.permute.xlu1 %134  ;;  %v158_v4 = vpop.permute.xlu2 %157 }
  0xfd   :  { %v123_v38 = vpop.permute.xlu0 %122  ;;  %v180_v6 = vsel %vm140_vm0, 0.0, %v158_v4 }
  0xfe   :  { %v144_v42 = vsel %vm143_vm1, %v141_v40, %v123_v38 }
 0x104   :  { %v156_v41 = vpop.permute.xlu1 %155  ;;  %v176_v11 = vpop.permute.xlu2 %175 }
 0x105   :  { %v129_v43 = vpop.permute.xlu0 %128  ;;  %v179_v45 = vsel %vm140_vm0, 0.0, %v156_v41 }
 0x106   :  { %v147_v44 = vsel %vm146_vm2, %v144_v42, %v129_v43  ;;  %v181_v50 = vsel %vm143_vm1, %v179_v45, %v162_v39 }
 0x107   :  { %v150_v46 = vsel %vm149_vm3, %v147_v44, %v135_v37  ;;  %v183_v51 = vsel %vm146_vm2, %v181_v50, %v168_v47 }
 0x108   :  { %v4688_v48 = vsel %vm152_vm4, %v150_v46, 0.0  ;;  %v214_v46 = vsel %vm140_vm0, 0.0, %v4658_v32 }
 0x109   :  { %322 = vrot.lane.b32.xlu2 %v4688_v48, %s4486_s28  ;;  %v293_v49 = vrot.slane %v4688_v48, 2  ;;  %v265_v55 = vrot.slane %v4688_v48, 1 }
 0x10b   :  { %301 = vrot.lane.b32.xlu1 %v293_v49, %s4484_s20 }
 0x10c   :  { %v137_v60 = vpop.permute.xlu1 %136  ;;  %v202_v22 = vpop.permute.xlu2 %201 }
 0x10d   :  { %v174_v52 = vpop.permute.xlu0 %173 }
 0x10e   :  { %v185_v53 = vsel %vm149_vm3, %v183_v51, %v174_v52 }
 0x10f   :  { %v4698_v54 = vsel %vm152_vm4, %v185_v53, 0.0 }
 0x110   :  { %324 = vrot.lane.b32.xlu0 %v4698_v54, %s4486_s28  ;;  %v266_v2 = vrot.slane %v4698_v54, 1  ;;  %v4721_v3 = vrot.slane %v4698_v54, 2 }
 0x111   :  { %398 = vrot.lane.b32.xlu2 %v4698_v54, %s4483_s13 }
 0x113   :  { %348 = vrot.lane.b32.xlu1 %v265_v55, %s4488_s30 }
 0x114   :  { %v170_v9 = vpop.permute.xlu1 %169  ;;  %v230_v31 = vpop.permute.xlu2 %229 }
 0x115   :  { %v131_v59 = vpop.permute.xlu0 %130 }
 0x116   :  { %v148_v61 = vsel %vm146_vm2, %v145_v58, %v131_v59 }
 0x117   :  { %v151_v62 = vsel %vm149_vm3, %v148_v61, %v137_v60 }
 0x118   :  { %374 = vrot.lane.b32.xlu0 %v293_v49, %s4487_s29  ;;  %v4713_v63 = vsel %vm152_vm4, %v151_v62, 0.0  ;;  %v1656_v62 = vrot.slane %v4482_v0, 3 }
 0x119   :  { %273 = vrot.lane.b32.xlu2 %v265_v55, %s4481_s19  ;;  %v296_v7 = vrot.slane %v4713_v63, 2  ;;  %v268_v13 = vrot.slane %v4713_v63, 1 }
 0x11b   :  { %330 = vrot.lane.b32.xlu1 %v4713_v63, %s4486_s28 }
 0x11c   :  { %v196_v19 = vpop.permute.xlu1 %195  ;;  %v210_v45 = vpop.permute.xlu2 %209 }
 0x11d   :  { %v164_v5 = vpop.permute.xlu0 %163  ;;  %v215_v25 = vsel %vm143_vm1, %v213_v24, %v196_v19 }
 0x11e   :  { %v182_v8 = vsel %vm143_vm1, %v180_v6, %v164_v5  ;;  %v217_v27 = vsel %vm146_vm2, %v215_v25, %v202_v22  ;;  %v1868_v6 = vsel %vm140_vm0, 0.0, %v1656_v62  ;;  %v530_v62 = vld [vmem:[%s8835_s3 + $0x30] sm:$0xff] }
 0x11f   :  { %v184_v10 = vsel %vm146_vm2, %v182_v8, %v170_v9  ;;  %v1885_v0 = vsel %vm143_vm1, %v1868_v6, 0.0 }
 0x120   :  { %275 = vrot.lane.b32.xlu0 %v266_v2, %s4481_s19  ;;  %v186_v12 = vsel %vm149_vm3, %v184_v10, %v176_v11  ;;  %v1902_v10 = vsel %vm146_vm2, %v1885_v0, %v4580_v1 }
 0x121   :  { %350 = vrot.lane.b32.xlu2 %v266_v2, %s4488_s30  ;;  %v4737_v14 = vsel %vm152_vm4, %v186_v12, 0.0  ;;  %v1919_v12 = vsel %vm149_vm3, %v1902_v10, 0.0 }
 0x122   :  { %v4744_v20 = vrot.slane %v4737_v14, 2  ;;  %v269_v21 = vrot.slane %v4737_v14, 1  ;;  %v1936_v19 = vsel %vm152_vm4, %v1919_v12, %v4607_v15 }
 0x123   :  { %376 = vrot.lane.b32.xlu1 %v4721_v3, %s4487_s29 }
 0x124   :  { %v224_v26 = vpop.permute.xlu1 %223  ;;  %v238_v53 = vpop.permute.xlu2 %237 }
 0x125   :  { %v208_v23 = vpop.permute.xlu0 %207  ;;  %v247_v29 = vsel %vm140_vm0, 0.0, %v224_v26  ;;  %v857_v26 = vrot.slane %v4610_v16, 1 }
 0x126   :  { %v219_v28 = vsel %vm149_vm3, %v217_v27, %v208_v23  ;;  %v249_v38 = vsel %vm143_vm1, %v247_v29, %v230_v31 }
 0x127   :  { %v4762_v30 = vsel %vm152_vm4, %v219_v28, 0.0  ;;  %v4865_v31 = vsel %vm838_vm7, %v857_v26, %v4607_v15 }
 0x128   :  { %307 = vrot.lane.b32.xlu0 %v296_v7, %s4484_s20  ;;  %v4773_v42 = vrot.slane %v4762_v30, 2  ;;  %v267_v50 = vrot.slane %v4762_v30, 1 }
 0x129   :  { %303 = vrot.lane.b32.xlu2 %v4721_v3, %s4484_s20 }
 0x12b   :  { %419 = vrot.lane.b32.xlu1 %v266_v2, %s4485_s0 }
 0x12c   :  { %v242_v40 = vpop.permute.xlu1 %241 }
 0x12d   :  { %v236_v37 = vpop.permute.xlu0 %235 }
 0x12e   :  { %v251_v39 = vsel %vm146_vm2, %v249_v38, %v236_v37 }
 0x12f   :  { %v253_v41 = vsel %vm149_vm3, %v251_v39, %v242_v40 }
 0x130   :  { %356 = vrot.lane.b32.xlu0 %v268_v13, %s4488_s30  ;;  %v4776_v43 = vsel %vm152_vm4, %v253_v41, 0.0  ;;  %v539_v41 = vld [vmem:[%s8835_s3 + $0x78] sm:$0xff] }
 0x131   :  { %332 = vrot.lane.b32.xlu2 %v4737_v14, %s4486_s28  ;;  %v346_v58 = vrot.slane %v4776_v43, 1  ;;  %v372_v4 = vrot.slane %v4776_v43, 2  ;;  %581 = vmatpush.msra.mxu2 %v539_v41 }
 0x133   :  { %406 = vrot.lane.b32.xlu1 %v4737_v14, %s4483_s13 }
 0x134   :  { %v204_v49 = vpop.permute.xlu1 %203 }
 0x135   :  { %v198_v44 = vpop.permute.xlu0 %197 }
 0x136   :  { %v216_v47 = vsel %vm143_vm1, %v214_v46, %v198_v44  ;;  %v538_v44 = vld [vmem:[%s8835_s3 + $0x70] sm:$0xff] }
 0x137   :  { %v218_v51 = vsel %vm146_vm2, %v216_v47, %v204_v49  ;;  %582 = vmatpush.msra.mxu2 %v538_v44  ;;  %v536_v47 = vld [vmem:[%s8835_s3 + $0x60] sm:$0xff]  ;;  %v541_v44 = vld [vmem:[%s8835_s3 + $0x88] sm:$0xff] }
 0x138   :  { %384 = vrot.lane.b32.xlu0 %v4744_v20, %s4487_s29  ;;  %v220_v55 = vsel %vm149_vm3, %v218_v51, %v210_v45  ;;  %v537_v45 = vld [vmem:[%s8835_s3 + $0x68] sm:$0xff]  ;;  %v534_v51 = vld [vmem:[%s8835_s3 + $0x50] sm:$0xff]  ;;  %624 = vmatpush.msra.mxu3 %v541_v44 }
 0x139   :  { %279 = vrot.lane.b32.xlu2 %v268_v13, %s4481_s19  ;;  %v4794_v56 = vsel %vm152_vm4, %v220_v55, 0.0  ;;  %583 = vmatpush.msra.mxu2 %v537_v45  ;;  %v533_v55 = vld [vmem:[%s8835_s3 + $0x48] sm:$0xff]  ;;  %v540_v45 = vld [vmem:[%s8835_s3 + $0x80] sm:$0xff] }
 0x13a   :  { %v4825_v9 = vrot.slane %v4794_v56, 2  ;;  %v270_v11 = vrot.slane %v4794_v56, 1  ;;  %625 = vmatpush.msra.mxu3 %v540_v45 }
 0x13b   :  { %358 = vrot.lane.b32.xlu1 %v269_v21, %s4488_s30  ;;  %584 = vmatpush.msra.mxu2 %v536_v47 }
 0x13c   :  { %v232_v57 = vpop.permute.xlu1 %231 }
 0x13d   :  { %v226_v52 = vpop.permute.xlu0 %225 }
 0x13e   :  { %v248_v32 = vsel %vm140_vm0, 0.0, %v226_v52  ;;  %v4369_v52 = vunpack.i.l.bf16 %v4674_v33 }
 0x13f   :  { %v250_v59 = vsel %vm143_vm1, %v248_v32, %v232_v57 }
 0x140   :  { %427 = vrot.lane.b32.xlu0 %v269_v21, %s4485_s0  ;;  %v252_v2 = vsel %vm146_vm2, %v250_v59, %v238_v53  ;;  %v441_v57 = vsel %vm440_vm8, 0.0, %v4369_v52 }
 0x141   :  { %382 = vrot.lane.b32.xlu2 %v296_v7, %s4487_s29 }
 0x143   :  { %309 = vrot.lane.b32.xlu1 %v4744_v20, %s4484_s20 }
 0x145   :  { %v244_v61 = vpop.permute.xlu0 %243 }
 0x146   :  { %v254_v5 = vsel %vm149_vm3, %v252_v2, %v244_v61  ;;  %v531_v61 = vld [vmem:[%s8835_s3 + $0x38] sm:$0xff]  ;;  %v449_v2 = vsel %vm448_vm9, %v441_v57, %v4678_v35  ;;  %v529_v35 = vld [vmem:[%s8835_s3 + $0x28] sm:$0xff] }
 0x147   :  { %v4817_v7 = vsel %vm152_vm4, %v254_v5, 0.0 }
 0x148   :  { %400 = vrot.lane.b32.xlu0 %v4762_v30, %s4483_s13  ;;  %v347_v25 = vrot.slane %v4817_v7, 1  ;;  %v373_v28 = vrot.slane %v4817_v7, 2 }
 0x149   :  { %281 = vrot.lane.b32.xlu2 %v269_v21, %s4481_s19  ;;  %v1953_v21 = vsel %vm828_vm6, %v1936_v19, 0.0  ;;  %v509_v19 = vrot.slane %v4721_v3, 4  ;;  %v525_v3 = vld [vmem:[%s8835_s3 + $0x8] sm:$0xff] }
 0x14a   :  { %v4847_v23 = vsel %vm838_vm7, %v1953_v21, 0.0 }
 0x14b   :  { %326 = vrot.lane.b32.xlu1 %v4762_v30, %s4486_s28  ;;  %8958 = vst [vmem:[#allocation8_spill] sm:$0xff] %v4847_v23  ;;  %v2189_v27 = vrot.slane %v4847_v23, 2 }
 0x14d   :  { %v4872_v37 = vsel %vm828_vm6, %v902_v17, %v2189_v27 }
 0x14e   :  { %v4371_v40 = vpack.i.bf16 %v4872_v37, %v4865_v31 }
 0x150   :  { %305 = vrot.lane.b32.xlu0 %v4773_v42, %s4484_s20 }
 0x151   :  { %328 = vrot.lane.b32.xlu2 %v4776_v43, %s4486_s28 }
 0x153   :  { %402 = vrot.lane.b32.xlu1 %v4776_v43, %s4483_s13 }
 0x158   :  { %352 = vrot.lane.b32.xlu0 %v267_v50, %s4488_s30 }
 0x159   :  { %421 = vrot.lane.b32.xlu2 %v267_v50, %s4485_s0 }
 0x15b   :  { %277 = vrot.lane.b32.xlu1 %v267_v50, %s4481_s19  ;;  %v535_v50 = vld [vmem:[%s8835_s3 + $0x58] sm:$0xff] }
 0x15c   :  { %585 = vmatpush.msra.mxu2 %v535_v50 }
 0x15e   :  { %586 = vmatpush.msra.mxu2 %v534_v51 }
 0x160   :  { %334 = vrot.lane.b32.xlu0 %v4794_v56, %s4486_s28  ;;  %587 = vmatpush.msra.mxu2 %v533_v55 }
 0x161   :  { %378 = vrot.lane.b32.xlu2 %v4773_v42, %s4487_s29 }
 0x163   :  { %v4803_v60 = vpop.permute.xlu2 %322  ;;  %354 = vrot.lane.b32.xlu1 %v346_v58, %s4488_s30 }
 0x164   :  { %v457_v5 = vsel %vm456_vm10, %v449_v2, %v4803_v60  ;;  %v528_v60 = vld [vmem:[%s8835_s3 + $0x20] sm:$0xff] }
 0x168   :  { %380 = vrot.lane.b32.xlu0 %v372_v4, %s4487_s29 }
 0x169   :  { %408 = vrot.lane.b32.xlu2 %v4794_v56, %s4483_s13 }
 0x16b   :  { %v4819_v8 = vpop.permute.xlu2 %398  ;;  %336 = vrot.lane.b32.xlu1 %v4817_v7, %s4486_s28 }
 0x170   :  { %423 = vrot.lane.b32.xlu0 %v346_v58, %s4485_s0  ;;  %v532_v58 = vld [vmem:[%s8835_s3 + $0x40] sm:$0xff] }
 0x171   :  { %311 = vrot.lane.b32.xlu2 %v4825_v9, %s4484_s20  ;;  %588 = vmatpush.msra.mxu2 %v532_v58 }
 0x173   :  { %v4834_v13 = vpop.permute.xlu2 %273  ;;  %429 = vrot.lane.b32.xlu1 %v270_v11, %s4485_s0  ;;  %589 = vmatpush.msra.mxu2 %v531_v61 }
 0x175   :  { %590 = vmatpush.msra.mxu2 %v530_v62 }
 0x177   :  { %591 = vmatpush.msra.mxu2 %v529_v35  ;;  %v442_v35 = vsel %vm440_vm8, %v4688_v48, %v4834_v13 }
 0x178   :  { %283 = vrot.lane.b32.xlu0 %v270_v11, %s4481_s19 }
 0x179   :  { %360 = vrot.lane.b32.xlu2 %v270_v11, %s4488_s30  ;;  %592 = vmatpush.msra.mxu2 %v528_v60 }
 0x17b   :  { %v4842_v22 = vpop.permute.xlu2 %350  ;;  %386 = vrot.lane.b32.xlu1 %v4825_v9, %s4487_s29 }
 0x17d   :  { %v4849_v24 = vpop.permute.xlu1 %301 }
 0x180   :  { %362 = vrot.lane.b32.xlu0 %v347_v25, %s4488_s30 }
 0x181   :  { %388 = vrot.lane.b32.xlu2 %v373_v28, %s4487_s29 }
 0x182   :  { %v4859_v29 = vpop.permute.xlu0 %324 }
 0x183   :  { %v4874_v38 = vpop.permute.xlu2 %303  ;;  %431 = vrot.lane.b32.xlu1 %v347_v25, %s4485_s0  ;;  %s4495_s0 = smov 28  }
 0x185   :  { %v349_v39 = vpop.permute.xlu1 %348 }
 0x186   :  { %v466_v6 = vsel %vm465_vm12, %v457_v5, %v349_v39  ;;  %v527_v39 = vld [vmem:[%s8835_s3 + $0x18] sm:$0xff]  ;;  %v513_v5 = vrot.slane %v4744_v20, 4 }
 0x187   :  { %593 = vmatpush.msra.mxu2 %v527_v39 }
 0x188   :  { %410 = vrot.lane.b32.xlu0 %v4817_v7, %s4483_s13 }
 0x189   :  { %4372 = vrot.lane.b32.xlu2 %v4371_v40, %s4489_s18  ;;  %v526_v40 = vld [vmem:[%s8835_s3 + $0x10] sm:$0xff] }
 0x18a   :  { %v375_v17 = vpop.permute.xlu0 %374  ;;  %594 = vmatpush.msra.mxu2 %v526_v40 }
 0x18b   :  { %v4891_v46 = vpop.permute.xlu2 %332  ;;  %v475_v0 = vsel %vm474_vm11, %v466_v6, %v375_v17  ;;  %v524_v17 = vld [vmem:[%s8835_s3] sm:$0xff]  ;;  %s4490_s3 = smov 56  }
 0x18c   :  { %v484_v12 = vsel %vm483_vm13, %v475_v0, %v4819_v8  ;;  %595 = vmatpush.msra.mxu2 %v525_v3  ;;  %1049 = vrot.lane.b32.xlu1 %v4865_v31, %s4490_s3 }
 0x18d   :  { %v331_v49 = vpop.permute.xlu1 %330 }
 0x18e   :  { %596 = vmatpush.msra.mxu2 %v524_v17  ;;  %v461_v52 = vsel %vm456_vm10, %v449_v2, %v331_v49  ;;  %v450_v49 = vsel %vm448_vm9, %v442_v35, %v4849_v24 }
 0x190   :  { %1028 = vrot.lane.b32.xlu0 %v4610_v16, %s4486_s28 }
 0x191   :  { %949 = vrot.lane.b32.xlu2 %v4610_v16, %s4492_s24 }
 0x192   :  { %v4905_v53 = vpop.permute.xlu0 %275 }
 0x193   :  { %v4910_v32 = vpop.permute.xlu2 %279 }
 0x194   :  { %v445_v35 = vsel %vm440_vm8, %v4713_v63, %v4910_v32  ;;  %1003 = vrot.lane.b32.xlu1 %v4617_v18, %s4491_s23 }
 0x195   :  { %v377_v59 = vpop.permute.xlu1 %376 }
 0x198   :  { %976 = vrot.lane.b32.xlu0 %v4865_v31, %s4484_s20 }
 0x199   :  { %1070 = vrot.lane.b32.xlu2 %v4617_v18, %s4488_s30 }
 0x19a   :  { %v4930_v10 = vpop.permute.xlu0 %307 }
 0x19b   :  { %v383_v11 = vpop.permute.xlu2 %382 }
 0x19d   :  { %v420_v21 = vpop.permute.xlu1 %419 }
 0x19e   :  { %v493_v25 = vsel %vm492_vm14, %v484_v12, %v420_v21  ;;  %v510_v21 = vrot.slane %v4773_v42, 4 }
 0x19f   :  { %v516_v41 = vsel %vm149_vm3, %v493_v25, %v509_v19 }
 0x1a0   :  { %546 = vst [vmem:[#allocation1] ss:$2 sm:$0xff] %v516_v41 }
 0x1a2   :  { %v357_v8 = vpop.permute.xlu0 %356 }
 0x1a3   :  { %v4961_v50 = vpop.permute.xlu2 %281  ;;  %v470_v55 = vsel %vm465_vm12, %v461_v52, %v357_v8  ;;  %v443_v52 = vsel %vm440_vm8, %v4698_v54, %v4905_v53 }
 0x1a4   :  { %v479_v58 = vsel %vm474_vm11, %v470_v55, %v383_v11  ;;  %v458_v11 = vsel %vm456_vm10, %v450_v49, %v4859_v29 }
 0x1a5   :  { %v407_v47 = vpop.permute.xlu1 %406  ;;  %v467_v20 = vsel %vm465_vm12, %v458_v11, %v4842_v22 }
 0x1a6   :  { %v488_v62 = vsel %vm483_vm13, %v479_v58, %v407_v47  ;;  %v476_v12 = vsel %vm474_vm11, %v467_v20, %v377_v59  ;;  %v451_v58 = vsel %vm448_vm9, %v443_v52, %v4874_v38  ;;  %v453_v38 = vsel %vm448_vm9, %v445_v35, %v4930_v10 }
 0x1a7   :  { %v462_v63 = vsel %vm456_vm10, %v453_v38, %v4891_v46  ;;  %v514_v46 = vrot.slane %v4825_v9, 4 }
 0x1aa   :  { %v4963_v51 = vpop.permute.xlu0 %384 }
 0x1ab   :  { %v329_v61 = vpop.permute.xlu2 %328 }
 0x1ad   :  { %v359_v57 = vpop.permute.xlu1 %358 }
 0x1ae   :  { %v471_v32 = vsel %vm465_vm12, %v462_v63, %v359_v57 }
 0x1b2   :  { %v428_v6 = vpop.permute.xlu0 %427 }
 0x1b3   :  { %v497_v0 = vsel %vm492_vm14, %v488_v62, %v428_v6  ;;  %v422_v48 = vpop.permute.xlu2 %421 }
 0x1b4   :  { %v520_v60 = vsel %vm149_vm3, %v497_v0, %v513_v5  ;;  %v512_v5 = vrot.slane %v4580_v1, 4 }
 0x1b5   :  { %554 = vst [vmem:[#allocation1 + $0x20] ss:$2 sm:$0xff] %v520_v60  ;;  %v4977_v2 = vpop.permute.xlu1 %309 }
 0x1ba   :  { %v401_v19 = vpop.permute.xlu0 %400 }
 0x1bb   :  { %v485_v13 = vsel %vm483_vm13, %v476_v12, %v401_v19  ;;  %v379_v59 = vpop.permute.xlu2 %378  ;;  %v511_v12 = vrot.slane %v372_v4, 4 }
 0x1bc   :  { %v494_v25 = vsel %vm492_vm14, %v485_v13, %v422_v48  ;;  %v480_v48 = vsel %vm474_vm11, %v471_v32, %v4963_v51 }
 0x1bd   :  { %v517_v24 = vsel %vm149_vm3, %v494_v25, %v510_v21  ;;  %v327_v39 = vpop.permute.xlu1 %326 }
 0x1be   :  { %548 = vst [vmem:[#allocation1 + $0x1] ss:$2 sm:$0xff] %v517_v24 }
 0x1c2   :  { %v306_v40 = vpop.permute.xlu0 %305 }
 0x1c3   :  { %v409_v17 = vpop.permute.xlu2 %408 }
 0x1c4   :  { %v489_v25 = vsel %vm483_vm13, %v480_v48, %v409_v17 }
 0x1c5   :  { %v403_v41 = vpop.permute.xlu1 %402  ;;  %v561_v29 = vld.sshfl [vmem:[#allocation1] sm:$0xff pattern:$0x75316420]  ;;  %v562_v8 = vld.sshfl [vmem:[#allocation1 + $0x8] sm:$0xff pattern:$0x75316420] }
 0x1c6   :  { %597 = vmatmul.f32.vlgmr.msra.gmra.mxu2 %v561_v29  ;;  %4171 = vmatmul.msk.f32.vlgmr.msra.gmra.mxu3 %vm440_vm8, %v562_v8 }
 0x1ca   :  { %v353_v22 = vpop.permute.xlu0 %352 }
 0x1cb   :  { %v312_v20 = vpop.permute.xlu2 %311 }
 0x1cd   :  { %v278_v3 = vpop.permute.xlu1 %277 }
 0x1ce   :  { %v444_v44 = vsel %vm440_vm8, %v4762_v30, %v278_v3  ;;  %v459_v30 = vsel %vm456_vm10, %v451_v58, %v327_v39 }
 0x1cf   :  { %v452_v47 = vsel %vm448_vm9, %v444_v44, %v306_v40  ;;  %v468_v54 = vsel %vm465_vm12, %v459_v30, %v353_v22  ;;  %v446_v44 = vsel %vm440_vm8, %v4737_v14, %v4961_v50 }
 0x1d0   :  { %v460_v55 = vsel %vm456_vm10, %v452_v47, %v329_v61  ;;  %v477_v11 = vsel %vm474_vm11, %v468_v54, %v379_v59  ;;  %v454_v47 = vsel %vm448_vm9, %v446_v44, %v4977_v2  ;;  %v515_v2 = vrot.slane %v373_v28, 4 }
 0x1d1   :  { %v486_v10 = vsel %vm483_vm13, %v477_v11, %v403_v41 }
 0x1d2   :  { %v335_v42 = vpop.permute.xlu0 %334 }
 0x1d3   :  { %v361_v4 = vpop.permute.xlu2 %360 }
 0x1d5   :  { %v355_v45 = vpop.permute.xlu1 %354 }
 0x1d6   :  { %v469_v62 = vsel %vm465_vm12, %v460_v55, %v355_v45  ;;  %v463_v55 = vsel %vm456_vm10, %v454_v47, %v335_v42 }
 0x1d7   :  { %v472_v50 = vsel %vm465_vm12, %v463_v55, %v361_v4 }
 0x1da   :  { %v381_v6 = vpop.permute.xlu0 %380 }
 0x1db   :  { %v478_v0 = vsel %vm474_vm11, %v469_v62, %v381_v6  ;;  %v389_v59 = vpop.permute.xlu2 %388 }
 0x1dc   :  { %v487_v53 = vsel %vm483_vm13, %v478_v0, %v4680_v36 }
 0x1dd   :  { %v496_v61 = vsel %vm492_vm14, %v487_v53, %v4676_v34  ;;  %v337_v60 = vpop.permute.xlu1 %336  ;;  %v4443_v53 = vld [vmem:[%s8836_s4] ss:$0 sm:$0xff]  ;;  %s4493_s4 = smov 4  }
 0x1de   :  { %v519_v49 = vsel %vm149_vm3, %v496_v61, %v512_v5 }
 0x1df   :  { %552 = vst [vmem:[#allocation1 + $0x11] ss:$2 sm:$0xff] %v519_v49 }
 0x1e2   :  { %v424_v19 = vpop.permute.xlu0 %423 }
 0x1e3   :  { %v495_v21 = vsel %vm492_vm14, %v486_v10, %v424_v19 }
 0x1e4   :  { %v518_v13 = vsel %vm149_vm3, %v495_v21, %v511_v12 }
 0x1e5   :  { %550 = vst [vmem:[#allocation1 + $0x10] ss:$2 sm:$0xff] %v518_v13  ;;  %v430_v24 = vpop.permute.xlu1 %429 }
 0x1e6   :  { %v498_v57 = vsel %vm492_vm14, %v489_v25, %v430_v24 }
 0x1e7   :  { %v521_v43 = vsel %vm149_vm3, %v498_v57, %v514_v46 }
 0x1e8   :  { %556 = vst [vmem:[#allocation1 + $0x21] ss:$2 sm:$0xff] %v521_v43 }
 0x1ea   :  { %v284_v39 = vpop.permute.xlu0 %283 }
 0x1eb   :  { %v447_v40 = vsel %vm440_vm8, %v4794_v56, %v284_v39  ;;  %v2020_v39 = vrot.slane %v4847_v23, 1 }
 0x1ec   :  { %v563_v41 = vld.sshfl [vmem:[#allocation1 + $0x10] sm:$0xff pattern:$0x75316420]  ;;  %v564_v51 = vld.sshfl [vmem:[#allocation1 + $0x18] sm:$0xff pattern:$0x75316420]  ;;  %v455_v29 = vsel %vm448_vm9, %v447_v40, %v312_v20 }
 0x1ed   :  { %600 = vmatmul.f32.gmra.mxu2 %v563_v41  ;;  %4172 = vmatmul.msk.f32.gmra.mxu3 %vm440_vm8, %v564_v51  ;;  %v387_v8 = vpop.permute.xlu1 %386  ;;  %v464_v22 = vsel %vm456_vm10, %v455_v29, %v337_v60  ;;  %v2021_v41 = vsel %vm838_vm7, %v857_v26, %v2020_v39  ;;  %v2022_v51 = vsel %vm838_vm7, %v2020_v39, %v4607_v15 }
 0x1ee   :  { %v481_v62 = vsel %vm474_vm11, %v472_v50, %v387_v8  ;;  %v4376_v29 = vpack.i.bf16 %v2022_v51, %v2021_v41  ;;  %v2191_v26 = vsel %vm828_vm6, %v2189_v27, %v4580_v1  ;;  %v4381_v27 = vpack.i.bf16 %v4847_v23, %v4610_v16 }
 0x1ef   :  { %v565_v17 = vld.sshfl [vmem:[#allocation1 + $0x20] sm:$0xff pattern:$0x75316420]  ;;  %v566_v45 = vld.sshfl [vmem:[#allocation1 + $0x28] sm:$0xff pattern:$0x75316420] }
 0x1f0   :  { %4377 = vrot.lane.b32.xlu1 %v4376_v29, %s4493_s4  ;;  %4382 = vrot.lane.b32.xlu0 %v4381_v27, %s4494_s26 }
 0x1f2   :  { %v363_v9 = vpop.permute.xlu0 %362 }
 0x1f3   :  { %v473_v3 = vsel %vm465_vm12, %v464_v22, %v363_v9 }
 0x1f4   :  { %v482_v56 = vsel %vm474_vm11, %v473_v3, %v389_v59 }
 0x1f5   :  { %v491_v52 = vsel %vm483_vm13, %v482_v56, %v4680_v36  ;;  %603 = vmatmul.f32.gmra.mxu2 %v565_v17  ;;  %4173 = vmatmul.msk.f32.gmra.mxu3 %vm440_vm8, %v566_v45  ;;  %v432_v36 = vpop.permute.xlu1 %431 }
 0x1f6   :  { %v500_v58 = vsel %vm492_vm14, %v491_v52, %v4676_v34 }
 0x1f7   :  { %v523_v14 = vsel %vm149_vm3, %v500_v58, %v512_v5 }
 0x1f8   :  { %560 = vst [vmem:[#allocation1 + $0x31] ss:$2 sm:$0xff] %v523_v14  ;;  %2258 = vrot.lane.b32.xlu1 %v2191_v26, %s4489_s18 }
 0x1fa   :  { %v411_v6 = vpop.permute.xlu0 %410 }
 0x1fb   :  { %v490_v30 = vsel %vm483_vm13, %v481_v62, %v411_v6 }
 0x1fc   :  { %v499_v0 = vsel %vm492_vm14, %v490_v30, %v432_v36  ;;  %vm1109_vm14 = vcmask 195584  }
 0x1fd   :  { %v522_v42 = vsel %vm149_vm3, %v499_v0, %v515_v2 }
 0x1fe   :  { %558 = vst [vmem:[#allocation1 + $0x30] ss:$2 sm:$0xff] %v522_v42  ;;  %v4386_v42 = vpack.i.bf16 %v2021_v41, %v2022_v51 }
 0x200   :  { %2664 = vrot.lane.b32.xlu1 %v4847_v23, %s4492_s24  ;;  %4387 = vrot.lane.b32.xlu2 %v4386_v42, %s4495_s0 }
 0x205   :  { %v567_v34 = vld.sshfl [vmem:[#allocation1 + $0x30] sm:$0xff pattern:$0x75316420]  ;;  %v568_v35 = vld.sshfl [vmem:[#allocation1 + $0x38] sm:$0xff pattern:$0x75316420] }
 0x206   :  { %606 = vmatmul.f32.gmra.mxu2 %v567_v34  ;;  %4174 = vmatmul.msk.f32.gmra.mxu3 %vm440_vm8, %v568_v35 }
 0x208   :  { %4397 = vrot.lane.b32.xlu1 %v4376_v29, %s4481_s19 }
 0x249   :  { %v598_v7 = vpop.f32.mrf.mxu2  ;;  %v627_v28 = vpop.f32.mrf.mxu3 }
 0x24a   :  { %v599_v61 = vadd.f32 %v4443_v53, %v598_v7 }
 0x24c   :  { %v628_v20 = vadd.f32 %v627_v28, %v599_v61  ;;  %v4391_v28 = vpack.i.bf16 %v4872_v37, %v2191_v26 }
 0x24e   :  { %v639_v18 = vsel %vm72_vm5, %v628_v20, 0.0  ;;  %4392 = vrot.lane.b32.xlu0 %v4391_v28, %s4484_s20 }
 0x270   :  { %v601_v5 = vpop.f32.mrf.mxu2  ;;  %v630_v54 = vpop.f32.mrf.mxu3 }
 0x271   :  { %v602_v38 = vadd.f32 %v4443_v53, %v601_v5 }
 0x273   :  { %v631_v11 = vadd.f32 %v630_v54, %v602_v38  ;;  %v4401_v54 = vpack.i.bf16 %v2191_v26, %v4872_v37 }
 0x275   :  { %v640_v32 = vsel %vm72_vm5, %v631_v11, 0.0  ;;  %4402 = vrot.lane.b32.xlu2 %v4401_v54, %s4496_s1 }
 0x276   :  { %v641_v21 = vadd.f32 %v640_v32, %v639_v18 }
 0x278   :  { %v604_v31 = vpop.f32.mrf.mxu2  ;;  %v633_v49 = vpop.f32.mrf.mxu3 }
 0x279   :  { %v605_v60 = vadd.f32 %v4443_v53, %v604_v31 }
 0x27b   :  { %v634_v63 = vadd.f32 %v633_v49, %v605_v60 }
 0x27d   :  { %v642_v19 = vsel %vm72_vm5, %v634_v63, 0.0 }
 0x27e   :  { %v643_v25 = vadd.f32 %v642_v19, %v641_v21 }
 0x289   :  { %v607_v12 = vpop.f32.mrf.mxu2  ;;  %v636_v48 = vpop.f32.mrf.mxu3 }
 0x28a   :  { %v608_v10 = vadd.f32 %v4443_v53, %v607_v12  ;;  %v4444_v12 = vld [vmem:[%s8838_s6] ss:$0 sm:$0xff] }
 0x28c   :  { %v637_v13 = vadd.f32 %v636_v48, %v608_v10 }
 0x28e   :  { %v644_v46 = vsel %vm72_vm5, %v637_v13, 0.0 }
 0x28f   :  { %v645_v24 = vadd.f32 %v644_v46, %v643_v25 }
 0x291   :  { %v646_v57 = vrot.slane %v645_v24, 4 }
 0x293   :  { %v647_v43 = vadd.f32 %v646_v57, %v645_v24 }
 0x295   :  { %v648_v4 = vrot.slane %v647_v43, 2 }
 0x297   :  { %v649_v40 = vadd.f32 %v648_v4, %v647_v43 }
 0x299   :  { %v650_v8 = vrot.slane %v649_v40, 1 }
 0x29b   :  { %v651_v9 = vadd.f32 %v650_v8, %v649_v40 }
 0x29d   :  { %v652_v22 = vmul.f32 0.03125, %v651_v9 }
 0x29f   :  { %v653_v59 = vsub.f32 %v628_v20, %v652_v22  ;;  %v654_v3 = vsub.f32 %v631_v11, %v652_v22  ;;  %v655_v44 = vsub.f32 %v634_v63, %v652_v22  ;;  %v656_v56 = vsub.f32 %v637_v13, %v652_v22  ;;  %v675_v11 = vld [vmem:[%s8837_s5] sm:$0x1] }
 0x2a1   :  { %v657_v17 = vmul.f32 %v653_v59, %v653_v59  ;;  %v658_v45 = vmul.f32 %v654_v3, %v654_v3  ;;  %v659_v47 = vmul.f32 %v655_v44, %v655_v44  ;;  %v660_v52 = vmul.f32 %v656_v56, %v656_v56 }
 0x2a3   :  { %v661_v55 = vsel %vm72_vm5, %v657_v17, 0.0  ;;  %v662_v58 = vsel %vm72_vm5, %v658_v45, 0.0  ;;  %v664_v50 = vsel %vm72_vm5, %v659_v47, 0.0  ;;  %v666_v6 = vsel %vm72_vm5, %v660_v52, 0.0 }
 0x2a4   :  { %v663_v14 = vadd.f32 %v662_v58, %v661_v55 }
 0x2a6   :  { %v665_v62 = vadd.f32 %v664_v50, %v663_v14 }
 0x2a8   :  { %v667_v2 = vadd.f32 %v666_v6, %v665_v62 }
 0x2aa   :  { %v668_v36 = vrot.slane %v667_v2, 4 }
 0x2ac   :  { %v669_v30 = vadd.f32 %v668_v36, %v667_v2 }
 0x2ae   :  { %v670_v0 = vrot.slane %v669_v30, 2 }
 0x2b0   :  { %v671_v34 = vadd.f32 %v670_v0, %v669_v30 }
 0x2b2   :  { %v672_v35 = vrot.slane %v671_v34, 1 }
 0x2b4   :  { %v673_v7 = vadd.f32 %v672_v35, %v671_v34 }
 0x2b6   :  { %v674_v5 = vmul.f32 0.03125, %v673_v7 }
 0x2b8   :  { %v676_v53 = vadd.f32 1e-05, %v674_v5 }
 0x2ba   :  { %4448 = vrsqrt.f32 %v676_v53  ;;  %vm683_vm11 = vweird.f32 %v676_v53 }
 0x2c0   :  { %v4449_v31 = vpop.eup %4448 }
 0x2c1   :  { %v678_v38 = vmul.f32 %v4449_v31, %v676_v53  ;;  %vm684_vm15 = vweird.f32 %v4449_v31 }
 0x2c2   :  { %vm685_vm13 = vmor %vm683_vm11, %vm684_vm15  ;;  %vm1142_vm15 = vcmask 326656   ;;  %vm1175_vm11 = vcmask 457728  }
 0x2c3   :  { %v679_v61 = vmul.f32 %v4449_v31, %v678_v38 }
 0x2c5   :  { %v680_v60 = vmul.f32 0.5, %v679_v61 }
 0x2c7   :  { %v681_v49 = vsub.f32 1.5, %v680_v60 }
 0x2c9   :  { %v682_v37 = vmul.f32 %v4449_v31, %v681_v49 }
 0x2cb   :  { %v686_v20 = vsel %vm685_vm13, %v4449_v31, %v682_v37  ;;  %vm1221_vm13 = vcmask 588800  }
 0x2cc   :  { %v687_v63 = vmul.f32 %v686_v20, %v675_v11 }
 0x2ce   :  { %v689_v32 = vperm.slane %v687_v63, 0 }
 0x2d0   :  { %v691_v18 = vmul.f32 %v689_v32, %v653_v59  ;;  %v692_v19 = vmul.f32 %v689_v32, %v654_v3  ;;  %v693_v10 = vmul.f32 %v689_v32, %v655_v44  ;;  %v694_v21 = vmul.f32 %v689_v32, %v656_v56 }
 0x2d2   :  { %v700_v48 = vadd.f32 %v4444_v12, %v692_v19  ;;  %v701_v13 = vadd.f32 %v4444_v12, %v693_v10  ;;  %v702_v25 = vadd.f32 %v4444_v12, %v694_v21  ;;  %v699_v46 = vadd.f32 %v4444_v12, %v691_v18 }
 0x2d4   :  { %v704_v24 = vmax.f32 %v700_v48, 0.0  ;;  %v705_v57 = vmax.f32 %v701_v13, 0.0  ;;  %v703_v43 = vmax.f32 %v699_v46, 0.0  ;;  %v5103_v4 = vmax.f32 %v702_v25, 0.0 }
 0x2d6   :  { %v5105_v39 = vrot.slane %v705_v57, 4  ;;  %v720_v40 = vrot.slane %v705_v57, 7  ;;  %v738_v41 = vrot.slane %v705_v57, 6  ;;  %v756_v51 = vrot.slane %v705_v57, 5 }
 0x2d7   :  { %v711_v29 = vrot.slane %v703_v43, 4  ;;  %v716_v8 = vrot.slane %v703_v43, 7  ;;  %v734_v9 = vrot.slane %v703_v43, 6  ;;  %v712_v22 = vrot.slane %v704_v24, 4 }
 0x2d8   :  { %v788_v59 = vsel %vm140_vm0, 0.0, %v720_v40  ;;  %v752_v3 = vrot.slane %v703_v43, 5  ;;  %v718_v44 = vrot.slane %v704_v24, 7  ;;  %v736_v56 = vrot.slane %v704_v24, 6 }
 0x2d9   :  { %v797_v17 = vsel %vm143_vm1, %v788_v59, 0.0  ;;  %v784_v45 = vsel %vm140_vm0, 0.0, %v716_v8  ;;  %v719_v47 = vrot.slane %v712_v22, 7  ;;  %v754_v26 = vrot.slane %v704_v24, 5 }
 0x2da   :  { %v806_v52 = vsel %vm146_vm2, %v797_v17, %v738_v41  ;;  %v793_v55 = vsel %vm143_vm1, %v784_v45, 0.0  ;;  %v737_v58 = vrot.slane %v712_v22, 6  ;;  %v755_v14 = vrot.slane %v712_v22, 5 }
 0x2db   :  { %v815_v50 = vsel %vm149_vm3, %v806_v52, 0.0  ;;  %v802_v62 = vsel %vm146_vm2, %v793_v55, %v734_v9  ;;  %v787_v6 = vsel %vm140_vm0, 0.0, %v719_v47  ;;  %v786_v2 = vsel %vm140_vm0, 0.0, %v718_v44 }
 0x2dc   :  { %v824_v36 = vsel %vm152_vm4, %v815_v50, %v756_v51  ;;  %v811_v30 = vsel %vm149_vm3, %v802_v62, 0.0  ;;  %v796_v27 = vsel %vm143_vm1, %v787_v6, 0.0  ;;  %v795_v0 = vsel %vm143_vm1, %v786_v2, 0.0 }
 0x2dd   :  { %v834_v42 = vsel %vm828_vm6, %v824_v36, 0.0  ;;  %v820_v34 = vsel %vm152_vm4, %v811_v30, %v752_v3  ;;  %v805_v35 = vsel %vm146_vm2, %v796_v27, %v737_v58  ;;  %v804_v7 = vsel %vm146_vm2, %v795_v0, %v736_v56 }
 0x2de   :  { %v5126_v28 = vsel %vm838_vm7, %v834_v42, %v5105_v39  ;;  %v830_v5 = vsel %vm828_vm6, %v820_v34, 0.0  ;;  %v814_v54 = vsel %vm149_vm3, %v805_v35, 0.0  ;;  %v813_v53 = vsel %vm149_vm3, %v804_v7, 0.0 }
 0x2df   :  { %957 = vrot.lane.b32.xlu0 %v5126_v28, %s4492_s24  ;;  %v5134_v31 = vsel %vm838_vm7, %v830_v5, %v711_v29  ;;  %v771_v38 = vrot.slane %v712_v22, 4  ;;  %v823_v61 = vsel %vm152_vm4, %v814_v54, %v755_v14  ;;  %v717_v60 = vrot.slane %v711_v29, 7 }
 0x2e0   :  { %v722_v49 = vrot.slane %v5103_v4, 7  ;;  %947 = vrot.lane.b32.xlu1 %v5134_v31, %s4492_s24  ;;  %v833_v11 = vsel %vm828_vm6, %v823_v61, 0.0  ;;  %v822_v20 = vsel %vm152_vm4, %v813_v53, %v754_v26  ;;  %v735_v63 = vrot.slane %v711_v29, 6 }
 0x2e1   :  { %v5142_v37 = vsel %vm838_vm7, %v833_v11, %v771_v38  ;;  %v785_v32 = vsel %vm140_vm0, 0.0, %v717_v60  ;;  %v753_v18 = vrot.slane %v711_v29, 5  ;;  %v832_v10 = vsel %vm828_vm6, %v822_v20, 0.0 }
 0x2e2   :  { %955 = vrot.lane.b32.xlu2 %v5142_v37, %s4492_s24  ;;  %v794_v12 = vsel %vm143_vm1, %v785_v32, 0.0  ;;  %v770_v48 = vrot.slane %v711_v29, 4  ;;  %v790_v25 = vsel %vm140_vm0, 0.0, %v722_v49  ;;  %v5156_v24 = vsel %vm838_vm7, %v832_v10, %v712_v22 }
 0x2e3   :  { %v803_v19 = vsel %vm146_vm2, %v794_v12, %v735_v63  ;;  %v799_v43 = vsel %vm143_vm1, %v790_v25, 0.0  ;;  %v740_v40 = vrot.slane %v5103_v4, 6  ;;  %v863_v51 = vrot.slane %v5156_v24, 1  ;;  %v5252_v12 = vpop.permute.xlu1 %1049 }
 0x2e4   :  { %v812_v21 = vsel %vm149_vm3, %v803_v19, 0.0  ;;  %v758_v8 = vrot.slane %v5103_v4, 5  ;;  %v721_v59 = vrot.slane %v5105_v39, 7  ;;  %v859_v3 = vrot.slane %v5134_v31, 1 }
 0x2e5   :  { %v821_v13 = vsel %vm152_vm4, %v812_v21, %v753_v18  ;;  %v808_v41 = vsel %vm146_vm2, %v799_v43, %v740_v40  ;;  %v5179_v9 = vsel %vm838_vm7, %v863_v51, %v4607_v15  ;;  %v714_v56 = vrot.slane %v5103_v4, 4  ;;  %v5255_v18 = vpop.permute.xlu2 %4372 }
 0x2e6   :  { %v831_v46 = vsel %vm828_vm6, %v821_v13, 0.0  ;;  %v817_v29 = vsel %vm149_vm3, %v808_v41, 0.0  ;;  %v904_v17 = vrot.slane %v5134_v31, 2  ;;  %v789_v45 = vsel %vm140_vm0, 0.0, %v721_v59  ;;  %8959 = vst [vmem:[#allocation9_spill] sm:$0xff] %v5255_v18  ;;  %v5270_v13 = vpop.permute.xlu0 %1028 }
 0x2e7   :  { %v5159_v57 = vsel %vm838_vm7, %v831_v46, %v770_v48  ;;  %v826_v22 = vsel %vm152_vm4, %v817_v29, %v758_v8  ;;  %v5195_v26 = vsel %vm838_vm7, %v859_v3, %v4607_v15  ;;  %v798_v52 = vsel %vm143_vm1, %v789_v45, 0.0 }
 0x2e8   :  { %953 = vrot.lane.b32.xlu1 %v5156_v24, %s4492_s24  ;;  %951 = vrot.lane.b32.xlu0 %v5159_v57, %s4492_s24  ;;  %v836_v44 = vsel %vm828_vm6, %v826_v22, 0.0  ;;  %v905_v4 = vsel %vm828_vm6, %v904_v17, %v4580_v1  ;;  %v739_v55 = vrot.slane %v5105_v39, 6  ;;  %v757_v2 = vrot.slane %v5105_v39, 5 }
 0x2e9   :  { %v5191_v47 = vsel %vm838_vm7, %v836_v44, %v714_v56  ;;  %v723_v27 = vrot.slane %v714_v56, 7  ;;  %v912_v0 = vrot.slane %v5126_v28, 2  ;;  %v772_v34 = vrot.slane %v5105_v39, 4 }
 0x2ea   :  { %1030 = vrot.lane.b32.xlu2 %v5159_v57, %s4486_s28  ;;  %v871_v58 = vrot.slane %v5191_v47, 1  ;;  %v807_v14 = vsel %vm146_vm2, %v798_v52, %v739_v55  ;;  %v916_v50 = vrot.slane %v5191_v47, 2  ;;  %v741_v53 = vrot.slane %v714_v56, 6 }
 0x2eb   :  { %v816_v62 = vsel %vm149_vm3, %v807_v14, 0.0  ;;  %v791_v35 = vsel %vm140_vm0, 0.0, %v723_v27  ;;  %v913_v5 = vsel %vm828_vm6, %v912_v0, %v4580_v1  ;;  %v908_v39 = vrot.slane %v5156_v24, 2  ;;  %v5264_v21 = vpop.permute.xlu1 %1003 }
 0x2ec   :  { %v872_v6 = vsel %vm838_vm7, %v871_v58, %v4607_v15  ;;  %v917_v36 = vsel %vm828_vm6, %v916_v50, %v4580_v1  ;;  %v825_v30 = vsel %vm152_vm4, %v816_v62, %v757_v2  ;;  %v800_v54 = vsel %vm143_vm1, %v791_v35, 0.0 }
 0x2ed   :  { %v835_v42 = vsel %vm828_vm6, %v825_v30, 0.0  ;;  %v809_v38 = vsel %vm146_vm2, %v800_v54, %v741_v53  ;;  %v909_v60 = vsel %vm828_vm6, %v908_v39, %v4580_v1  ;;  %v759_v49 = vrot.slane %v714_v56, 5  ;;  %v5266_v48 = vpop.permute.xlu2 %949 }
 0x2ee   :  { %v5225_v7 = vsel %vm838_vm7, %v835_v42, %v772_v34  ;;  %v818_v61 = vsel %vm149_vm3, %v809_v38, 0.0  ;;  %v773_v63 = vrot.slane %v714_v56, 4  ;;  %v867_v19 = vrot.slane %v5126_v28, 1  ;;  %8960 = vst [vmem:[#allocation10_spill] sm:$0xff] %v5266_v48  ;;  %v5284_v51 = vpop.permute.xlu0 %976 }
 0x2ef   :  { %v827_v11 = vsel %vm152_vm4, %v818_v61, %v759_v49  ;;  %v865_v25 = vrot.slane %v5142_v37, 1  ;;  %v906_v41 = vrot.slane %v5159_v57, 2  ;;  %v869_v29 = vrot.slane %v5225_v7, 1 }
 0x2f0   :  { %1032 = vrot.lane.b32.xlu1 %v5156_v24, %s4486_s28  ;;  %1034 = vrot.lane.b32.xlu0 %v5142_v37, %s4486_s28  ;;  %v837_v20 = vsel %vm828_vm6, %v827_v11, 0.0  ;;  %v868_v10 = vsel %vm838_vm7, %v867_v19, %v4607_v15  ;;  %v910_v17 = vrot.slane %v5142_v37, 2  ;;  %v861_v55 = vrot.slane %v5159_v57, 1  ;;  %v1215_v19 = vld [vmem:[%s8839_s7 + $0x38] sm:$0xff] }
 0x2f1   :  { %v5247_v32 = vsel %vm838_vm7, %v837_v20, %v773_v63  ;;  %v866_v40 = vsel %vm838_vm7, %v865_v25, %v4607_v15  ;;  %v907_v59 = vsel %vm828_vm6, %v906_v41, %v4580_v1  ;;  %v870_v3 = vsel %vm838_vm7, %v869_v29, %v4607_v15  ;;  %v1216_v63 = vld [vmem:[%s8839_s7 + $0x40] sm:$0xff]  ;;  %v1214_v41 = vld [vmem:[%s8839_s7 + $0x30] sm:$0xff]  ;;  %v1213_v29 = vld [vmem:[%s8839_s7 + $0x28] sm:$0xff] }
 0x2f2   :  { %881 = vrot.lane.b32.xlu2 %v5179_v9, %s4489_s18  ;;  %v918_v44 = vrot.slane %v5247_v32, 2  ;;  %v862_v58 = vsel %vm838_vm7, %v861_v55, %v4607_v15  ;;  %v873_v62 = vrot.slane %v5247_v32, 1  ;;  %v914_v30 = vrot.slane %v5225_v7, 2  ;;  %1277 = vmatpush.msra.mxu0 %v1216_v63  ;;  %v1209_v55 = vld [vmem:[%s8839_s7 + $0x8] sm:$0xff] }
 0x2f3   :  { %v5274_v46 = vpop.permute.xlu1 %4377 }
 0x2f4   :  { %8961 = vst [vmem:[#allocation11_spill] sm:$0xff] %v5274_v46  ;;  %v919_v52 = vsel %vm828_vm6, %v918_v44, %v4580_v1  ;;  %v915_v0 = vsel %vm828_vm6, %v914_v30, %v4580_v1  ;;  %1278 = vmatpush.msra.mxu0 %v1215_v19 }
 0x2f5   :  { %v5276_v43 = vpop.permute.xlu2 %1070 }
 0x2f6   :  { %v5300_v56 = vpop.permute.xlu0 %4382  ;;  %1279 = vmatpush.msra.mxu0 %v1214_v41  ;;  %v4374_v41 = vunpack.i.l.bf16 %v5255_v18 }
 0x2f7   :  { %8964 = vst [vmem:[#allocation14_spill] sm:$0xff] %v5300_v56 }
 0x2f8   :  { %1038 = vrot.lane.b32.xlu1 %v5191_v47, %s4486_s28  ;;  %877 = vrot.lane.b32.xlu0 %v5195_v26, %s4489_s18 }
 0x2f9   :  { %1280 = vmatpush.msra.mxu0 %v1213_v29 }
 0x2fa   :  { %922 = vrot.lane.b32.xlu2 %v905_v4, %s4481_s19 }
 0x2fb   :  { %v5287_v8 = vpop.permute.xlu1 %2258 }
 0x2fc   :  { %8962 = vst [vmem:[#allocation12_spill] sm:$0xff] %v5287_v8 }
 0x2fd   :  { %v5289_v22 = vpop.permute.xlu2 %4387 }
 0x2fe   :  { %8963 = vst [vmem:[#allocation13_spill] sm:$0xff] %v5289_v22  ;;  %v5318_v14 = vpop.permute.xlu0 %4392 }
 0x2ff   :  { %8967 = vst [vmem:[#allocation17_spill] sm:$0xff] %v5318_v14 }
 0x300   :  { %961 = vrot.lane.b32.xlu1 %v5191_v47, %s4492_s24  ;;  %889 = vrot.lane.b32.xlu0 %v872_v6, %s4489_s18 }
 0x302   :  { %934 = vrot.lane.b32.xlu2 %v917_v36, %s4481_s19 }
 0x303   :  { %v5303_v45 = vpop.permute.xlu1 %2664 }
 0x304   :  { %8965 = vst [vmem:[#allocation15_spill] sm:$0xff] %v5303_v45 }
 0x308   :  { %1036 = vrot.lane.b32.xlu1 %v5225_v7, %s4486_s28  ;;  %930 = vrot.lane.b32.xlu0 %v913_v5, %s4481_s19 }
 0x30a   :  { %1001 = vrot.lane.b32.xlu2 %v905_v4, %s4491_s23  ;;  %v911_v4 = vsel %vm828_vm6, %v910_v17, %v4580_v1 }
 0x310   :  { %959 = vrot.lane.b32.xlu1 %v5225_v7, %s4492_s24  ;;  %1074 = vrot.lane.b32.xlu0 %v909_v60, %s4488_s30 }
 0x312   :  { %1053 = vrot.lane.b32.xlu2 %v5179_v9, %s4490_s3 }
 0x318   :  { %1040 = vrot.lane.b32.xlu1 %v5247_v32, %s4486_s28  ;;  %1011 = vrot.lane.b32.xlu0 %v913_v5, %s4491_s23 }
 0x31a   :  { %1007 = vrot.lane.b32.xlu2 %v909_v60, %s4491_s23 }
 0x320   :  { %963 = vrot.lane.b32.xlu1 %v5247_v32, %s4492_s24  ;;  %1080 = vrot.lane.b32.xlu0 %v917_v36, %s4488_s30 }
 0x322   :  { %984 = vrot.lane.b32.xlu2 %v868_v10, %s4484_s20 }
 0x328   :  { %885 = vrot.lane.b32.xlu1 %v868_v10, %s4489_s18  ;;  %1015 = vrot.lane.b32.xlu0 %v917_v36, %s4491_s23 }
 0x32a   :  { %1059 = vrot.lane.b32.xlu2 %v872_v6, %s4490_s3 }
 0x330   :  { %926 = vrot.lane.b32.xlu1 %v909_v60, %s4481_s19  ;;  %883 = vrot.lane.b32.xlu0 %v866_v40, %s4489_s18 }
 0x332   :  { %988 = vrot.lane.b32.xlu2 %v872_v6, %s4484_s20  ;;  %v874_v6 = vsel %vm838_vm7, %v873_v62, %v4607_v15 }
 0x338   :  { %974 = vrot.lane.b32.xlu1 %v5195_v26, %s4484_s20  ;;  %924 = vrot.lane.b32.xlu0 %v907_v59, %s4481_s19  ;;  %v5310_v26 = vpop.permute.xlu2 %4402 }
 0x339   :  { %8966 = vst [vmem:[#allocation16_spill] sm:$0xff] %v5310_v26 }
 0x33a   :  { %887 = vrot.lane.b32.xlu2 %v870_v3, %s4489_s18 }
 0x340   :  { %980 = vrot.lane.b32.xlu1 %v5179_v9, %s4484_s20  ;;  %936 = vrot.lane.b32.xlu0 %v919_v52, %s4481_s19  ;;  %v5322_v9 = vpop.permute.xlu1 %4397  ;;  %v5325_v50 = vpop.permute.xlu2 %955 }
 0x341   :  { %8968 = vst [vmem:[#allocation18_spill] sm:$0xff] %v5322_v9 }
 0x342   :  { %928 = vrot.lane.b32.xlu2 %v911_v4, %s4481_s19 }
 0x348   :  { %1051 = vrot.lane.b32.xlu0 %v862_v58, %s4490_s3  ;;  %879 = vrot.lane.b32.xlu1 %v862_v58, %s4489_s18  ;;  %v5338_v27 = vpop.permute.xlu2 %1030 }
 0x34a   :  { %978 = vrot.lane.b32.xlu2 %v862_v58, %s4484_s20  ;;  %v1208_v58 = vld [vmem:[%s8839_s7] sm:$0xff] }
 0x350   :  { %1005 = vrot.lane.b32.xlu0 %v907_v59, %s4491_s23  ;;  %891 = vrot.lane.b32.xlu1 %v874_v6, %s4489_s18  ;;  %v5349_v35 = vpop.permute.xlu2 %881 }
 0x351   :  { %v5332_v2 = vpop.permute.xlu0 %957 }
 0x352   :  { %v5334_v36 = vpop.permute.xlu1 %947  ;;  %1076 = vrot.lane.b32.xlu2 %v911_v4, %s4488_s30 }
 0x358   :  { %982 = vrot.lane.b32.xlu0 %v866_v40, %s4484_s20  ;;  %932 = vrot.lane.b32.xlu1 %v915_v0, %s4481_s19  ;;  %v5360_v53 = vpop.permute.xlu2 %922 }
 0x35a   :  { %v5344_v42 = vpop.permute.xlu1 %953  ;;  %v5346_v34 = vpop.permute.xlu0 %951  ;;  %1057 = vrot.lane.b32.xlu2 %v870_v3, %s4490_s3 }
 0x360   :  { %1078 = vrot.lane.b32.xlu0 %v915_v0, %s4488_s30  ;;  %1072 = vrot.lane.b32.xlu1 %v907_v59, %s4488_s30  ;;  %v5374_v49 = vpop.permute.xlu2 %934 }
 0x362   :  { %v5353_v5 = vpop.permute.xlu1 %1032  ;;  %v5355_v54 = vpop.permute.xlu0 %1034  ;;  %986 = vrot.lane.b32.xlu2 %v870_v3, %s4484_s20  ;;  %v1212_v3 = vld [vmem:[%s8839_s7 + $0x20] sm:$0xff] }
 0x363   :  { %1281 = vmatpush.msra.mxu0 %v1212_v3  ;;  %v1091_v3 = vsel %vm72_vm5, %v4610_v16, %v4374_v41 }
 0x368   :  { %1013 = vrot.lane.b32.xlu0 %v915_v0, %s4491_s23  ;;  %1055 = vrot.lane.b32.xlu1 %v866_v40, %s4490_s3  ;;  %v1002_v10 = vpop.permute.xlu2 %1001 }
 0x36a   :  { %v5362_v39 = vpop.permute.xlu1 %1038  ;;  %v5364_v38 = vpop.permute.xlu0 %877  ;;  %1061 = vrot.lane.b32.xlu2 %v874_v6, %s4490_s3 }
 0x370   :  { %1082 = vrot.lane.b32.xlu0 %v919_v52, %s4488_s30  ;;  %1009 = vrot.lane.b32.xlu1 %v911_v4, %s4491_s23  ;;  %v5397_v59 = vpop.permute.xlu2 %1053  ;;  %v1210_v4 = vld [vmem:[%s8839_s7 + $0x10] sm:$0xff] }
 0x372   :  { %v5369_v61 = vpop.permute.xlu1 %961  ;;  %v5371_v60 = vpop.permute.xlu0 %889  ;;  %990 = vrot.lane.b32.xlu2 %v874_v6, %s4484_s20 }
 0x378   :  { %1017 = vrot.lane.b32.xlu0 %v919_v52, %s4491_s23  ;;  %v1211_v52 = vld [vmem:[%s8839_s7 + $0x18] sm:$0xff]  ;;  %v5418_v62 = vpop.permute.xlu2 %1007 }
 0x379   :  { %1282 = vmatpush.msra.mxu0 %v1211_v52 }
 0x37a   :  { %v5377_v11 = vpop.permute.xlu1 %1036  ;;  %v5379_v20 = vpop.permute.xlu0 %930 }
 0x37b   :  { %1283 = vmatpush.msra.mxu0 %v1210_v4  ;;  %v4370_v4 = vunpack.i.h.bf16 %v4674_v33 }
 0x37d   :  { %1284 = vmatpush.msra.mxu0 %v1209_v55 }
 0x37f   :  { %1285 = vmatpush.msra.mxu0 %v1208_v58  ;;  %v5439_v58 = vsel %vm440_vm8, %v1091_v3, %v4370_v4 }
 0x380   :  { %v5426_v63 = vpop.permute.xlu2 %984  ;;  %v1110_v26 = vsel %vm1109_vm14, %v5439_v58, %v5334_v36 }
 0x382   :  { %v5387_v25 = vpop.permute.xlu1 %959  ;;  %v5389_v40 = vpop.permute.xlu0 %1074 }
 0x388   :  { %v5433_v52 = vpop.permute.xlu2 %1059 }
 0x38a   :  { %v5402_v44 = vpop.permute.xlu1 %1040  ;;  %v5404_v17 = vpop.permute.xlu0 %1011 }
 0x390   :  { %v5452_v4 = vpop.permute.xlu2 %988 }
 0x392   :  { %v5420_v6 = vpop.permute.xlu1 %963  ;;  %v5422_v30 = vpop.permute.xlu0 %1080 }
 0x39a   :  { %v5424_v0 = vpop.permute.xlu1 %885  ;;  %v5428_v19 = vpop.permute.xlu0 %1015 }
 0x3a2   :  { %v927_v29 = vpop.permute.xlu1 %926  ;;  %v5436_v55 = vpop.permute.xlu0 %883 }
 0x3aa   :  { %v975_v45 = vpop.permute.xlu1 %974  ;;  %v925_v36 = vpop.permute.xlu0 %924 }
 0x3ab   :  { %v1126_v18 = vsel %vm448_vm9, %v1110_v26, %v975_v45  ;;  %v5455_v45 = vpop.permute.xlu2 %887 }
 0x3ac   :  { %v1143_v41 = vsel %vm1142_vm15, %v1126_v18, %v1002_v10  ;;  %v1092_v10 = vsel %vm72_vm5, %v5134_v31, %v5364_v38 }
 0x3ad   :  { %v1159_v16 = vsel %vm456_vm10, %v1143_v41, %v5270_v13 }
 0x3ae   :  { %v1176_v33 = vsel %vm1175_vm11, %v1159_v16, %v5252_v12 }
 0x3af   :  { %v1192_v3 = vsel %vm465_vm12, %v1176_v33, %v5276_v43  ;;  %v1101_v33 = vsel %vm440_vm8, %v1092_v10, %v5360_v53  ;;  %v1112_v53 = vsel %vm1109_vm14, %v5439_v58, %v5346_v34 }
 0x3b0   :  { %4175 = vmatmul.msk.f32.vlgmr.msra.gmra.mxu0 %vm1221_vm13, %v1192_v3  ;;  %v1111_v3 = vsel %vm1109_vm14, %v1101_v33, %v5266_v48 }
 0x3b1   :  { %v1127_v56 = vsel %vm448_vm9, %v1111_v3, %v5284_v51 }
 0x3b2   :  { %v981_v14 = vpop.permute.xlu1 %980  ;;  %v5457_v26 = vpop.permute.xlu0 %936  ;;  %v1144_v23 = vsel %vm1142_vm15, %v1127_v56, %v5264_v21 }
 0x3b3   :  { %v929_v16 = vpop.permute.xlu2 %928  ;;  %v1160_v33 = vsel %vm456_vm10, %v1144_v23, %v5338_v27 }
 0x3ba   :  { %v880_v18 = vpop.permute.xlu1 %879  ;;  %v1052_v9 = vpop.permute.xlu0 %1051 }
 0x3bb   :  { %v979_v8 = vpop.permute.xlu2 %978  ;;  %v1093_v31 = vsel %vm72_vm5, %v5159_v57, %v880_v18  ;;  %v1177_v3 = vsel %vm1175_vm11, %v1160_v33, %v1052_v9  ;;  %v1094_v18 = vsel %vm72_vm5, %v5156_v24, %v5349_v35 }
 0x3bc   :  { %v1128_v10 = vsel %vm448_vm9, %v1112_v53, %v979_v8  ;;  %v1102_v46 = vsel %vm440_vm8, %v1093_v31, %v925_v36 }
 0x3bd   :  { %v1113_v57 = vsel %vm1109_vm14, %v1102_v46, %v5266_v48 }
 0x3be   :  { %v1129_v23 = vsel %vm448_vm9, %v1113_v57, %v5284_v51 }
 0x3bf   :  { %v1146_v9 = vsel %vm1142_vm15, %v1129_v23, %v5264_v21 }
 0x3c2   :  { %v5462_v41 = vpop.permute.xlu1 %891  ;;  %v1006_v38 = vpop.permute.xlu0 %1005 }
 0x3c3   :  { %v1145_v1 = vsel %vm1142_vm15, %v1128_v10, %v1006_v38  ;;  %v1103_v38 = vsel %vm440_vm8, %v1094_v18, %v927_v29  ;;  %v1095_v29 = vsel %vm72_vm5, %v5142_v37, %v5436_v55  ;;  %v1077_v23 = vpop.permute.xlu2 %1076 }
 0x3c4   :  { %v1161_v8 = vsel %vm456_vm10, %v1145_v1, %v5270_v13  ;;  %v1114_v1 = vsel %vm1109_vm14, %v5439_v58, %v5344_v42  ;;  %v1104_v57 = vsel %vm440_vm8, %v1095_v29, %v929_v16 }
 0x3c5   :  { %v1178_v27 = vsel %vm1175_vm11, %v1161_v8, %v5252_v12  ;;  %v1130_v46 = vsel %vm448_vm9, %v1114_v1, %v981_v14  ;;  %v1117_v55 = vsel %vm1109_vm14, %v1104_v57, %v5266_v48  ;;  %v1118_v1 = vsel %vm1109_vm14, %v5439_v58, %v5332_v2 }
 0x3c6   :  { %v1194_v34 = vsel %vm465_vm12, %v1178_v27, %v5276_v43  ;;  %v1147_v31 = vsel %vm1142_vm15, %v1130_v46, %v5418_v62 }
 0x3c7   :  { %v1163_v14 = vsel %vm456_vm10, %v1147_v31, %v5270_v13  ;;  %v1096_v31 = vsel %vm72_vm5, %v5126_v28, %v5424_v0 }
 0x3c8   :  { %v1180_v24 = vsel %vm1175_vm11, %v1163_v14, %v5252_v12 }
 0x3c9   :  { %v1196_v62 = vsel %vm465_vm12, %v1180_v24, %v5276_v43 }
 0x3ca   :  { %v5468_v22 = vpop.permute.xlu1 %932  ;;  %v983_v53 = vpop.permute.xlu0 %982 }
 0x3d2   :  { %v1073_v56 = vpop.permute.xlu1 %1072 }
 0x3d3   :  { %v1193_v15 = vsel %vm465_vm12, %v1177_v3, %v1073_v56  ;;  %v1116_v3 = vsel %vm1109_vm14, %v5439_v58, %v5325_v50  ;;  %v1133_v50 = vsel %vm448_vm9, %v1117_v55, %v5284_v51 }
 0x3d4   :  { %4176 = vmatmul.msk.f32.gmra.mxu0 %vm1221_vm13, %v1193_v15  ;;  %v1162_v15 = vsel %vm456_vm10, %v1146_v9, %v5353_v5  ;;  %v1132_v8 = vsel %vm448_vm9, %v1116_v3, %v983_v53  ;;  %v1150_v9 = vsel %vm1142_vm15, %v1133_v50, %v5264_v21 }
 0x3d5   :  { %v1179_v36 = vsel %vm1175_vm11, %v1162_v15, %v5397_v59  ;;  %v1115_v59 = vsel %vm1109_vm14, %v1103_v38, %v5266_v48  ;;  %v1166_v15 = vsel %vm456_vm10, %v1150_v9, %v5270_v13 }
 0x3d6   :  { %v1195_v5 = vsel %vm465_vm12, %v1179_v36, %v5389_v40  ;;  %v1131_v35 = vsel %vm448_vm9, %v1115_v59, %v5284_v51  ;;  %v1183_v46 = vsel %vm1175_vm11, %v1166_v15, %v5252_v12  ;;  %v1134_v36 = vsel %vm448_vm9, %v1118_v1, %v5426_v63  ;;  %v1079_v63 = vpop.permute.xlu0 %1078 }
 0x3d7   :  { %v1148_v40 = vsel %vm1142_vm15, %v1131_v35, %v5264_v21  ;;  %v1151_v18 = vsel %vm1142_vm15, %v1134_v36, %v5404_v17  ;;  %v1199_v38 = vsel %vm465_vm12, %v1183_v46, %v5276_v43  ;;  %v1120_v35 = vsel %vm1109_vm14, %v5439_v58, %v5387_v25 }
 0x3d8   :  { %v1164_v10 = vsel %vm456_vm10, %v1148_v40, %v5355_v54  ;;  %v1167_v2 = vsel %vm456_vm10, %v1151_v18, %v5270_v13 }
 0x3d9   :  { %v1184_v14 = vsel %vm1175_vm11, %v1167_v2, %v5252_v12 }
 0x3da   :  { %v1056_v42 = vpop.permute.xlu1 %1055  ;;  %v1200_v0 = vsel %vm465_vm12, %v1184_v14, %v5276_v43 }
 0x3db   :  { %v1181_v56 = vsel %vm1175_vm11, %v1164_v10, %v1056_v42  ;;  %v1105_v42 = vsel %vm440_vm8, %v1096_v31, %v5379_v20 }
 0x3dc   :  { %4177 = vmatmul.msk.f32.gmra.mxu0 %vm1221_vm13, %v1194_v34  ;;  %v1197_v37 = vsel %vm465_vm12, %v1181_v56, %v1077_v23  ;;  %v1119_v17 = vsel %vm1109_vm14, %v1105_v42, %v5266_v48 }
 0x3dd   :  { %v1135_v28 = vsel %vm448_vm9, %v1119_v17, %v5284_v51 }
 0x3de   :  { %v1152_v59 = vsel %vm1142_vm15, %v1135_v28, %v5264_v21  ;;  %v1014_v20 = vpop.permute.xlu0 %1013 }
 0x3df   :  { %v1168_v40 = vsel %vm456_vm10, %v1152_v59, %v5377_v11 }
 0x3e2   :  { %v1010_v33 = vpop.permute.xlu1 %1009 }
 0x3e3   :  { %v1149_v27 = vsel %vm1142_vm15, %v1132_v8, %v1010_v33  ;;  %v1122_v8 = vsel %vm1109_vm14, %v5439_v58, %v5369_v61 }
 0x3e4   :  { %4178 = vmatmul.msk.f32.gmra.mxu0 %vm1221_vm13, %v1195_v5  ;;  %v1165_v54 = vsel %vm456_vm10, %v1149_v27, %v5270_v13  ;;  %v1058_v5 = vpop.permute.xlu2 %1057  ;;  %v1138_v27 = vsel %vm448_vm9, %v1122_v8, %v5452_v4 }
 0x3e5   :  { %v1182_v16 = vsel %vm1175_vm11, %v1165_v54, %v5252_v12  ;;  %v1185_v10 = vsel %vm1175_vm11, %v1168_v40, %v1058_v5 }
 0x3e6   :  { %v1198_v34 = vsel %vm465_vm12, %v1182_v16, %v5276_v43  ;;  %v1201_v3 = vsel %vm465_vm12, %v1185_v10, %v1079_v63 }
 0x3ec   :  { %4179 = vmatmul.msk.f32.gmra.mxu0 %vm1221_vm13, %v1196_v62  ;;  %v987_v24 = vpop.permute.xlu2 %986  ;;  %v1097_v62 = vsel %vm72_vm5, %v5225_v7, %v5455_v45 }
 0x3ed   :  { %v1136_v29 = vsel %vm448_vm9, %v1120_v35, %v987_v24  ;;  %v1106_v53 = vsel %vm440_vm8, %v1097_v62, %v5468_v22 }
 0x3ee   :  { %v1153_v33 = vsel %vm1142_vm15, %v1136_v29, %v1014_v20  ;;  %v1121_v25 = vsel %vm1109_vm14, %v1106_v53, %v5266_v48 }
 0x3ef   :  { %v1169_v7 = vsel %vm456_vm10, %v1153_v33, %v5270_v13  ;;  %v1137_v11 = vsel %vm448_vm9, %v1121_v25, %v5284_v51 }
 0x3f0   :  { %v1186_v22 = vsel %vm1175_vm11, %v1169_v7, %v5252_v12  ;;  %v1154_v45 = vsel %vm1142_vm15, %v1137_v11, %v5264_v21 }
 0x3f1   :  { %v1202_v56 = vsel %vm465_vm12, %v1186_v22, %v5276_v43  ;;  %v1170_v57 = vsel %vm456_vm10, %v1154_v45, %v5362_v39  ;;  %v1098_v39 = vsel %vm72_vm5, %v5191_v47, %v5371_v60  ;;  %v1099_v60 = vsel %vm72_vm5, %v5247_v32, %v5462_v41 }
 0x3f2   :  { %v1187_v23 = vsel %vm1175_vm11, %v1170_v57, %v5433_v52  ;;  %v1083_v52 = vpop.permute.xlu0 %1082  ;;  %v1107_v4 = vsel %vm440_vm8, %v1098_v39, %v5374_v49  ;;  %v1108_v1 = vsel %vm440_vm8, %v1099_v60, %v5457_v26 }
 0x3f3   :  { %v1203_v55 = vsel %vm465_vm12, %v1187_v23, %v5422_v30  ;;  %v1123_v30 = vsel %vm1109_vm14, %v1107_v4, %v5266_v48  ;;  %v1125_v18 = vsel %vm1109_vm14, %v1108_v1, %v5266_v48 }
 0x3f4   :  { %4180 = vmatmul.msk.f32.gmra.mxu0 %vm1221_vm13, %v1197_v37  ;;  %v1155_v37 = vsel %vm1142_vm15, %v1138_v27, %v5428_v19  ;;  %v1062_v54 = vpop.permute.xlu2 %1061  ;;  %v1139_v47 = vsel %vm448_vm9, %v1123_v30, %v5284_v51 }
 0x3f5   :  { %v1171_v61 = vsel %vm456_vm10, %v1155_v37, %v5270_v13  ;;  %v1156_v9 = vsel %vm1142_vm15, %v1139_v47, %v5264_v21 }
 0x3f6   :  { %v1188_v19 = vsel %vm1175_vm11, %v1171_v61, %v5252_v12  ;;  %v1172_v15 = vsel %vm456_vm10, %v1156_v9, %v5402_v44  ;;  %v1141_v44 = vsel %vm448_vm9, %v1125_v18, %v5284_v51 }
 0x3f7   :  { %v1204_v50 = vsel %vm465_vm12, %v1188_v19, %v5276_v43  ;;  %v1189_v36 = vsel %vm1175_vm11, %v1172_v15, %v1062_v54  ;;  %v1158_v26 = vsel %vm1142_vm15, %v1141_v44, %v5264_v21  ;;  %v4445_v21 = vld [vmem:[%s8840_s8] ss:$0 sm:$0xff] }
 0x3f8   :  { %v1205_v41 = vsel %vm465_vm12, %v1189_v36, %v1083_v52 }
 0x3fa   :  { %v1018_v49 = vpop.permute.xlu0 %1017 }
 0x3fc   :  { %4181 = vmatmul.msk.f32.gmra.mxu0 %vm1221_vm13, %v1198_v34  ;;  %v991_v16 = vpop.permute.xlu2 %990  ;;  %v1124_v34 = vsel %vm1109_vm14, %v5439_v58, %v5420_v6 }
 0x3fd   :  { %v1140_v46 = vsel %vm448_vm9, %v1124_v34, %v991_v16 }
 0x3fe   :  { %v1157_v32 = vsel %vm1142_vm15, %v1140_v46, %v1018_v49 }
 0x3ff   :  { %v1173_v6 = vsel %vm456_vm10, %v1157_v32, %v5270_v13 }
 0x400   :  { %v1190_v58 = vsel %vm1175_vm11, %v1173_v6, %v5252_v12 }
 0x401   :  { %v1206_v31 = vsel %vm465_vm12, %v1190_v58, %v5276_v43 }
 0x404   :  { %4182 = vmatmul.msk.f32.gmra.mxu0 %vm1221_vm13, %v1199_v38  ;;  %v1174_v38 = vsel %vm456_vm10, %v1158_v26, %v5270_v13  ;;  %vm1335_vm10 = vcmask 31744  }
 0x405   :  { %v1191_v5 = vsel %vm1175_vm11, %v1174_v38, %v5252_v12 }
 0x406   :  { %v1207_v51 = vsel %vm465_vm12, %v1191_v5, %v5276_v43 }
 0x40c   :  { %4183 = vmatmul.msk.f32.gmra.mxu0 %vm1221_vm13, %v1200_v0 }
 0x414   :  { %4184 = vmatmul.msk.f32.gmra.mxu0 %vm1221_vm13, %v1201_v3 }
 0x41c   :  { %4185 = vmatmul.msk.f32.gmra.mxu0 %vm1221_vm13, %v1202_v56 }
 0x424   :  { %4186 = vmatmul.msk.f32.gmra.mxu0 %vm1221_vm13, %v1203_v55 }
 0x42c   :  { %4187 = vmatmul.msk.f32.gmra.mxu0 %vm1221_vm13, %v1204_v50 }
 0x42d   :  { %v1287_v2 = vpop.f32.mrf.mxu0 }
 0x42e   :  { %v5689_v14 = vadd.f32 %v4445_v21, %v1287_v2 }
 0x430   :  { %v1336_v43 = vsel %vm1335_vm10, %v5689_v14, 0.0 }
 0x434   :  { %4188 = vmatmul.msk.f32.gmra.mxu0 %vm1221_vm13, %v1205_v41 }
 0x43c   :  { %4189 = vmatmul.msk.f32.gmra.mxu0 %vm1221_vm13, %v1206_v31 }
 0x444   :  { %4190 = vmatmul.msk.f32.gmra.mxu0 %vm1221_vm13, %v1207_v51 }
 0x451   :  { %v1290_v42 = vpop.f32.mrf.mxu0 }
 0x452   :  { %v5687_v17 = vadd.f32 %v4445_v21, %v1290_v42 }
 0x454   :  { %v1337_v12 = vsel %vm1335_vm10, %v5687_v17, 0.0 }
 0x455   :  { %v1338_v0 = vadd.f32 %v1337_v12, %v1336_v43 }
 0x459   :  { %v1293_v63 = vpop.f32.mrf.mxu0 }
 0x45a   :  { %v5691_v13 = vadd.f32 %v4445_v21, %v1293_v63 }
 0x45c   :  { %v1339_v28 = vsel %vm1335_vm10, %v5691_v13, 0.0 }
 0x45d   :  { %v1340_v20 = vadd.f32 %v1339_v28, %v1338_v0 }
 0x461   :  { %v1296_v59 = vpop.f32.mrf.mxu0 }
 0x462   :  { %v1297_v24 = vadd.f32 %v4445_v21, %v1296_v59 }
 0x464   :  { %v1341_v35 = vsel %vm1335_vm10, %v1297_v24, 0.0 }
 0x465   :  { %v1342_v62 = vadd.f32 %v1341_v35, %v1340_v20 }
 0x469   :  { %v1299_v40 = vpop.f32.mrf.mxu0 }
 0x46a   :  { %v1300_v29 = vadd.f32 %v4445_v21, %v1299_v40 }
 0x46c   :  { %v1343_v53 = vsel %vm1335_vm10, %v1300_v29, 0.0 }
 0x46d   :  { %v1344_v10 = vadd.f32 %v1343_v53, %v1342_v62 }
 0x471   :  { %v1302_v33 = vpop.f32.mrf.mxu0 }
 0x472   :  { %v1303_v57 = vadd.f32 %v4445_v21, %v1302_v33 }
 0x474   :  { %v1345_v23 = vsel %vm1335_vm10, %v1303_v57, 0.0 }
 0x475   :  { %v1346_v39 = vadd.f32 %v1345_v23, %v1344_v10 }
 0x479   :  { %v1305_v3 = vpop.f32.mrf.mxu0 }
 0x47a   :  { %v1306_v8 = vadd.f32 %v4445_v21, %v1305_v3 }
 0x47c   :  { %v1347_v37 = vsel %vm1335_vm10, %v1306_v8, 0.0 }
 0x47d   :  { %v1348_v4 = vadd.f32 %v1347_v37, %v1346_v39 }
 0x481   :  { %v1308_v25 = vpop.f32.mrf.mxu0 }
 0x482   :  { %v1309_v27 = vadd.f32 %v4445_v21, %v1308_v25 }
 0x484   :  { %v1349_v61 = vsel %vm1335_vm10, %v1309_v27, 0.0 }
 0x485   :  { %v1350_v50 = vadd.f32 %v1349_v61, %v1348_v4 }
 0x489   :  { %v1311_v7 = vpop.f32.mrf.mxu0 }
 0x48a   :  { %v1312_v55 = vadd.f32 %v4445_v21, %v1311_v7 }
 0x48c   :  { %v1351_v19 = vsel %vm1335_vm10, %v1312_v55, 0.0 }
 0x48d   :  { %v1352_v16 = vadd.f32 %v1351_v19, %v1350_v50 }
 0x491   :  { %v1314_v11 = vpop.f32.mrf.mxu0 }
 0x492   :  { %v1315_v52 = vadd.f32 %v4445_v21, %v1314_v11 }
 0x494   :  { %v1353_v47 = vsel %vm1335_vm10, %v1315_v52, 0.0 }
 0x495   :  { %v1354_v34 = vadd.f32 %v1353_v47, %v1352_v16 }
 0x499   :  { %v1317_v22 = vpop.f32.mrf.mxu0 }
 0x49a   :  { %v1318_v30 = vadd.f32 %v4445_v21, %v1317_v22 }
 0x49c   :  { %v1355_v49 = vsel %vm1335_vm10, %v1318_v30, 0.0 }
 0x49d   :  { %v1356_v36 = vadd.f32 %v1355_v49, %v1354_v34 }
 0x4a1   :  { %v1320_v45 = vpop.f32.mrf.mxu0 }
 0x4a2   :  { %v1321_v60 = vadd.f32 %v4445_v21, %v1320_v45 }
 0x4a4   :  { %v1357_v1 = vsel %vm1335_vm10, %v1321_v60, 0.0 }
 0x4a5   :  { %v1358_v18 = vadd.f32 %v1357_v1, %v1356_v36 }
 0x4a9   :  { %v1323_v56 = vpop.f32.mrf.mxu0 }
 0x4aa   :  { %v1324_v9 = vadd.f32 %v4445_v21, %v1323_v56 }
 0x4ac   :  { %v1359_v32 = vsel %vm1335_vm10, %v1324_v9, 0.0 }
 0x4ad   :  { %v1360_v44 = vadd.f32 %v1359_v32, %v1358_v18 }
 0x4b1   :  { %v1326_v54 = vpop.f32.mrf.mxu0 }
 0x4b2   :  { %v1327_v46 = vadd.f32 %v4445_v21, %v1326_v54 }
 0x4b4   :  { %v1361_v6 = vsel %vm1335_vm10, %v1327_v46, 0.0 }
 0x4b5   :  { %v1362_v26 = vadd.f32 %v1361_v6, %v1360_v44 }
 0x4b9   :  { %v1329_v15 = vpop.f32.mrf.mxu0 }
 0x4ba   :  { %v5709_v41 = vadd.f32 %v4445_v21, %v1329_v15 }
 0x4bc   :  { %v1363_v58 = vsel %vm1335_vm10, %v5709_v41, 0.0 }
 0x4bd   :  { %v1364_v5 = vadd.f32 %v1363_v58, %v1362_v26 }
 0x4c1   :  { %v1332_v31 = vpop.f32.mrf.mxu0 }
 0x4c2   :  { %v1333_v38 = vadd.f32 %v4445_v21, %v1332_v31 }
 0x4c4   :  { %v1365_v51 = vsel %vm1335_vm10, %v1333_v38, 0.0 }
 0x4c5   :  { %v1366_v2 = vadd.f32 %v1365_v51, %v1364_v5 }
 0x4c7   :  { %v1367_v42 = vrot.slane %v1366_v2, 4 }
 0x4c9   :  { %v1368_v63 = vadd.f32 %v1367_v42, %v1366_v2 }
 0x4cb   :  { %v1369_v12 = vrot.slane %v1368_v63, 2 }
 0x4cd   :  { %v1370_v43 = vadd.f32 %v1369_v12, %v1368_v63 }
 0x4cf   :  { %v1371_v28 = vrot.slane %v1370_v43, 1 }
 0x4d1   :  { %v1372_v0 = vadd.f32 %v1371_v28, %v1370_v43 }
 0x4d3   :  { %v1373_v59 = vmul.f32 0.0078125, %v1372_v0 }
 0x4d5   :  { %v5716_v20 = vsub.f32 %v5689_v14, %v1373_v59  ;;  %v5719_v35 = vsub.f32 %v5687_v17, %v1373_v59  ;;  %v5722_v62 = vsub.f32 %v5691_v13, %v1373_v59  ;;  %v5724_v21 = vsub.f32 %v1297_v24, %v1373_v59 }
 0x4d6   :  { %v5726_v40 = vsub.f32 %v1300_v29, %v1373_v59  ;;  %v5734_v33 = vsub.f32 %v1303_v57, %v1373_v59  ;;  %v5740_v3 = vsub.f32 %v1306_v8, %v1373_v59  ;;  %v5745_v22 = vsub.f32 %v1309_v27, %v1373_v59 }
 0x4d7   :  { %v1390_v53 = vmul.f32 %v5716_v20, %v5716_v20  ;;  %v1391_v10 = vmul.f32 %v5719_v35, %v5719_v35  ;;  %v1392_v14 = vmul.f32 %v5722_v62, %v5722_v62  ;;  %v1393_v17 = vmul.f32 %v5724_v21, %v5724_v21 }
 0x4d8   :  { %v1394_v25 = vmul.f32 %v5726_v40, %v5726_v40  ;;  %v1395_v45 = vmul.f32 %v5734_v33, %v5734_v33  ;;  %v5750_v23 = vsub.f32 %v1312_v55, %v1373_v59  ;;  %v1396_v8 = vmul.f32 %v5740_v3, %v5740_v3 }
 0x4d9   :  { %v1406_v13 = vsel %vm1335_vm10, %v1390_v53, 0.0  ;;  %v1407_v24 = vsel %vm1335_vm10, %v1391_v10, 0.0  ;;  %v1409_v7 = vsel %vm1335_vm10, %v1392_v14, 0.0  ;;  %v1411_v56 = vsel %vm1335_vm10, %v1393_v17, 0.0 }
 0x4da   :  { %v1408_v29 = vadd.f32 %v1407_v24, %v1406_v13  ;;  %v1413_v37 = vsel %vm1335_vm10, %v1394_v25, 0.0  ;;  %v5755_v54 = vsub.f32 %v1315_v52, %v1373_v59  ;;  %v1397_v27 = vmul.f32 %v5745_v22, %v5745_v22 }
 0x4db   :  { %v1415_v61 = vsel %vm1335_vm10, %v1395_v45, 0.0  ;;  %v1384_v19 = vsub.f32 %v1318_v30, %v1373_v59  ;;  %v1398_v50 = vmul.f32 %v5750_v23, %v5750_v23  ;;  %v1417_v55 = vsel %vm1335_vm10, %v1396_v8, 0.0  ;;  %v1444_v8 = vld [vmem:[%s8841_s9] sm:$0x1] }
 0x4dc   :  { %v1410_v11 = vadd.f32 %v1409_v7, %v1408_v29  ;;  %v1385_v16 = vsub.f32 %v1321_v60, %v1373_v59  ;;  %v1399_v49 = vmul.f32 %v5755_v54, %v5755_v54  ;;  %v1419_v52 = vsel %vm1335_vm10, %v1397_v27, 0.0 }
 0x4dd   :  { %v1386_v15 = vsub.f32 %v1324_v9, %v1373_v59  ;;  %v1400_v1 = vmul.f32 %v1384_v19, %v1384_v19  ;;  %v1421_v36 = vsel %vm1335_vm10, %v1398_v50, 0.0  ;;  %v1387_v18 = vsub.f32 %v1327_v46, %v1373_v59 }
 0x4de   :  { %v1412_v57 = vadd.f32 %v1411_v56, %v1410_v11  ;;  %v1401_v30 = vmul.f32 %v1385_v16, %v1385_v16  ;;  %v1423_v6 = vsel %vm1335_vm10, %v1399_v49, 0.0  ;;  %v1388_v58 = vsub.f32 %v5709_v41, %v1373_v59 }
 0x4df   :  { %v1402_v26 = vmul.f32 %v1386_v15, %v1386_v15  ;;  %v1425_v60 = vsel %vm1335_vm10, %v1400_v1, 0.0  ;;  %v1389_v5 = vsub.f32 %v1333_v38, %v1373_v59  ;;  %v1403_v51 = vmul.f32 %v1387_v18, %v1387_v18 }
 0x4e0   :  { %v1414_v39 = vadd.f32 %v1413_v37, %v1412_v57  ;;  %v1427_v2 = vsel %vm1335_vm10, %v1401_v30, 0.0  ;;  %v1404_v42 = vmul.f32 %v1388_v58, %v1388_v58 }
 0x4e1   :  { %v1429_v63 = vsel %vm1335_vm10, %v1402_v26, 0.0  ;;  %v1405_v46 = vmul.f32 %v1389_v5, %v1389_v5  ;;  %v1431_v43 = vsel %vm1335_vm10, %v1403_v51, 0.0 }
 0x4e2   :  { %v1416_v4 = vadd.f32 %v1415_v61, %v1414_v39  ;;  %v1433_v0 = vsel %vm1335_vm10, %v1404_v42, 0.0 }
 0x4e3   :  { %v1435_v53 = vsel %vm1335_vm10, %v1405_v46, 0.0 }
 0x4e4   :  { %v1418_v47 = vadd.f32 %v1417_v55, %v1416_v4  ;;  %v5781_v4 = vld [vmem:[%s8842_s10] ss:$0 sm:$0xff] }
 0x4e6   :  { %v1420_v34 = vadd.f32 %v1419_v52, %v1418_v47 }
 0x4e8   :  { %v1422_v32 = vadd.f32 %v1421_v36, %v1420_v34 }
 0x4ea   :  { %v1424_v44 = vadd.f32 %v1423_v6, %v1422_v32 }
 0x4ec   :  { %v1426_v31 = vadd.f32 %v1425_v60, %v1424_v44 }
 0x4ee   :  { %v1428_v9 = vadd.f32 %v1427_v2, %v1426_v31 }
 0x4f0   :  { %v1430_v12 = vadd.f32 %v1429_v63, %v1428_v9 }
 0x4f2   :  { %v1432_v28 = vadd.f32 %v1431_v43, %v1430_v12 }
 0x4f4   :  { %v1434_v41 = vadd.f32 %v1433_v0, %v1432_v28 }
 0x4f6   :  { %v1436_v10 = vadd.f32 %v1435_v53, %v1434_v41 }
 0x4f8   :  { %v1437_v14 = vrot.slane %v1436_v10, 4 }
 0x4fa   :  { %v1438_v38 = vadd.f32 %v1437_v14, %v1436_v10 }
 0x4fc   :  { %v1439_v59 = vrot.slane %v1438_v38, 2 }
 0x4fe   :  { %v1440_v17 = vadd.f32 %v1439_v59, %v1438_v38 }
 0x500   :  { %v1441_v13 = vrot.slane %v1440_v17, 1 }
 0x502   :  { %v1442_v24 = vadd.f32 %v1441_v13, %v1440_v17 }
 0x504   :  { %v1443_v29 = vmul.f32 0.0078125, %v1442_v24 }
 0x506   :  { %v1445_v25 = vadd.f32 1e-05, %v1443_v29 }
 0x508   :  { %4450 = vrsqrt.f32 %v1445_v25  ;;  %vm1452_vm15 = vweird.f32 %v1445_v25 }
 0x50e   :  { %v4451_v7 = vpop.eup %4450 }
 0x50f   :  { %v1447_v11 = vmul.f32 %v4451_v7, %v1445_v25  ;;  %vm1453_vm12 = vweird.f32 %v4451_v7 }
 0x510   :  { %vm1454_vm11 = vmor %vm1452_vm15, %vm1453_vm12 }
 0x511   :  { %v1448_v45 = vmul.f32 %v4451_v7, %v1447_v11 }
 0x513   :  { %v1449_v56 = vmul.f32 0.5, %v1448_v45 }
 0x515   :  { %v1450_v57 = vsub.f32 1.5, %v1449_v56 }
 0x517   :  { %v1451_v37 = vmul.f32 %v4451_v7, %v1450_v57 }
 0x519   :  { %v1455_v39 = vsel %vm1454_vm11, %v4451_v7, %v1451_v37 }
 0x51a   :  { %v1456_v27 = vmul.f32 %v1455_v39, %v1444_v8 }
 0x51c   :  { %v1458_v61 = vperm.slane %v1456_v27, 0 }
 0x51e   :  { %v1462_v50 = vmul.f32 %v1458_v61, %v5722_v62  ;;  %v1465_v55 = vmul.f32 %v1458_v61, %v5734_v33  ;;  %v1466_v47 = vmul.f32 %v1458_v61, %v5740_v3  ;;  %v1470_v49 = vmul.f32 %v1458_v61, %v1384_v19 }
 0x51f   :  { %v1471_v52 = vmul.f32 %v1458_v61, %v1385_v16  ;;  %v1472_v34 = vmul.f32 %v1458_v61, %v1386_v15  ;;  %v1473_v1 = vmul.f32 %v1458_v61, %v1387_v18  ;;  %v1468_v36 = vmul.f32 %v1458_v61, %v5750_v23 }
 0x520   :  { %v1474_v32 = vmul.f32 %v1458_v61, %v1388_v58  ;;  %v1475_v30 = vmul.f32 %v1458_v61, %v1389_v5  ;;  %v1485_v6 = vadd.f32 %v5781_v4, %v1465_v55  ;;  %v1463_v44 = vmul.f32 %v1458_v61, %v5724_v21 }
 0x521   :  { %v1482_v26 = vadd.f32 %v5781_v4, %v1462_v50  ;;  %v5791_v62 = vadd.f32 %v5781_v4, %v1470_v49  ;;  %v5794_v33 = vadd.f32 %v5781_v4, %v1471_v52  ;;  %v5797_v3 = vadd.f32 %v5781_v4, %v1472_v34 }
 0x522   :  { %v5800_v19 = vadd.f32 %v5781_v4, %v1473_v1  ;;  %v1467_v23 = vmul.f32 %v1458_v61, %v5745_v22  ;;  %v1469_v16 = vmul.f32 %v1458_v61, %v5755_v54  ;;  %v5805_v21 = vadd.f32 %v5781_v4, %v1474_v32 }
 0x523   :  { %v5808_v15 = vadd.f32 %v5781_v4, %v1475_v30  ;;  %v1486_v18 = vadd.f32 %v5781_v4, %v1466_v47  ;;  %v1488_v58 = vadd.f32 %v5781_v4, %v1468_v36  ;;  %v5812_v60 = vmax.f32 %v1485_v6, 0.0 }
 0x524   :  { %v5814_v31 = vmax.f32 %v1482_v26, 0.0  ;;  %v1460_v5 = vmul.f32 %v1458_v61, %v5716_v20  ;;  %v1483_v22 = vadd.f32 %v5781_v4, %v1463_v44  ;;  %v5819_v54 = vmul.f32 %v1458_v61, %v5726_v40 }
 0x525   :  { %v5822_v51 = vadd.f32 %v5781_v4, %v1467_v23  ;;  %v5825_v2 = vadd.f32 %v5781_v4, %v1469_v16  ;;  %v1461_v9 = vmul.f32 %v1458_v61, %v5719_v35  ;;  %v5828_v42 = vmax.f32 %v1486_v18, 0.0 }
 0x526   :  { %v5830_v63 = vmax.f32 %v1488_v58, 0.0  ;;  %v1530_v12 = vrot.slane %v5814_v31, 7  ;;  %v1533_v20 = vrot.slane %v5812_v60, 7  ;;  %v1480_v46 = vadd.f32 %v5781_v4, %v1460_v5 }
 0x527   :  { %v5835_v40 = vmax.f32 %v1483_v22, 0.0  ;;  %v1481_v43 = vadd.f32 %v5781_v4, %v1461_v9  ;;  %v1565_v28 = vrot.slane %v5812_v60, 6  ;;  %v1562_v0 = vrot.slane %v5814_v31, 6 }
 0x528   :  { %v1594_v35 = vrot.slane %v5814_v31, 5  ;;  %v1758_v41 = vsel %vm140_vm0, 0.0, %v1530_v12  ;;  %v1597_v53 = vrot.slane %v5812_v60, 5  ;;  %v1626_v10 = vrot.slane %v5814_v31, 4 }
 0x529   :  { %v1774_v14 = vsel %vm143_vm1, %v1758_v41, 0.0  ;;  %v1496_v38 = vmax.f32 %v1480_v46, 0.0  ;;  %v1660_v59 = vrot.slane %v5835_v40, 3  ;;  %v1693_v13 = vrot.slane %v5835_v40, 2 }
 0x52a   :  { %v1790_v17 = vsel %vm146_vm2, %v1774_v14, %v1562_v0  ;;  %v1629_v24 = vrot.slane %v5812_v60, 4  ;;  %v1761_v29 = vsel %vm140_vm0, 0.0, %v1533_v20  ;;  %v1726_v11 = vrot.slane %v5835_v40, 1 }
 0x52b   :  { %v1806_v25 = vsel %vm149_vm3, %v1790_v17, 0.0  ;;  %v1657_v7 = vrot.slane %v1496_v38, 3  ;;  %v5852_v45 = vmax.f32 %v1481_v43, 0.0  ;;  %v1690_v57 = vrot.slane %v1496_v38, 2 }
 0x52c   :  { %v1822_v56 = vsel %vm152_vm4, %v1806_v25, %v1594_v35  ;;  %v1723_v8 = vrot.slane %v1496_v38, 1  ;;  %v1528_v37 = vrot.slane %v1496_v38, 7  ;;  %v1560_v61 = vrot.slane %v1496_v38, 6 }
 0x52d   :  { %v1838_v39 = vsel %vm828_vm6, %v1822_v56, 0.0  ;;  %v1869_v27 = vsel %vm140_vm0, 0.0, %v1657_v7  ;;  %v1872_v50 = vsel %vm140_vm0, 0.0, %v1660_v59  ;;  %v1658_v32 = vrot.slane %v5852_v45, 3 }
 0x52e   :  { %v5859_v55 = vsel %vm838_vm7, %v1838_v39, %v1626_v10  ;;  %v1886_v47 = vsel %vm143_vm1, %v1869_v27, 0.0  ;;  %v1756_v49 = vsel %vm140_vm0, 0.0, %v1528_v37  ;;  %v1889_v52 = vsel %vm143_vm1, %v1872_v50, 0.0 }
 0x52f   :  { %2370 = vrot.lane.b32.xlu0 %v5859_v55, %s4494_s26  ;;  %v1903_v34 = vsel %vm146_vm2, %v1886_v47, %v1690_v57  ;;  %v1772_v1 = vsel %vm143_vm1, %v1756_v49, 0.0  ;;  %v1906_v36 = vsel %vm146_vm2, %v1889_v52, %v1693_v13  ;;  %v1592_v6 = vrot.slane %v1496_v38, 5 }
 0x530   :  { %v1920_v30 = vsel %vm149_vm3, %v1903_v34, 0.0  ;;  %v1788_v44 = vsel %vm146_vm2, %v1772_v1, %v1560_v61  ;;  %v1923_v26 = vsel %vm149_vm3, %v1906_v36, 0.0  ;;  %v1624_v16 = vrot.slane %v1496_v38, 4 }
 0x531   :  { %v1937_v23 = vsel %vm152_vm4, %v1920_v30, %v1723_v8  ;;  %v1804_v18 = vsel %vm149_vm3, %v1788_v44, 0.0  ;;  %v1940_v58 = vsel %vm152_vm4, %v1923_v26, %v1726_v11  ;;  %v1691_v9 = vrot.slane %v5852_v45, 2 }
 0x532   :  { %v1954_v5 = vsel %vm828_vm6, %v1937_v23, 0.0  ;;  %v1820_v22 = vsel %vm152_vm4, %v1804_v18, %v1592_v6  ;;  %v1870_v12 = vsel %vm140_vm0, 0.0, %v1658_v32  ;;  %v1957_v43 = vsel %vm828_vm6, %v1940_v58, 0.0 }
 0x533   :  { %v5881_v20 = vsel %vm838_vm7, %v1954_v5, %v1496_v38  ;;  %v1836_v46 = vsel %vm828_vm6, %v1820_v22, 0.0  ;;  %v1887_v0 = vsel %vm143_vm1, %v1870_v12, 0.0  ;;  %v1724_v41 = vrot.slane %v5852_v45, 1 }
 0x534   :  { %8969 = vst [vmem:[#allocation19_spill] sm:$0xff] %v5881_v20  ;;  %2360 = vrot.lane.b32.xlu2 %v5881_v20, %s4494_s26  ;;  %v5889_v35 = vsel %vm838_vm7, %v1836_v46, %v1624_v16  ;;  %v1904_v10 = vsel %vm146_vm2, %v1887_v0, %v1691_v9  ;;  %v1777_v14 = vsel %vm143_vm1, %v1761_v29, 0.0  ;;  %v1529_v59 = vrot.slane %v5852_v45, 7 }
 0x535   :  { %8970 = vst [vmem:[#allocation20_spill] sm:$0xff] %v5889_v35  ;;  %2358 = vrot.lane.b32.xlu1 %v5889_v35, %s4494_s26  ;;  %v1921_v38 = vsel %vm149_vm3, %v1904_v10, 0.0  ;;  %v1659_v17 = vrot.slane %v5814_v31, 3  ;;  %v1692_v13 = vrot.slane %v5814_v31, 2  ;;  %v5902_v25 = vsel %vm838_vm7, %v1957_v43, %v5835_v40 }
 0x536   :  { %8971 = vst [vmem:[#allocation21_spill] sm:$0xff] %v5902_v25  ;;  %v1938_v7 = vsel %vm152_vm4, %v1921_v38, %v1724_v41  ;;  %v1561_v11 = vrot.slane %v5852_v45, 6  ;;  %v1593_v29 = vrot.slane %v5852_v45, 5  ;;  %v1757_v57 = vsel %vm140_vm0, 0.0, %v1529_v59 }
 0x537   :  { %2376 = vrot.lane.b32.xlu0 %v5902_v25, %s4494_s26  ;;  %v1955_v56 = vsel %vm828_vm6, %v1938_v7, 0.0  ;;  %v1793_v8 = vsel %vm146_vm2, %v1777_v14, %v1565_v28  ;;  %v1531_v37 = vrot.slane %v5835_v40, 7  ;;  %v1625_v27 = vrot.slane %v5852_v45, 4 }
 0x538   :  { %v5917_v39 = vsel %vm838_vm7, %v1955_v56, %v5852_v45  ;;  %v1773_v61 = vsel %vm143_vm1, %v1757_v57, 0.0  ;;  %v1809_v50 = vsel %vm149_vm3, %v1793_v8, 0.0  ;;  %v1563_v28 = vrot.slane %v5835_v40, 6 }
 0x539   :  { %8972 = vst [vmem:[#allocation22_spill] sm:$0xff] %v5917_v39  ;;  %v1789_v47 = vsel %vm146_vm2, %v1773_v61, %v1561_v11  ;;  %v1825_v49 = vsel %vm152_vm4, %v1809_v50, %v1597_v53  ;;  %v1595_v52 = vrot.slane %v5835_v40, 5  ;;  %v1627_v45 = vrot.slane %v5835_v40, 4 }
 0x53a   :  { %v1805_v34 = vsel %vm149_vm3, %v1789_v47, 0.0  ;;  %v1841_v1 = vsel %vm828_vm6, %v1825_v49, 0.0  ;;  %v1759_v36 = vsel %vm140_vm0, 0.0, %v1531_v37  ;;  %v1725_v6 = vrot.slane %v5814_v31, 1 }
 0x53b   :  { %v1821_v32 = vsel %vm152_vm4, %v1805_v34, %v1593_v29  ;;  %v1775_v30 = vsel %vm143_vm1, %v1759_v36, 0.0  ;;  %v1871_v53 = vsel %vm140_vm0, 0.0, %v1659_v17  ;;  %v1663_v40 = vrot.slane %v5828_v42, 3 }
 0x53c   :  { %2368 = vrot.lane.b32.xlu2 %v5917_v39, %s4494_s26  ;;  %v1837_v44 = vsel %vm828_vm6, %v1821_v32, 0.0  ;;  %v1791_v26 = vsel %vm146_vm2, %v1775_v30, %v1563_v28  ;;  %v1888_v23 = vsel %vm143_vm1, %v1871_v53, 0.0  ;;  %v5948_v18 = vsel %vm838_vm7, %v1841_v1, %v1629_v24 }
 0x53d   :  { %v5943_v16 = vsel %vm838_vm7, %v1837_v44, %v1625_v27  ;;  %8974 = vst [vmem:[#allocation24_spill] sm:$0xff] %v5948_v18  ;;  %v1807_v58 = vsel %vm149_vm3, %v1791_v26, 0.0  ;;  %v1905_v5 = vsel %vm146_vm2, %v1888_v23, %v1692_v13  ;;  %v1696_v12 = vrot.slane %v5828_v42, 2 }
 0x53e   :  { %8973 = vst [vmem:[#allocation23_spill] sm:$0xff] %v5943_v16  ;;  %2366 = vrot.lane.b32.xlu1 %v5943_v16, %s4494_s26  ;;  %v1823_v22 = vsel %vm152_vm4, %v1807_v58, %v1595_v52  ;;  %v1922_v9 = vsel %vm149_vm3, %v1905_v5, 0.0  ;;  %v1875_v46 = vsel %vm140_vm0, 0.0, %v1663_v40  ;;  %v1484_v41 = vadd.f32 %v5781_v4, %v5819_v54 }
 0x53f   :  { %2382 = vrot.lane.b32.xlu0 %v5948_v18, %s4494_s26  ;;  %v1839_v24 = vsel %vm828_vm6, %v1823_v22, 0.0  ;;  %v1939_v43 = vsel %vm152_vm4, %v1922_v9, %v1725_v6  ;;  %v1892_v0 = vsel %vm143_vm1, %v1875_v46, 0.0  ;;  %v1729_v14 = vrot.slane %v5828_v42, 1 }
 0x540   :  { %v1956_v10 = vsel %vm828_vm6, %v1939_v43, 0.0  ;;  %v1909_v38 = vsel %vm146_vm2, %v1892_v0, %v1696_v12  ;;  %v1536_v59 = vrot.slane %v5830_v63, 7  ;;  %v5970_v17 = vmax.f32 %v5822_v51, 0.0 }
 0x541   :  { %v1926_v13 = vsel %vm149_vm3, %v1909_v38, 0.0  ;;  %v1500_v7 = vmax.f32 %v1484_v41, 0.0  ;;  %v5974_v11 = vmax.f32 %v5825_v2, 0.0  ;;  %v5977_v29 = vsel %vm838_vm7, %v1839_v24, %v1627_v45 }
 0x542   :  { %v1943_v4 = vsel %vm152_vm4, %v1926_v13, %v1729_v14  ;;  %v1764_v54 = vsel %vm140_vm0, 0.0, %v1536_v59  ;;  %v5983_v56 = vsel %vm838_vm7, %v1956_v10, %v5814_v31  ;;  %v1568_v8 = vrot.slane %v5830_v63, 6 }
 0x543   :  { %v1960_v51 = vsel %vm828_vm6, %v1943_v4, 0.0  ;;  %v1661_v57 = vrot.slane %v1500_v7, 3  ;;  %v1694_v2 = vrot.slane %v1500_v7, 2  ;;  %v1532_v37 = vrot.slane %v1500_v7, 7 }
 0x544   :  { %2374 = vrot.lane.b32.xlu2 %v5977_v29, %s4494_s26  ;;  %v1600_v27 = vrot.slane %v5830_v63, 5  ;;  %v1632_v61 = vrot.slane %v5830_v63, 4  ;;  %v5993_v50 = vsel %vm838_vm7, %v1960_v51, %v5828_v42  ;;  %v1780_v47 = vsel %vm143_vm1, %v1764_v54, 0.0 }
 0x545   :  { %8975 = vst [vmem:[#allocation25_spill] sm:$0xff] %v5993_v50  ;;  %v1873_v31 = vsel %vm140_vm0, 0.0, %v1661_v57  ;;  %v1534_v49 = vrot.slane %v5828_v42, 7  ;;  %v1564_v52 = vrot.slane %v1500_v7, 6  ;;  %v1760_v34 = vsel %vm140_vm0, 0.0, %v1532_v37 }
 0x546   :  { %2372 = vrot.lane.b32.xlu1 %v5983_v56, %s4494_s26  ;;  %v1890_v28 = vsel %vm143_vm1, %v1873_v31, 0.0  ;;  %v1796_v1 = vsel %vm146_vm2, %v1780_v47, %v1568_v8  ;;  %v1727_v45 = vrot.slane %v1500_v7, 1  ;;  %v1776_v32 = vsel %vm143_vm1, %v1760_v34, 0.0 }
 0x547   :  { %2388 = vrot.lane.b32.xlu0 %v5993_v50, %s4494_s26  ;;  %v1907_v36 = vsel %vm146_vm2, %v1890_v28, %v1694_v2  ;;  %v1812_v30 = vsel %vm149_vm3, %v1796_v1, 0.0  ;;  %v1596_v53 = vrot.slane %v1500_v7, 5  ;;  %v1792_v44 = vsel %vm146_vm2, %v1776_v32, %v1564_v52 }
 0x548   :  { %v1924_v6 = vsel %vm149_vm3, %v1907_v36, 0.0  ;;  %v1828_v26 = vsel %vm152_vm4, %v1812_v30, %v1600_v27  ;;  %v1808_v40 = vsel %vm149_vm3, %v1792_v44, 0.0  ;;  %v1762_v5 = vsel %vm140_vm0, 0.0, %v1534_v49 }
 0x549   :  { %v1941_v23 = vsel %vm152_vm4, %v1924_v6, %v1727_v45  ;;  %v1844_v58 = vsel %vm828_vm6, %v1828_v26, 0.0  ;;  %v1824_v9 = vsel %vm152_vm4, %v1808_v40, %v1596_v53  ;;  %v1566_v12 = vrot.slane %v5828_v42, 6 }
 0x54a   :  { %v1958_v22 = vsel %vm828_vm6, %v1941_v23, 0.0  ;;  %v1778_v46 = vsel %vm143_vm1, %v1762_v5, 0.0  ;;  %v1628_v43 = vrot.slane %v1500_v7, 4  ;;  %v1840_v0 = vsel %vm828_vm6, %v1824_v9, 0.0 }
 0x54b   :  { %v6020_v24 = vsel %vm838_vm7, %v1958_v22, %v1500_v7  ;;  %v1598_v41 = vrot.slane %v5828_v42, 5  ;;  %v6027_v10 = vsel %vm838_vm7, %v1844_v58, %v1632_v61  ;;  %v1630_v14 = vrot.slane %v5828_v42, 4 }
 0x54c   :  { %8976 = vst [vmem:[#allocation26_spill] sm:$0xff] %v6020_v24  ;;  %2380 = vrot.lane.b32.xlu2 %v6020_v24, %s4494_s26  ;;  %v1794_v38 = vsel %vm146_vm2, %v1778_v46, %v1566_v12  ;;  %v1662_v59 = vrot.slane %v5812_v60, 3  ;;  %v6033_v13 = vsel %vm838_vm7, %v1840_v0, %v1628_v43  ;;  %v1695_v4 = vrot.slane %v5812_v60, 2 }
 0x54d   :  { %8977 = vst [vmem:[#allocation27_spill] sm:$0xff] %v6027_v10  ;;  %v1810_v7 = vsel %vm149_vm3, %v1794_v38, 0.0  ;;  %v1666_v54 = vrot.slane %v5974_v11, 3  ;;  %v1728_v42 = vrot.slane %v5812_v60, 1  ;;  %v1664_v8 = vrot.slane %v5970_v17, 3 }
 0x54e   :  { %8978 = vst [vmem:[#allocation28_spill] sm:$0xff] %v6033_v13  ;;  %2378 = vrot.lane.b32.xlu1 %v6033_v13, %s4494_s26  ;;  %v1826_v51 = vsel %vm152_vm4, %v1810_v7, %v1598_v41  ;;  %v1874_v57 = vsel %vm140_vm0, 0.0, %v1662_v59  ;;  %v1699_v27 = vrot.slane %v5974_v11, 2  ;;  %v1732_v47 = vrot.slane %v5974_v11, 1 }
 0x54f   :  { %2394 = vrot.lane.b32.xlu0 %v6027_v10, %s4494_s26  ;;  %v1842_v2 = vsel %vm828_vm6, %v1826_v51, 0.0  ;;  %v1891_v37 = vsel %vm143_vm1, %v1874_v57, 0.0  ;;  %v1878_v61 = vsel %vm140_vm0, 0.0, %v1666_v54  ;;  %v1697_v28 = vrot.slane %v5970_v17, 2 }
 0x550   :  { %v1908_v31 = vsel %vm146_vm2, %v1891_v37, %v1695_v4  ;;  %v1895_v49 = vsel %vm143_vm1, %v1878_v61, 0.0  ;;  %v1876_v1 = vsel %vm140_vm0, 0.0, %v1664_v8  ;;  %v1535_v45 = vrot.slane %v5970_v17, 7 }
 0x551   :  { %v1925_v52 = vsel %vm149_vm3, %v1908_v31, 0.0  ;;  %v1912_v34 = vsel %vm146_vm2, %v1895_v49, %v1699_v27  ;;  %v6059_v36 = vsel %vm838_vm7, %v1842_v2, %v1630_v14  ;;  %v1893_v6 = vsel %vm143_vm1, %v1876_v1, 0.0 }
 0x552   :  { %8979 = vst [vmem:[#allocation29_spill] sm:$0xff] %v6059_v36  ;;  %v1942_v32 = vsel %vm152_vm4, %v1925_v52, %v1728_v42  ;;  %v1929_v30 = vsel %vm149_vm3, %v1912_v34, 0.0  ;;  %v1730_v26 = vrot.slane %v5970_v17, 1  ;;  %v1910_v23 = vsel %vm146_vm2, %v1893_v6, %v1697_v28 }
 0x553   :  { %v1959_v53 = vsel %vm828_vm6, %v1942_v32, 0.0  ;;  %v1946_v44 = vsel %vm152_vm4, %v1929_v30, %v1732_v47  ;;  %v6069_v40 = vmax.f32 %v5791_v62, 0.0  ;;  %v1927_v5 = vsel %vm149_vm3, %v1910_v23, 0.0 }
 0x554   :  { %2386 = vrot.lane.b32.xlu2 %v6059_v36, %s4494_s26  ;;  %v1963_v58 = vsel %vm828_vm6, %v1946_v44, 0.0  ;;  %v1567_v22 = vrot.slane %v5970_v17, 6  ;;  %v6078_v9 = vsel %vm838_vm7, %v1959_v53, %v5812_v60  ;;  %v1944_v12 = vsel %vm152_vm4, %v1927_v5, %v1730_v26 }
 0x555   :  { %8980 = vst [vmem:[#allocation30_spill] sm:$0xff] %v6078_v9  ;;  %v1763_v46 = vsel %vm140_vm0, 0.0, %v1535_v45  ;;  %v1537_v62 = vrot.slane %v5974_v11, 7  ;;  %v6087_v43 = vsel %vm838_vm7, %v1963_v58, %v5974_v11  ;;  %v1599_v60 = vrot.slane %v5970_v17, 5 }
 0x556   :  { %2384 = vrot.lane.b32.xlu1 %v6078_v9, %s4494_s26  ;;  %8981 = vst [vmem:[#allocation31_spill] sm:$0xff] %v6087_v43  ;;  %v1779_v0 = vsel %vm143_vm1, %v1763_v46, 0.0  ;;  %v1569_v14 = vrot.slane %v5974_v11, 6  ;;  %v1961_v59 = vsel %vm828_vm6, %v1944_v12, 0.0  ;;  %v1665_v54 = vrot.slane %v5830_v63, 3 }
 0x557   :  { %2400 = vrot.lane.b32.xlu0 %v6087_v43, %s4494_s26  ;;  %v1795_v41 = vsel %vm146_vm2, %v1779_v0, %v1567_v22  ;;  %v1765_v38 = vsel %vm140_vm0, 0.0, %v1537_v62  ;;  %v1538_v57 = vrot.slane %v6069_v40, 7  ;;  %v1698_v37 = vrot.slane %v5830_v63, 2 }
 0x558   :  { %v1811_v7 = vsel %vm149_vm3, %v1795_v41, 0.0  ;;  %v1781_v4 = vsel %vm143_vm1, %v1765_v38, 0.0  ;;  %v1877_v27 = vsel %vm140_vm0, 0.0, %v1665_v54  ;;  %v6109_v61 = vsel %vm838_vm7, %v1961_v59, %v5970_v17 }
 0x559   :  { %v1827_v51 = vsel %vm152_vm4, %v1811_v7, %v1599_v60  ;;  %v1797_v42 = vsel %vm146_vm2, %v1781_v4, %v1569_v14  ;;  %8982 = vst [vmem:[#allocation32_spill] sm:$0xff] %v6109_v61  ;;  %v1631_v31 = vrot.slane %v5970_v17, 4  ;;  %v1601_v47 = vrot.slane %v5974_v11, 5 }
 0x55a   :  { %v1843_v8 = vsel %vm828_vm6, %v1827_v51, 0.0  ;;  %v1813_v2 = vsel %vm149_vm3, %v1797_v42, 0.0  ;;  %v1894_v49 = vsel %vm143_vm1, %v1877_v27, 0.0  ;;  %v1766_v52 = vsel %vm140_vm0, 0.0, %v1538_v57 }
 0x55b   :  { %v1911_v28 = vsel %vm146_vm2, %v1894_v49, %v1698_v37  ;;  %v6119_v34 = vsel %vm838_vm7, %v1843_v8, %v1631_v31  ;;  %v1829_v1 = vsel %vm152_vm4, %v1813_v2, %v1601_v47  ;;  %v1731_v45 = vrot.slane %v5830_v63, 1 }
 0x55c   :  { %2392 = vrot.lane.b32.xlu2 %v6109_v61, %s4494_s26  ;;  %8983 = vst [vmem:[#allocation33_spill] sm:$0xff] %v6119_v34  ;;  %v1928_v17 = vsel %vm149_vm3, %v1911_v28, 0.0  ;;  %v1782_v32 = vsel %vm143_vm1, %v1766_v52, 0.0  ;;  %v1570_v6 = vrot.slane %v6069_v40, 6  ;;  %v1845_v53 = vsel %vm828_vm6, %v1829_v1, 0.0 }
 0x55d   :  { %v1945_v30 = vsel %vm152_vm4, %v1928_v17, %v1731_v45  ;;  %v6133_v44 = vmax.f32 %v5800_v19, 0.0  ;;  %v1633_v26 = vrot.slane %v5974_v11, 4  ;;  %v1602_v19 = vrot.slane %v6069_v40, 5 }
 0x55e   :  { %2390 = vrot.lane.b32.xlu1 %v6119_v34, %s4494_s26  ;;  %v1798_v23 = vsel %vm146_vm2, %v1782_v32, %v1570_v6  ;;  %v1962_v58 = vsel %vm828_vm6, %v1945_v30, 0.0  ;;  %v1634_v60 = vrot.slane %v6069_v40, 4  ;;  %v6173_v4 = vmax.f32 %v5794_v33, 0.0 }
 0x55f   :  { %2674 = vrot.lane.b32.xlu0 %v5977_v29, %s4492_s24  ;;  %v6139_v5 = vsel %vm838_vm7, %v1845_v53, %v1633_v26  ;;  %v1814_v22 = vsel %vm149_vm3, %v1798_v23, 0.0  ;;  %v6146_v12 = vsel %vm838_vm7, %v1962_v58, %v5830_v63  ;;  %v1541_v11 = vrot.slane %v6133_v44, 7 }
 0x560   :  { %8984 = vst [vmem:[#allocation34_spill] sm:$0xff] %v6139_v5  ;;  %v1830_v46 = vsel %vm152_vm4, %v1814_v22, %v1602_v19  ;;  %v1573_v14 = vrot.slane %v6133_v44, 6  ;;  %v1605_v7 = vrot.slane %v6133_v44, 5  ;;  %v1670_v51 = vrot.slane %v6133_v44, 3 }
 0x561   :  { %8985 = vst [vmem:[#allocation35_spill] sm:$0xff] %v6146_v12  ;;  %v1769_v62 = vsel %vm140_vm0, 0.0, %v1541_v11  ;;  %v1846_v0 = vsel %vm828_vm6, %v1830_v46, 0.0  ;;  %v1539_v57 = vrot.slane %v6173_v4, 7  ;;  %v6186_v33 = vmax.f32 %v5805_v21, 0.0 }
 0x562   :  { %v1785_v63 = vsel %vm143_vm1, %v1769_v62, 0.0  ;;  %v6162_v41 = vsel %vm838_vm7, %v1846_v0, %v1634_v60  ;;  %v1637_v8 = vrot.slane %v6133_v44, 4  ;;  %v1882_v2 = vsel %vm140_vm0, 0.0, %v1670_v51 }
 0x563   :  { %8986 = vst [vmem:[#allocation36_spill] sm:$0xff] %v6162_v41  ;;  %v1801_v38 = vsel %vm146_vm2, %v1785_v63, %v1573_v14  ;;  %v6194_v27 = vmax.f32 %v5808_v15, 0.0  ;;  %v1899_v31 = vsel %vm143_vm1, %v1882_v2, 0.0  ;;  %v1767_v47 = vsel %vm140_vm0, 0.0, %v1539_v57 }
 0x564   :  { %2398 = vrot.lane.b32.xlu2 %v6139_v5, %s4494_s26  ;;  %v1817_v59 = vsel %vm149_vm3, %v1801_v38, 0.0  ;;  %v1703_v21 = vrot.slane %v6133_v44, 2  ;;  %v1542_v49 = vrot.slane %v6186_v33, 7  ;;  %v1783_v28 = vsel %vm143_vm1, %v1767_v47, 0.0 }
 0x565   :  { %v1833_v54 = vsel %vm152_vm4, %v1817_v59, %v1605_v7  ;;  %v1571_v52 = vrot.slane %v6173_v4, 6  ;;  %v1543_v1 = vrot.slane %v6194_v27, 7  ;;  %v1736_v30 = vrot.slane %v6133_v44, 1 }
 0x566   :  { %2396 = vrot.lane.b32.xlu1 %v6146_v12, %s4494_s26  ;;  %v1849_v42 = vsel %vm828_vm6, %v1833_v54, 0.0  ;;  %v1916_v15 = vsel %vm146_vm2, %v1899_v31, %v1703_v21  ;;  %v1770_v45 = vsel %vm140_vm0, 0.0, %v1542_v49  ;;  %v1574_v58 = vrot.slane %v6186_v33, 6 }
 0x567   :  { %2676 = vrot.lane.b32.xlu0 %v5902_v25, %s4492_s24  ;;  %v6191_v37 = vsel %vm838_vm7, %v1849_v42, %v1637_v8  ;;  %v1933_v17 = vsel %vm149_vm3, %v1916_v15, 0.0  ;;  %v1799_v32 = vsel %vm146_vm2, %v1783_v28, %v1571_v52  ;;  %v1786_v6 = vsel %vm143_vm1, %v1770_v45, 0.0 }
 0x568   :  { %8987 = vst [vmem:[#allocation37_spill] sm:$0xff] %v6191_v37  ;;  %v1771_v53 = vsel %vm140_vm0, 0.0, %v1543_v1  ;;  %v1950_v26 = vsel %vm152_vm4, %v1933_v17, %v1736_v30  ;;  %v1815_v23 = vsel %vm149_vm3, %v1799_v32, 0.0  ;;  %v1671_v22 = vrot.slane %v6186_v33, 3 }
 0x569   :  { %v1603_v19 = vrot.slane %v6173_v4, 5  ;;  %v1802_v11 = vsel %vm146_vm2, %v1786_v6, %v1574_v58  ;;  %v1787_v46 = vsel %vm143_vm1, %v1771_v53, 0.0  ;;  %v1967_v62 = vsel %vm828_vm6, %v1950_v26, 0.0 }
 0x56a   :  { %v1575_v60 = vrot.slane %v6194_v27, 6  ;;  %v1672_v63 = vrot.slane %v6194_v27, 3  ;;  %v1883_v14 = vsel %vm140_vm0, 0.0, %v1671_v22  ;;  %v1818_v38 = vsel %vm149_vm3, %v1802_v11, 0.0 }
 0x56b   :  { %v1831_v0 = vsel %vm152_vm4, %v1815_v23, %v1603_v19  ;;  %v6238_v7 = vsel %vm838_vm7, %v1967_v62, %v6133_v44  ;;  %v1606_v51 = vrot.slane %v6186_v33, 5  ;;  %v1635_v42 = vrot.slane %v6173_v4, 4 }
 0x56c   :  { %2682 = vrot.lane.b32.xlu2 %v5948_v18, %s4492_s24  ;;  %v1803_v59 = vsel %vm146_vm2, %v1787_v46, %v1575_v60  ;;  %8988 = vst [vmem:[#allocation38_spill] sm:$0xff] %v6238_v7  ;;  %v1847_v54 = vsel %vm828_vm6, %v1831_v0, 0.0  ;;  %v1900_v57 = vsel %vm143_vm1, %v1883_v14, 0.0  ;;  %v1884_v8 = vsel %vm140_vm0, 0.0, %v1672_v63 }
 0x56d   :  { %v1834_v2 = vsel %vm152_vm4, %v1818_v38, %v1606_v51  ;;  %v1819_v31 = vsel %vm149_vm3, %v1803_v59, 0.0  ;;  %v1704_v44 = vrot.slane %v6186_v33, 2  ;;  %v6255_v21 = vsel %vm838_vm7, %v1847_v54, %v1635_v42 }
 0x56e   :  { %2402 = vrot.lane.b32.xlu1 %v6162_v41, %s4494_s26  ;;  %8990 = vst [vmem:[#allocation40_spill] sm:$0xff] %v6255_v21  ;;  %v1607_v49 = vrot.slane %v6194_v27, 5  ;;  %v1901_v28 = vsel %vm143_vm1, %v1884_v8, 0.0  ;;  %v1850_v52 = vsel %vm828_vm6, %v1834_v2, 0.0  ;;  %v1705_v45 = vrot.slane %v6194_v27, 2 }
 0x56f   :  { %2690 = vrot.lane.b32.xlu0 %v6119_v34, %s4492_s24  ;;  %v1917_v15 = vsel %vm146_vm2, %v1900_v57, %v1704_v44  ;;  %v1638_v17 = vrot.slane %v6186_v33, 4  ;;  %v1737_v26 = vrot.slane %v6186_v33, 1  ;;  %v6274_v23 = vmax.f32 %v5797_v3, 0.0 }
 0x570   :  { %v1835_v1 = vsel %vm152_vm4, %v1819_v31, %v1607_v49  ;;  %v1934_v32 = vsel %vm149_vm3, %v1917_v15, 0.0  ;;  %v1918_v30 = vsel %vm146_vm2, %v1901_v28, %v1705_v45  ;;  %v1639_v58 = vrot.slane %v6194_v27, 4 }
 0x571   :  { %v6269_v6 = vsel %vm838_vm7, %v1850_v52, %v1638_v17  ;;  %v1851_v53 = vsel %vm828_vm6, %v1835_v1, 0.0  ;;  %v1951_v22 = vsel %vm152_vm4, %v1934_v32, %v1737_v26  ;;  %v1935_v19 = vsel %vm149_vm3, %v1918_v30, 0.0 }
 0x572   :  { %8991 = vst [vmem:[#allocation41_spill] sm:$0xff] %v6269_v6  ;;  %v1668_v11 = vrot.slane %v6173_v4, 3  ;;  %v6287_v62 = vsel %vm838_vm7, %v1851_v53, %v1639_v58  ;;  %v1738_v3 = vrot.slane %v6194_v27, 1  ;;  %v1667_v0 = vrot.slane %v6069_v40, 3 }
 0x573   :  { %8993 = vst [vmem:[#allocation43_spill] sm:$0xff] %v6287_v62  ;;  %v1968_v60 = vsel %vm828_vm6, %v1951_v22, 0.0  ;;  %v1540_v14 = vrot.slane %v6274_v23, 7  ;;  %v1701_v8 = vrot.slane %v6173_v4, 2  ;;  %v1700_v49 = vrot.slane %v6069_v40, 2 }
 0x574   :  { %2684 = vrot.lane.b32.xlu2 %v6078_v9, %s4492_s24  ;;  %v1952_v63 = vsel %vm152_vm4, %v1935_v19, %v1738_v3  ;;  %v1880_v38 = vsel %vm140_vm0, 0.0, %v1668_v11  ;;  %v6299_v59 = vsel %vm838_vm7, %v1968_v60, %v6186_v33  ;;  %v1879_v51 = vsel %vm140_vm0, 0.0, %v1667_v0 }
 0x575   :  { %8994 = vst [vmem:[#allocation44_spill] sm:$0xff] %v6299_v59  ;;  %v1969_v54 = vsel %vm828_vm6, %v1952_v63, 0.0  ;;  %v1897_v42 = vsel %vm143_vm1, %v1880_v38, 0.0  ;;  %v1768_v57 = vsel %vm140_vm0, 0.0, %v1540_v14  ;;  %v1896_v31 = vsel %vm143_vm1, %v1879_v51, 0.0 }
 0x576   :  { %2678 = vrot.lane.b32.xlu1 %v6033_v13, %s4492_s24  ;;  %v6314_v33 = vsel %vm838_vm7, %v1969_v54, %v6194_v27  ;;  %v1914_v44 = vsel %vm146_vm2, %v1897_v42, %v1701_v8  ;;  %v1784_v15 = vsel %vm143_vm1, %v1768_v57, 0.0  ;;  %v1572_v28 = vrot.slane %v6274_v23, 6 }
 0x577   :  { %2670 = vrot.lane.b32.xlu0 %v5859_v55, %s4492_s24  ;;  %8995 = vst [vmem:[#allocation45_spill] sm:$0xff] %v6314_v33  ;;  %v1669_v52 = vrot.slane %v6274_v23, 3  ;;  %v1913_v27 = vsel %vm146_vm2, %v1896_v31, %v1700_v49  ;;  %v1931_v45 = vsel %vm149_vm3, %v1914_v44, 0.0  ;;  %v1734_v32 = vrot.slane %v6173_v4, 1 }
 0x578   :  { %v1800_v17 = vsel %vm146_vm2, %v1784_v15, %v1572_v28  ;;  %v1930_v30 = vsel %vm149_vm3, %v1913_v27, 0.0  ;;  %v1733_v58 = vrot.slane %v6069_v40, 1  ;;  %v1604_v11 = vrot.slane %v6274_v23, 5 }
 0x579   :  { %v1881_v53 = vsel %vm140_vm0, 0.0, %v1669_v52  ;;  %v1948_v26 = vsel %vm152_vm4, %v1931_v45, %v1734_v32  ;;  %v1816_v22 = vsel %vm149_vm3, %v1800_v17, 0.0  ;;  %v1702_v38 = vrot.slane %v6274_v23, 2 }
 0x57a   :  { %v1947_v0 = vsel %vm152_vm4, %v1930_v30, %v1733_v58  ;;  %v1898_v60 = vsel %vm143_vm1, %v1881_v53, 0.0  ;;  %v1965_v63 = vsel %vm828_vm6, %v1948_v26, 0.0  ;;  %v1832_v14 = vsel %vm152_vm4, %v1816_v22, %v1604_v11 }
 0x57b   :  { %v1964_v51 = vsel %vm828_vm6, %v1947_v0, 0.0  ;;  %v1915_v42 = vsel %vm146_vm2, %v1898_v60, %v1702_v38  ;;  %v6357_v57 = vsel %vm838_vm7, %v1965_v63, %v6173_v4  ;;  %v1848_v8 = vsel %vm828_vm6, %v1832_v14, 0.0  ;;  %v9013_v14 = vld [vmem:[#allocation6_spill] sm:$0xff] }
 0x57c   :  { %2414 = vrot.lane.b32.xlu2 %v6191_v37, %s4494_s26  ;;  %9000 = vst [vmem:[#allocation50_spill] sm:$0xff] %v6357_v57  ;;  %v1636_v31 = vrot.slane %v6274_v23, 4  ;;  %v6365_v44 = vsel %vm838_vm7, %v1964_v51, %v6069_v40  ;;  %v1932_v49 = vsel %vm149_vm3, %v1915_v42, 0.0  ;;  %v1735_v28 = vrot.slane %v6274_v23, 1 }
 0x57d   :  { %9001 = vst [vmem:[#allocation51_spill] sm:$0xff] %v6365_v44  ;;  %v2027_v58 = vrot.slane %v5943_v16, 1  ;;  %v2028_v22 = vrot.slane %v5917_v39, 1  ;;  %v2024_v0 = vrot.slane %v5881_v20, 1  ;;  %v2032_v42 = vrot.slane %v5983_v56, 1 }
 0x57e   :  { %2680 = vrot.lane.b32.xlu1 %v6020_v24, %s4492_s24  ;;  %v6373_v4 = vsel %vm838_vm7, %v1848_v8, %v1636_v31  ;;  %v1949_v40 = vsel %vm152_vm4, %v1932_v49, %v1735_v28  ;;  %v2031_v31 = vrot.slane %v5859_v55, 1  ;;  %vm2999_vm0 = vcmask 97280  }
 0x57f   :  { %2692 = vrot.lane.b32.xlu0 %v6109_v61, %s4492_s24  ;;  %9003 = vst [vmem:[#allocation53_spill] sm:$0xff] %v6373_v4  ;;  %v1966_v45 = vsel %vm828_vm6, %v1949_v40, 0.0  ;;  %v6418_v60 = vsel %vm838_vm7, %v2027_v58, %v2028_v22  ;;  %v6426_v38 = vsel %vm838_vm7, %v2024_v0, %v9013_v14  ;;  %v6440_v49 = vsel %vm838_vm7, %v2032_v42, %v9013_v14 }
 0x580   :  { %v6392_v32 = vsel %vm838_vm7, %v1966_v45, %v6274_v23  ;;  %v6447_v40 = vsel %vm838_vm7, %v2031_v31, %v2032_v42  ;;  %v2039_v58 = vrot.slane %v6033_v13, 1  ;;  %vm3128_vm1 = vcmask 162816  }
 0x581   :  { %9007 = vst [vmem:[#allocation57_spill] sm:$0xff] %v6392_v32  ;;  %v2072_v48 = vrot.slane %v6392_v32, 1  ;;  %vm3257_vm2 = vcmask 228352   ;;  %vm3395_vm4 = vcmask 293888  }
 0x582   :  { %9017 = vst [vmem:[#allocation65_spill] sm:$0xff] %v6447_v40 }
 0x584   :  { %2672 = vrot.lane.b32.xlu2 %v5983_v56, %s4492_s24 }
 0x586   :  { %2686 = vrot.lane.b32.xlu1 %v6059_v36, %s4492_s24 }
 0x587   :  { %2698 = vrot.lane.b32.xlu0 %v6162_v41, %s4492_s24 }
 0x58c   :  { %2416 = vrot.lane.b32.xlu2 %v6238_v7, %s4494_s26 }
 0x58e   :  { %2666 = vrot.lane.b32.xlu1 %v5943_v16, %s4492_s24  ;;  %v6252_v47 = vpop.permute.xlu2 %2360 }
 0x58f   :  { %8989 = vst [vmem:[#allocation39_spill] sm:$0xff] %v6252_v47  ;;  %2702 = vrot.lane.b32.xlu0 %v6255_v21, %s4492_s24  ;;  %v6507_v47 = vsel %vm838_vm7, %v2028_v22, %v9013_v14  ;;  %v2035_v22 = vrot.slane %v5977_v29, 1 }
 0x594   :  { %2714 = vrot.lane.b32.xlu2 %v6269_v6, %s4492_s24 }
 0x596   :  { %2688 = vrot.lane.b32.xlu1 %v5993_v50, %s4492_s24  ;;  %v6284_v46 = vpop.permute.xlu2 %2368 }
 0x597   :  { %8992 = vst [vmem:[#allocation42_spill] sm:$0xff] %v6284_v46  ;;  %2718 = vrot.lane.b32.xlu0 %v6287_v62, %s4492_s24  ;;  %v2043_v46 = vrot.slane %v5948_v18, 1 }
 0x59c   :  { %2716 = vrot.lane.b32.xlu2 %v6299_v59, %s4492_s24 }
 0x59e   :  { %2668 = vrot.lane.b32.xlu1 %v5917_v39, %s4492_s24  ;;  %v6310_v2 = vpop.permute.xlu2 %2374 }
 0x59f   :  { %2720 = vrot.lane.b32.xlu0 %v6314_v33, %s4492_s24 }
 0x5a1   :  { %v6324_v1 = vpop.permute.xlu0 %2370 }
 0x5a2   :  { %8996 = vst [vmem:[#allocation46_spill] sm:$0xff] %v6324_v1  ;;  %v2023_v1 = vrot.slane %v5889_v35, 1 }
 0x5a4   :  { %2418 = vrot.lane.b32.xlu2 %v6269_v6, %s4494_s26 }
 0x5a6   :  { %2712 = vrot.lane.b32.xlu1 %v6238_v7, %s4492_s24  ;;  %v6339_v19 = vpop.permute.xlu2 %2380 }
 0x5a7   :  { %8997 = vst [vmem:[#allocation47_spill] sm:$0xff] %v6339_v19  ;;  %v6342_v3 = vpop.permute.xlu1 %2358  ;;  %2696 = vrot.lane.b32.xlu0 %v6087_v43, %s4492_s24 }
 0x5a8   :  { %8998 = vst [vmem:[#allocation48_spill] sm:$0xff] %v6342_v3 }
 0x5a9   :  { %v6351_v54 = vpop.permute.xlu0 %2376 }
 0x5aa   :  { %8999 = vst [vmem:[#allocation49_spill] sm:$0xff] %v6351_v54 }
 0x5ac   :  { %2704 = vrot.lane.b32.xlu2 %v6357_v57, %s4492_s24 }
 0x5ae   :  { %2700 = vrot.lane.b32.xlu1 %v6365_v44, %s4492_s24  ;;  %v6370_v15 = vpop.permute.xlu2 %2386 }
 0x5af   :  { %9002 = vst [vmem:[#allocation52_spill] sm:$0xff] %v6370_v15  ;;  %2706 = vrot.lane.b32.xlu0 %v6373_v4, %s4492_s24 }
 0x5b0   :  { %v6378_v52 = vpop.permute.xlu1 %2366 }
 0x5b1   :  { %9004 = vst [vmem:[#allocation54_spill] sm:$0xff] %v6378_v52  ;;  %v6381_v27 = vpop.permute.xlu0 %2382  ;;  %v6481_v52 = vsel %vm838_vm7, %v2023_v1, %v2024_v0  ;;  %v2051_v0 = vrot.slane %v6119_v34, 1 }
 0x5b2   :  { %9005 = vst [vmem:[#allocation55_spill] sm:$0xff] %v6381_v27 }
 0x5b4   :  { %2406 = vrot.lane.b32.xlu2 %v6255_v21, %s4494_s26 }
 0x5b6   :  { %2404 = vrot.lane.b32.xlu1 %v6365_v44, %s4494_s26  ;;  %v6388_v17 = vpop.permute.xlu2 %2392 }
 0x5b7   :  { %9006 = vst [vmem:[#allocation56_spill] sm:$0xff] %v6388_v17  ;;  %2708 = vrot.lane.b32.xlu0 %v6392_v32, %s4492_s24 }
 0x5b8   :  { %v6396_v30 = vpop.permute.xlu1 %2372 }
 0x5b9   :  { %v6398_v53 = vpop.permute.xlu0 %2388 }
 0x5ba   :  { %9008 = vst [vmem:[#allocation58_spill] sm:$0xff] %v6398_v53  ;;  %v2044_v53 = vrot.slane %v6078_v9, 1 }
 0x5bc   :  { %2408 = vrot.lane.b32.xlu2 %v6357_v57, %s4494_s26  ;;  %v6494_v15 = vsel %vm838_vm7, %v2043_v46, %v2044_v53 }
 0x5be   :  { %2420 = vrot.lane.b32.xlu1 %v6299_v59, %s4494_s26  ;;  %v6404_v26 = vpop.permute.xlu2 %2398 }
 0x5bf   :  { %9009 = vst [vmem:[#allocation59_spill] sm:$0xff] %v6404_v26  ;;  %2410 = vrot.lane.b32.xlu0 %v6373_v4, %s4494_s26 }
 0x5c0   :  { %v6408_v23 = vpop.permute.xlu1 %2378 }
 0x5c1   :  { %9010 = vst [vmem:[#allocation60_spill] sm:$0xff] %v6408_v23  ;;  %v6412_v11 = vpop.permute.xlu0 %2394 }
 0x5c2   :  { %9011 = vst [vmem:[#allocation61_spill] sm:$0xff] %v6412_v11  ;;  %v2036_v11 = vrot.slane %v5902_v25, 1 }
 0x5c4   :  { %2694 = vrot.lane.b32.xlu2 %v6139_v5, %s4492_s24  ;;  %v6469_v31 = vsel %vm838_vm7, %v2036_v11, %v9013_v14  ;;  %v6532_v3 = vsel %vm838_vm7, %v2035_v22, %v2036_v11  ;;  %v2063_v22 = vrot.slane %v6162_v41, 1 }
 0x5c6   :  { %2095 = vrot.lane.b32.xlu1 %v6418_v60, %s4493_s4  ;;  %v6422_v63 = vpop.permute.xlu2 %2682 }
 0x5c7   :  { %9012 = vst [vmem:[#allocation62_spill] sm:$0xff] %v6422_v63  ;;  %2093 = vrot.lane.b32.xlu0 %v6426_v38, %s4493_s4  ;;  %v2055_v63 = vrot.slane %v6027_v10, 1 }
 0x5c8   :  { %v6430_v51 = vpop.permute.xlu1 %2384 }
 0x5c9   :  { %9014 = vst [vmem:[#allocation6_spill] sm:$0xff] %v6430_v51  ;;  %v6433_v8 = vpop.permute.xlu0 %2400  ;;  %v2052_v51 = vrot.slane %v6109_v61, 1 }
 0x5ca   :  { %9015 = vst [vmem:[#allocation63_spill] sm:$0xff] %v6433_v8  ;;  %v2040_v8 = vrot.slane %v6020_v24, 1 }
 0x5cb   :  { %v6512_v46 = vsel %vm838_vm7, %v2051_v0, %v2052_v51 }
 0x5cc   :  { %2422 = vrot.lane.b32.xlu2 %v6287_v62, %s4494_s26  ;;  %v6461_v17 = vsel %vm838_vm7, %v2039_v58, %v2040_v8 }
 0x5ce   :  { %2101 = vrot.lane.b32.xlu1 %v6440_v49, %s4493_s4  ;;  %v6444_v28 = vpop.permute.xlu2 %2684 }
 0x5cf   :  { %9016 = vst [vmem:[#allocation64_spill] sm:$0xff] %v6444_v28  ;;  %2099 = vrot.lane.b32.xlu0 %v6447_v40, %s4493_s4  ;;  %v2048_v28 = vrot.slane %v5993_v50, 1 }
 0x5d0   :  { %v6451_v45 = vpop.permute.xlu1 %2390 }
 0x5d1   :  { %9018 = vst [vmem:[#allocation66_spill] sm:$0xff] %v6451_v45  ;;  %v6455_v26 = vpop.permute.xlu0 %2674 }
 0x5d4   :  { %2424 = vrot.lane.b32.xlu2 %v6314_v33, %s4494_s26 }
 0x5d6   :  { %2107 = vrot.lane.b32.xlu1 %v6461_v17, %s4493_s4  ;;  %v6465_v42 = vpop.permute.xlu2 %2414 }
 0x5d7   :  { %9019 = vst [vmem:[#allocation67_spill] sm:$0xff] %v6465_v42  ;;  %2105 = vrot.lane.b32.xlu0 %v6469_v31, %s4493_s4  ;;  %v6487_v42 = vsel %vm838_vm7, %v2044_v53, %v9013_v14 }
 0x5d8   :  { %v6474_v45 = vpop.permute.xlu1 %2396 }
 0x5d9   :  { %9020 = vst [vmem:[#allocation68_spill] sm:$0xff] %v6474_v45  ;;  %v6477_v58 = vpop.permute.xlu0 %2676 }
 0x5da   :  { %9021 = vst [vmem:[#allocation69_spill] sm:$0xff] %v6477_v58  ;;  %v2084_v58 = vrot.slane %v6314_v33, 1 }
 0x5dc   :  { %2091 = vrot.lane.b32.xlu2 %v6481_v52, %s4493_s4 }
 0x5de   :  { %2113 = vrot.lane.b32.xlu1 %v6487_v42, %s4493_s4  ;;  %v6491_v45 = vpop.permute.xlu2 %2672 }
 0x5df   :  { %9022 = vst [vmem:[#allocation70_spill] sm:$0xff] %v6491_v45  ;;  %2111 = vrot.lane.b32.xlu0 %v6494_v15, %s4493_s4 }
 0x5e0   :  { %v6498_v1 = vpop.permute.xlu1 %2402 }
 0x5e1   :  { %9023 = vst [vmem:[#allocation71_spill] sm:$0xff] %v6498_v1  ;;  %v6502_v27 = vpop.permute.xlu0 %2690  ;;  %v6520_v1 = vsel %vm838_vm7, %v2048_v28, %v9013_v14 }
 0x5e2   :  { %9024 = vst [vmem:[#allocation72_spill] sm:$0xff] %v6502_v27  ;;  %v2056_v27 = vrot.slane %v6146_v12, 1 }
 0x5e4   :  { %2097 = vrot.lane.b32.xlu2 %v6507_v47, %s4493_s4  ;;  %v6545_v40 = vsel %vm838_vm7, %v2055_v63, %v2056_v27 }
 0x5e5   :  { %9030 = vst [vmem:[#allocation78_spill] sm:$0xff] %v6545_v40 }
 0x5e6   :  { %2119 = vrot.lane.b32.xlu1 %v6512_v46, %s4493_s4  ;;  %v6516_v53 = vpop.permute.xlu2 %2416 }
 0x5e7   :  { %9025 = vst [vmem:[#allocation73_spill] sm:$0xff] %v6516_v53  ;;  %2117 = vrot.lane.b32.xlu0 %v6520_v1, %s4493_s4  ;;  %v6538_v53 = vsel %vm838_vm7, %v2056_v27, %v9013_v14 }
 0x5e8   :  { %v6525_v45 = vpop.permute.xlu1 %2678  ;;  %9028 = vst [vmem:[#allocation76_spill] sm:$0xff] %v6538_v53 }
 0x5e9   :  { %9026 = vst [vmem:[#allocation74_spill] sm:$0xff] %v6525_v45  ;;  %v6528_v0 = vpop.permute.xlu0 %2670  ;;  %v2060_v45 = vrot.slane %v6087_v43, 1 }
 0x5ea   :  { %9027 = vst [vmem:[#allocation75_spill] sm:$0xff] %v6528_v0  ;;  %v2064_v0 = vrot.slane %v6365_v44, 1 }
 0x5ec   :  { %2103 = vrot.lane.b32.xlu2 %v6532_v3, %s4493_s4  ;;  %v6563_v27 = vsel %vm838_vm7, %v2063_v22, %v2064_v0 }
 0x5ed   :  { %9033 = vst [vmem:[#allocation81_spill] sm:$0xff] %v6563_v27 }
 0x5ee   :  { %2125 = vrot.lane.b32.xlu1 %v6538_v53, %s4493_s4  ;;  %v6542_v19 = vpop.permute.xlu2 %2714  ;;  %v6558_v53 = vsel %vm838_vm7, %v2040_v8, %v9013_v14  ;;  %v2047_v8 = vrot.slane %v6059_v36, 1 }
 0x5ef   :  { %9029 = vst [vmem:[#allocation77_spill] sm:$0xff] %v6542_v19  ;;  %2123 = vrot.lane.b32.xlu0 %v6545_v40, %s4493_s4  ;;  %v6571_v19 = vsel %vm838_vm7, %v2060_v45, %v9013_v14  ;;  %v2068_v40 = vrot.slane %v6357_v57, 1 }
 0x5f0   :  { %v6549_v11 = vpop.permute.xlu1 %2680  ;;  %9035 = vst [vmem:[#allocation83_spill] sm:$0xff] %v6571_v19 }
 0x5f1   :  { %9031 = vst [vmem:[#allocation79_spill] sm:$0xff] %v6549_v11  ;;  %v6553_v23 = vpop.permute.xlu0 %2692  ;;  %v2067_v11 = vrot.slane %v6255_v21, 1 }
 0x5f2   :  { %9032 = vst [vmem:[#allocation80_spill] sm:$0xff] %v6553_v23 }
 0x5f4   :  { %2109 = vrot.lane.b32.xlu2 %v6558_v53, %s4493_s4 }
 0x5f6   :  { %2131 = vrot.lane.b32.xlu1 %v6563_v27, %s4493_s4  ;;  %v6567_v63 = vpop.permute.xlu2 %2716  ;;  %v6583_v27 = vsel %vm838_vm7, %v2047_v8, %v2048_v28  ;;  %v2075_v8 = vrot.slane %v6191_v37, 1 }
 0x5f7   :  { %9034 = vst [vmem:[#allocation82_spill] sm:$0xff] %v6567_v63  ;;  %2129 = vrot.lane.b32.xlu0 %v6571_v19, %s4493_s4  ;;  %v6589_v63 = vsel %vm838_vm7, %v2068_v40, %v9013_v14 }
 0x5f8   :  { %v6576_v23 = vpop.permute.xlu1 %2686  ;;  %9038 = vst [vmem:[#allocation86_spill] sm:$0xff] %v6589_v63 }
 0x5f9   :  { %9036 = vst [vmem:[#allocation84_spill] sm:$0xff] %v6576_v23  ;;  %v6579_v22 = vpop.permute.xlu0 %2698  ;;  %v6596_v23 = vsel %vm838_vm7, %v2067_v11, %v2068_v40 }
 0x5fa   :  { %9037 = vst [vmem:[#allocation85_spill] sm:$0xff] %v6579_v22  ;;  %v2076_v22 = vrot.slane %v6238_v7, 1 }
 0x5fb   :  { %9040 = vst [vmem:[#allocation88_spill] sm:$0xff] %v6596_v23 }
 0x5fc   :  { %2115 = vrot.lane.b32.xlu2 %v6583_v27, %s4493_s4  ;;  %v6614_v40 = vsel %vm838_vm7, %v2075_v8, %v2076_v22 }
 0x5fd   :  { %9043 = vst [vmem:[#allocation91_spill] sm:$0xff] %v6614_v40 }
 0x5fe   :  { %2137 = vrot.lane.b32.xlu1 %v6589_v63, %s4493_s4  ;;  %v6593_v19 = vpop.permute.xlu2 %2418  ;;  %v6609_v63 = vsel %vm838_vm7, %v2052_v51, %v9013_v14  ;;  %v2059_v51 = vrot.slane %v6139_v5, 1 }
 0x5ff   :  { %9039 = vst [vmem:[#allocation87_spill] sm:$0xff] %v6593_v19  ;;  %2135 = vrot.lane.b32.xlu0 %v6596_v23, %s4493_s4  ;;  %v6622_v19 = vsel %vm838_vm7, %v2072_v48, %v9013_v14  ;;  %v2079_v23 = vrot.slane %v6269_v6, 1 }
 0x600   :  { %v6600_v28 = vpop.permute.xlu1 %2666  ;;  %9045 = vst [vmem:[#allocation93_spill] sm:$0xff] %v6622_v19 }
 0x601   :  { %9041 = vst [vmem:[#allocation89_spill] sm:$0xff] %v6600_v28  ;;  %v6604_v54 = vpop.permute.xlu0 %2702  ;;  %v2080_v28 = vrot.slane %v6299_v59, 1 }
 0x602   :  { %9042 = vst [vmem:[#allocation90_spill] sm:$0xff] %v6604_v54 }
 0x604   :  { %2121 = vrot.lane.b32.xlu2 %v6609_v63, %s4493_s4 }
 0x606   :  { %2143 = vrot.lane.b32.xlu1 %v6614_v40, %s4493_s4  ;;  %v6618_v11 = vpop.permute.xlu2 %2704  ;;  %v6634_v40 = vsel %vm838_vm7, %v2059_v51, %v2060_v45  ;;  %v2196_v51 = vrot.slane %v5943_v16, 2  ;;  %v2201_v16 = vrot.slane %v5983_v56, 2 }
 0x607   :  { %9044 = vst [vmem:[#allocation92_spill] sm:$0xff] %v6618_v11  ;;  %2141 = vrot.lane.b32.xlu0 %v6622_v19, %s4493_s4  ;;  %v6640_v11 = vsel %vm838_vm7, %v2080_v28, %v9013_v14 }
 0x608   :  { %v6627_v54 = vpop.permute.xlu1 %2688  ;;  %9048 = vst [vmem:[#allocation96_spill] sm:$0xff] %v6634_v40 }
 0x609   :  { %9046 = vst [vmem:[#allocation94_spill] sm:$0xff] %v6627_v54  ;;  %v6630_v8 = vpop.permute.xlu0 %2718  ;;  %v6647_v54 = vsel %vm838_vm7, %v2079_v23, %v2080_v28 }
 0x60a   :  { %9047 = vst [vmem:[#allocation95_spill] sm:$0xff] %v6630_v8  ;;  %v8884_v8 = vrot.slane %v5917_v39, 2 }
 0x60b   :  { %9049 = vst [vmem:[#allocation97_spill] sm:$0xff] %v6640_v11 }
 0x60c   :  { %2127 = vrot.lane.b32.xlu2 %v6634_v40, %s4493_s4  ;;  %9051 = vst [vmem:[#allocation99_spill] sm:$0xff] %v6647_v54  ;;  %v6667_v23 = vsel %vm828_vm6, %v2196_v51, %v8884_v8  ;;  %v2193_v8 = vrot.slane %v5881_v20, 2  ;;  %v2200_v20 = vrot.slane %v5859_v55, 2 }
 0x60e   :  { %2149 = vrot.lane.b32.xlu1 %v6640_v11, %s4493_s4  ;;  %v6644_v19 = vpop.permute.xlu2 %2406  ;;  %v6660_v11 = vsel %vm838_vm7, %v2064_v0, %v9013_v14  ;;  %v2071_v0 = vrot.slane %v6373_v4, 1 }
 0x60f   :  { %9050 = vst [vmem:[#allocation98_spill] sm:$0xff] %v6644_v19  ;;  %2147 = vrot.lane.b32.xlu0 %v6647_v54, %s4493_s4 }
 0x610   :  { %v6651_v45 = vpop.permute.xlu1 %2668  ;;  %9054 = vst [vmem:[#allocation102_spill] sm:$0xff] %v6660_v11 }
 0x611   :  { %9052 = vst [vmem:[#allocation100_spill] sm:$0xff] %v6651_v45  ;;  %v6655_v40 = vpop.permute.xlu0 %2720  ;;  %v6687_v45 = vsel %vm838_vm7, %v2071_v0, %v2072_v48  ;;  %v2208_v0 = vrot.slane %v6033_v13, 2  ;;  %v2213_v13 = vrot.slane %v6078_v9, 2 }
 0x612   :  { %9053 = vst [vmem:[#allocation101_spill] sm:$0xff] %v6655_v40  ;;  %v6675_v40 = vsel %vm838_vm7, %v2084_v58, %v9013_v14 }
 0x613   :  { %9056 = vst [vmem:[#allocation104_spill] sm:$0xff] %v6675_v40 }
 0x614   :  { %2133 = vrot.lane.b32.xlu2 %v6660_v11, %s4493_s4  ;;  %9059 = vst [vmem:[#allocation107_spill] sm:$0xff] %v6687_v45 }
 0x616   :  { %2264 = vrot.lane.b32.xlu1 %v6667_v23, %s4489_s18  ;;  %v6671_v28 = vpop.permute.xlu2 %2408 }
 0x617   :  { %9055 = vst [vmem:[#allocation103_spill] sm:$0xff] %v6671_v28  ;;  %2153 = vrot.lane.b32.xlu0 %v6675_v40, %s4493_s4  ;;  %v9060_v28 = vld [vmem:[#allocation5_spill] sm:$0xff] }
 0x618   :  { %v6680_v19 = vpop.permute.xlu1 %2712  ;;  %v6693_v54 = vsel %vm828_vm6, %v2201_v16, %v9060_v28 }
 0x619   :  { %9057 = vst [vmem:[#allocation105_spill] sm:$0xff] %v6680_v19  ;;  %v6683_v51 = vpop.permute.xlu0 %2696 }
 0x61a   :  { %9058 = vst [vmem:[#allocation106_spill] sm:$0xff] %v6683_v51  ;;  %v6701_v51 = vsel %vm828_vm6, %v2193_v8, %v9060_v28 }
 0x61c   :  { %2139 = vrot.lane.b32.xlu2 %v6687_v45, %s4493_s4  ;;  %v8897_v45 = vrot.slane %v6020_v24, 2 }
 0x61e   :  { %2270 = vrot.lane.b32.xlu1 %v6693_v54, %s4489_s18  ;;  %v6697_v19 = vpop.permute.xlu2 %2694  ;;  %v6721_v11 = vsel %vm828_vm6, %v2208_v0, %v8897_v45  ;;  %v2205_v0 = vrot.slane %v5902_v25, 2 }
 0x61f   :  { %9061 = vst [vmem:[#allocation5_spill] sm:$0xff] %v6697_v19  ;;  %2262 = vrot.lane.b32.xlu0 %v6701_v51, %s4489_s18  ;;  %v6714_v19 = vsel %vm838_vm7, %v2076_v22, %v9013_v14  ;;  %v2083_v14 = vrot.slane %v6287_v62, 1 }
 0x620   :  { %v6705_v48 = vpop.permute.xlu1 %2700  ;;  %9064 = vst [vmem:[#allocation110_spill] sm:$0xff] %v6714_v19 }
 0x621   :  { %9062 = vst [vmem:[#allocation108_spill] sm:$0xff] %v6705_v48  ;;  %v6709_v40 = vpop.permute.xlu0 %2706  ;;  %v6740_v45 = vsel %vm838_vm7, %v2083_v14, %v2084_v58  ;;  %v2220_v14 = vrot.slane %v6119_v34, 2 }
 0x622   :  { %9063 = vst [vmem:[#allocation109_spill] sm:$0xff] %v6709_v40  ;;  %v6728_v40 = vsel %vm828_vm6, %v2200_v20, %v2201_v16  ;;  %v6746_v20 = vsel %vm828_vm6, %v2213_v13, %v9060_v28 }
 0x623   :  { %9068 = vst [vmem:[#allocation114_spill] sm:$0xff] %v6740_v45 }
 0x624   :  { %2145 = vrot.lane.b32.xlu2 %v6714_v19, %s4493_s4 }
 0x626   :  { %2276 = vrot.lane.b32.xlu1 %v6721_v11, %s4489_s18  ;;  %v6725_v48 = vpop.permute.xlu2 %2422 }
 0x627   :  { %9065 = vst [vmem:[#allocation111_spill] sm:$0xff] %v6725_v48  ;;  %2268 = vrot.lane.b32.xlu0 %v6728_v40, %s4489_s18  ;;  %v2192_v48 = vrot.slane %v5889_v35, 2 }
 0x628   :  { %v6733_v22 = vpop.permute.xlu1 %2404 }
 0x629   :  { %9066 = vst [vmem:[#allocation112_spill] sm:$0xff] %v6733_v22  ;;  %v6736_v19 = vpop.permute.xlu0 %2708  ;;  %v8903_v22 = vrot.slane %v6109_v61, 2 }
 0x62a   :  { %9067 = vst [vmem:[#allocation113_spill] sm:$0xff] %v6736_v19  ;;  %v6754_v19 = vsel %vm828_vm6, %v2205_v0, %v9060_v28 }
 0x62b   :  { %v6774_v35 = vsel %vm828_vm6, %v2220_v14, %v8903_v22  ;;  %v2217_v14 = vrot.slane %v5993_v50, 2  ;;  %v9075_v22 = vrot.slane %v5917_v39, 2  ;;  %v2232_v50 = vrot.slane %v6162_v41, 2 }
 0x62c   :  { %2151 = vrot.lane.b32.xlu2 %v6740_v45, %s4493_s4  ;;  %v2212_v45 = vrot.slane %v5948_v18, 2  ;;  %v9081_v41 = vrot.slane %v6020_v24, 2  ;;  %v2245_v24 = vrot.slane %v6238_v7, 2 }
 0x62d   :  { %v6795_v18 = vsel %vm828_vm6, %v9075_v22, %v9060_v28  ;;  %v2204_v22 = vrot.slane %v5977_v29, 2 }
 0x62e   :  { %2282 = vrot.lane.b32.xlu1 %v6746_v20, %s4489_s18  ;;  %v6750_v16 = vpop.permute.xlu2 %2424 }
 0x62f   :  { %9069 = vst [vmem:[#allocation115_spill] sm:$0xff] %v6750_v16  ;;  %2274 = vrot.lane.b32.xlu0 %v6754_v19, %s4489_s18  ;;  %v6767_v16 = vsel %vm828_vm6, %v2192_v48, %v2193_v8  ;;  %v2225_v48 = vrot.slane %v6146_v12, 2  ;;  %v6809_v12 = vsel %vm828_vm6, %v2217_v14, %v9060_v28 }
 0x630   :  { %v6759_v58 = vpop.permute.xlu1 %2420 }
 0x631   :  { %9070 = vst [vmem:[#allocation116_spill] sm:$0xff] %v6759_v58  ;;  %v6763_v9 = vpop.permute.xlu0 %2410 }
 0x632   :  { %9071 = vst [vmem:[#allocation117_spill] sm:$0xff] %v6763_v9  ;;  %v6781_v9 = vsel %vm828_vm6, %v2212_v45, %v2213_v13  ;;  %v6801_v13 = vsel %vm828_vm6, %v2225_v48, %v9060_v28 }
 0x633   :  { %9076 = vst [vmem:[#allocation121_spill] sm:$0xff] %v6801_v13 }
 0x634   :  { %2260 = vrot.lane.b32.xlu2 %v6767_v16, %s4489_s18 }
 0x636   :  { %2288 = vrot.lane.b32.xlu1 %v6774_v35, %s4489_s18  ;;  %v6778_v58 = vpop.permute.xlu2 %2091 }
 0x637   :  { %9072 = vst [vmem:[#allocation118_spill] sm:$0xff] %v6778_v58  ;;  %2280 = vrot.lane.b32.xlu0 %v6781_v9, %s4489_s18 }
 0x638   :  { %v6785_v8 = vpop.permute.xlu1 %2095 }
 0x639   :  { %9073 = vst [vmem:[#allocation119_spill] sm:$0xff] %v6785_v8  ;;  %v6788_v34 = vpop.permute.xlu0 %2093  ;;  %v2233_v8 = vrot.slane %v6365_v44, 2 }
 0x63a   :  { %9074 = vst [vmem:[#allocation120_spill] sm:$0xff] %v6788_v34 }
 0x63b   :  { %v6827_v58 = vsel %vm828_vm6, %v2232_v50, %v2233_v8  ;;  %v2229_v50 = vrot.slane %v6087_v43, 2 }
 0x63c   :  { %2266 = vrot.lane.b32.xlu2 %v6795_v18, %s4489_s18  ;;  %9078 = vst [vmem:[#allocation123_spill] sm:$0xff] %v6827_v58 }
 0x63e   :  { %2294 = vrot.lane.b32.xlu1 %v6801_v13, %s4489_s18  ;;  %v6805_v45 = vpop.permute.xlu2 %2097  ;;  %v2224_v13 = vrot.slane %v6027_v10, 2 }
 0x63f   :  { %9077 = vst [vmem:[#allocation122_spill] sm:$0xff] %v6805_v45  ;;  %2286 = vrot.lane.b32.xlu0 %v6809_v12, %s4489_s18  ;;  %v6822_v45 = vsel %vm828_vm6, %v2204_v22, %v2205_v0  ;;  %v2237_v0 = vrot.slane %v6357_v57, 2  ;;  %v6862_v57 = vsel %vm828_vm6, %v2229_v50, %v9060_v28 }
 0x640   :  { %v6814_v39 = vpop.permute.xlu1 %2101  ;;  %v6834_v44 = vsel %vm828_vm6, %v2224_v13, %v2225_v48  ;;  %9084 = vst [vmem:[#allocation128_spill] sm:$0xff] %v6862_v57 }
 0x641   :  { %v6818_v34 = vpop.permute.xlu0 %2099  ;;  %9079 = vst [vmem:[#allocation124_spill] sm:$0xff] %v6834_v44  ;;  %v6854_v48 = vsel %vm828_vm6, %v2237_v0, %v9060_v28 }
 0x642   :  { %9082 = vst [vmem:[#allocation126_spill] sm:$0xff] %v6854_v48 }
 0x644   :  { %2272 = vrot.lane.b32.xlu2 %v6822_v45, %s4489_s18 }
 0x646   :  { %2300 = vrot.lane.b32.xlu1 %v6827_v58, %s4489_s18  ;;  %v6831_v25 = vpop.permute.xlu2 %2103  ;;  %v6848_v58 = vsel %vm828_vm6, %v9081_v41, %v9060_v28  ;;  %v2216_v41 = vrot.slane %v6059_v36, 2 }
 0x647   :  { %2292 = vrot.lane.b32.xlu0 %v6834_v44, %s4489_s18  ;;  %v2244_v44 = vrot.slane %v6191_v37, 2  ;;  %v9089_v37 = vrot.slane %v6109_v61, 2 }
 0x648   :  { %v6838_v10 = vpop.permute.xlu1 %2107 }
 0x649   :  { %9080 = vst [vmem:[#allocation125_spill] sm:$0xff] %v6838_v10  ;;  %v6841_v22 = vpop.permute.xlu0 %2105 }
 0x64c   :  { %2278 = vrot.lane.b32.xlu2 %v6848_v58, %s4489_s18 }
 0x64e   :  { %2306 = vrot.lane.b32.xlu1 %v6854_v48, %s4489_s18  ;;  %v6858_v13 = vpop.permute.xlu2 %2109  ;;  %v2236_v48 = vrot.slane %v6255_v21, 2 }
 0x64f   :  { %9083 = vst [vmem:[#allocation127_spill] sm:$0xff] %v6858_v13  ;;  %2298 = vrot.lane.b32.xlu0 %v6862_v57, %s4489_s18  ;;  %v6875_v13 = vsel %vm828_vm6, %v2216_v41, %v2217_v14  ;;  %v6880_v57 = vsel %vm828_vm6, %v2244_v44, %v2245_v24  ;;  %v2249_v14 = vrot.slane %v6299_v59, 2  ;;  %v2241_v44 = vrot.slane %v6392_v32, 2 }
 0x650   :  { %v6867_v43 = vpop.permute.xlu1 %2113  ;;  %9086 = vst [vmem:[#allocation130_spill] sm:$0xff] %v6880_v57  ;;  %v6887_v7 = vsel %vm828_vm6, %v2236_v48, %v2237_v0  ;;  %v2248_v32 = vrot.slane %v6269_v6, 2 }
 0x651   :  { %9085 = vst [vmem:[#allocation129_spill] sm:$0xff] %v6867_v43  ;;  %v6871_v10 = vpop.permute.xlu0 %2111  ;;  %v6901_v43 = vsel %vm828_vm6, %v9089_v37, %v9060_v28  ;;  %v6907_v0 = vsel %vm828_vm6, %v2249_v14, %v9060_v28  ;;  %v6915_v59 = vsel %vm828_vm6, %v2241_v44, %v9060_v28  ;;  %v2228_v37 = vrot.slane %v6139_v5, 2 }
 0x652   :  { %9091 = vst [vmem:[#allocation134_spill] sm:$0xff] %v6915_v59 }
 0x654   :  { %2284 = vrot.lane.b32.xlu2 %v6875_v13, %s4489_s18 }
 0x656   :  { %2312 = vrot.lane.b32.xlu1 %v6880_v57, %s4489_s18  ;;  %v6884_v36 = vpop.permute.xlu2 %2115 }
 0x657   :  { %2304 = vrot.lane.b32.xlu0 %v6887_v7, %s4489_s18 }
 0x658   :  { %v6891_v21 = vpop.permute.xlu1 %2119 }
 0x659   :  { %9087 = vst [vmem:[#allocation131_spill] sm:$0xff] %v6891_v21  ;;  %v6894_v41 = vpop.permute.xlu0 %2117 }
 0x65a   :  { %9088 = vst [vmem:[#allocation132_spill] sm:$0xff] %v6894_v41  ;;  %v6926_v41 = vsel %vm828_vm6, %v2228_v37, %v2229_v50  ;;  %v2253_v50 = vrot.slane %v6314_v33, 2  ;;  %v6946_v37 = vsel %vm828_vm6, %v2233_v8, %v9060_v28  ;;  %v2240_v33 = vrot.slane %v6373_v4, 2 }
 0x65b   :  { %9094 = vst [vmem:[#allocation137_spill] sm:$0xff] %v6926_v41 }
 0x65c   :  { %2290 = vrot.lane.b32.xlu2 %v6901_v43, %s4489_s18 }
 0x65e   :  { %2318 = vrot.lane.b32.xlu1 %v6907_v0, %s4489_s18  ;;  %v6911_v48 = vpop.permute.xlu2 %2121 }
 0x65f   :  { %9090 = vst [vmem:[#allocation133_spill] sm:$0xff] %v6911_v48  ;;  %2310 = vrot.lane.b32.xlu0 %v6915_v59, %s4489_s18  ;;  %v6935_v59 = vsel %vm828_vm6, %v2248_v32, %v2249_v14  ;;  %v6956_v14 = vsel %vm828_vm6, %v2253_v50, %v9060_v28 }
 0x660   :  { %v6920_v61 = vpop.permute.xlu1 %2125  ;;  %9099 = vst [vmem:[#allocation142_spill] sm:$0xff] %v6956_v14 }
 0x661   :  { %9092 = vst [vmem:[#allocation135_spill] sm:$0xff] %v6920_v61  ;;  %v6922_v21 = vpop.permute.xlu0 %2123 }
 0x662   :  { %9093 = vst [vmem:[#allocation136_spill] sm:$0xff] %v6922_v21 }
 0x664   :  { %2296 = vrot.lane.b32.xlu2 %v6926_v41, %s4489_s18  ;;  %v9136_v41 = vld [vmem:[#allocation18_spill] sm:$0xff] }
 0x666   :  { %2763 = vrot.lane.b32.xlu1 %v6532_v3, %s4495_s0  ;;  %v6932_v48 = vpop.permute.xlu2 %2127 }
 0x667   :  { %9095 = vst [vmem:[#allocation138_spill] sm:$0xff] %v6932_v48  ;;  %2316 = vrot.lane.b32.xlu0 %v6935_v59, %s4489_s18 }
 0x668   :  { %v6939_v61 = vpop.permute.xlu1 %2131 }
 0x669   :  { %9096 = vst [vmem:[#allocation139_spill] sm:$0xff] %v6939_v61  ;;  %v6941_v21 = vpop.permute.xlu0 %2129  ;;  %v6966_v61 = vsel %vm828_vm6, %v2240_v33, %v2241_v44  ;;  %v2252_v44 = vrot.slane %v6287_v62, 2 }
 0x66a   :  { %9097 = vst [vmem:[#allocation140_spill] sm:$0xff] %v6941_v21 }
 0x66b   :  { %9102 = vst [vmem:[#allocation145_spill] sm:$0xff] %v6966_v61 }
 0x66c   :  { %2302 = vrot.lane.b32.xlu2 %v6946_v37, %s4489_s18 }
 0x66e   :  { %2765 = vrot.lane.b32.xlu1 %v6469_v31, %s4495_s0  ;;  %v6952_v32 = vpop.permute.xlu2 %2133 }
 0x66f   :  { %9098 = vst [vmem:[#allocation141_spill] sm:$0xff] %v6952_v32  ;;  %2322 = vrot.lane.b32.xlu0 %v6956_v14, %s4489_s18 }
 0x670   :  { %v6961_v6 = vpop.permute.xlu1 %2137 }
 0x671   :  { %9100 = vst [vmem:[#allocation143_spill] sm:$0xff] %v6961_v6  ;;  %v6963_v8 = vpop.permute.xlu0 %2135  ;;  %v6982_v6 = vsel %vm828_vm6, %v2245_v24, %v9060_v28  ;;  %v6998_v24 = vsel %vm828_vm6, %v2252_v44, %v2253_v50 }
 0x672   :  { %9101 = vst [vmem:[#allocation144_spill] sm:$0xff] %v6963_v8 }
 0x673   :  { %9108 = vst [vmem:[#allocation151_spill] sm:$0xff] %v6998_v24 }
 0x674   :  { %2308 = vrot.lane.b32.xlu2 %v6966_v61, %s4489_s18 }
 0x676   :  { %2578 = vrot.lane.b32.xlu1 %v6822_v45, %s4496_s1  ;;  %v6972_v32 = vpop.permute.xlu2 %2139 }
 0x677   :  { %9103 = vst [vmem:[#allocation146_spill] sm:$0xff] %v6972_v32  ;;  %2576 = vrot.lane.b32.xlu0 %v6693_v54, %s4496_s1 }
 0x678   :  { %v6976_v21 = vpop.permute.xlu1 %2143 }
 0x679   :  { %9104 = vst [vmem:[#allocation147_spill] sm:$0xff] %v6976_v21  ;;  %v6978_v4 = vpop.permute.xlu0 %2141 }
 0x67c   :  { %2314 = vrot.lane.b32.xlu2 %v6982_v6, %s4489_s18 }
 0x67e   :  { %2480 = vrot.lane.b32.xlu1 %v6461_v17, %s4481_s19  ;;  %v6988_v33 = vpop.permute.xlu2 %2145 }
 0x67f   :  { %9105 = vst [vmem:[#allocation148_spill] sm:$0xff] %v6988_v33  ;;  %2476 = vrot.lane.b32.xlu0 %v6532_v3, %s4481_s19 }
 0x680   :  { %v6993_v32 = vpop.permute.xlu1 %2149 }
 0x681   :  { %9106 = vst [vmem:[#allocation149_spill] sm:$0xff] %v6993_v32  ;;  %v6995_v8 = vpop.permute.xlu0 %2147 }
 0x682   :  { %9107 = vst [vmem:[#allocation150_spill] sm:$0xff] %v6995_v8 }
 0x684   :  { %2320 = vrot.lane.b32.xlu2 %v6998_v24, %s4489_s18 }
 0x686   :  { %2584 = vrot.lane.b32.xlu1 %v6848_v58, %s4496_s1  ;;  %v7004_v28 = vpop.permute.xlu2 %2151 }
 0x687   :  { %9109 = vst [vmem:[#allocation152_spill] sm:$0xff] %v7004_v28  ;;  %2580 = vrot.lane.b32.xlu0 %v6754_v19, %s4496_s1 }
 0x688   :  { %v7008_v3 = vpop.permute.xlu1 %2264 }
 0x689   :  { %v7010_v62 = vpop.permute.xlu0 %2153 }
 0x68a   :  { %9110 = vst [vmem:[#allocation153_spill] sm:$0xff] %v7010_v62 }
 0x68c   :  { %2474 = vrot.lane.b32.xlu2 %v6440_v49, %s4481_s19 }
 0x68e   :  { %2861 = vrot.lane.b32.xlu1 %v6781_v9, %s4484_s20  ;;  %v7016_v50 = vpop.permute.xlu2 %2260 }
 0x68f   :  { %2857 = vrot.lane.b32.xlu0 %v6721_v11, %s4484_s20 }
 0x690   :  { %v7020_v44 = vpop.permute.xlu1 %2270 }
 0x691   :  { %v7022_v28 = vpop.permute.xlu0 %2262 }
 0x694   :  { %2853 = vrot.lane.b32.xlu2 %v6822_v45, %s4484_s20 }
 0x696   :  { %2863 = vrot.lane.b32.xlu1 %v6746_v20, %s4484_s20  ;;  %v7028_v62 = vpop.permute.xlu2 %2266 }
 0x697   :  { %9111 = vst [vmem:[#allocation154_spill] sm:$0xff] %v7028_v62  ;;  %2859 = vrot.lane.b32.xlu0 %v6848_v58, %s4484_s20  ;;  %v9137_v62 = vld [vmem:[#allocation17_spill] sm:$0xff] }
 0x698   :  { %v7032_v32 = vpop.permute.xlu1 %2276 }
 0x699   :  { %v7034_v8 = vpop.permute.xlu0 %2268 }
 0x69c   :  { %2855 = vrot.lane.b32.xlu2 %v6754_v19, %s4484_s20 }
 0x69e   :  { %2460 = vrot.lane.b32.xlu1 %v6481_v52, %s4481_s19  ;;  %v7040_v33 = vpop.permute.xlu2 %2272 }
 0x69f   :  { %2482 = vrot.lane.b32.xlu0 %v6558_v53, %s4481_s19 }
 0x6a0   :  { %v7044_v45 = vpop.permute.xlu1 %2282 }
 0x6a1   :  { %v7046_v21 = vpop.permute.xlu0 %2274 }
 0x6a4   :  { %2478 = vrot.lane.b32.xlu2 %v6469_v31, %s4481_s19 }
 0x6a6   :  { %2588 = vrot.lane.b32.xlu1 %v6746_v20, %s4496_s1  ;;  %v7052_v58 = vpop.permute.xlu2 %2278 }
 0x6a7   :  { %2771 = vrot.lane.b32.xlu0 %v6494_v15, %s4495_s0 }
 0x6a8   :  { %v7056_v19 = vpop.permute.xlu1 %2288 }
 0x6a9   :  { %9112 = vst [vmem:[#allocation155_spill] sm:$0xff] %v7056_v19  ;;  %v7058_v52 = vpop.permute.xlu0 %2280 }
 0x6ac   :  { %2767 = vrot.lane.b32.xlu2 %v6461_v17, %s4495_s0 }
 0x6ae   :  { %2847 = vrot.lane.b32.xlu1 %v6795_v18, %s4484_s20  ;;  %v7064_v61 = vpop.permute.xlu2 %2284 }
 0x6af   :  { %2773 = vrot.lane.b32.xlu0 %v6487_v42, %s4495_s0 }
 0x6b0   :  { %v7068_v31 = vpop.permute.xlu1 %2294 }
 0x6b1   :  { %9113 = vst [vmem:[#allocation156_spill] sm:$0xff] %v7068_v31  ;;  %v7070_v20 = vpop.permute.xlu0 %2286 }
 0x6b2   :  { %9114 = vst [vmem:[#allocation157_spill] sm:$0xff] %v7070_v20 }
 0x6b4   :  { %2769 = vrot.lane.b32.xlu2 %v6558_v53, %s4495_s0 }
 0x6b6   :  { %2570 = vrot.lane.b32.xlu1 %v6667_v23, %s4496_s1  ;;  %v7076_v19 = vpop.permute.xlu2 %2290 }
 0x6b7   :  { %9115 = vst [vmem:[#allocation158_spill] sm:$0xff] %v7076_v19  ;;  %2586 = vrot.lane.b32.xlu0 %v6781_v9, %s4496_s1 }
 0x6b8   :  { %v7080_v17 = vpop.permute.xlu1 %2300 }
 0x6b9   :  { %9116 = vst [vmem:[#allocation159_spill] sm:$0xff] %v7080_v17  ;;  %v7082_v14 = vpop.permute.xlu0 %2292 }
 0x6ba   :  { %9117 = vst [vmem:[#allocation160_spill] sm:$0xff] %v7082_v14 }
 0x6bc   :  { %2582 = vrot.lane.b32.xlu2 %v6721_v11, %s4496_s1 }
 0x6be   :  { %2470 = vrot.lane.b32.xlu1 %v6507_v47, %s4481_s19  ;;  %v7088_v31 = vpop.permute.xlu2 %2296 }
 0x6bf   :  { %9118 = vst [vmem:[#allocation161_spill] sm:$0xff] %v7088_v31  ;;  %2486 = vrot.lane.b32.xlu0 %v6487_v42, %s4481_s19  ;;  %v3390_v42 = vld [vmem:[%s8843_s11 + $0x20] sm:$0xf]  ;;  %v7196_v31 = vunpack.i.l.bf16 %v9137_v62 }
 0x6c0   :  { %v7092_v53 = vpop.permute.xlu1 %2306  ;;  %4256 = vmatpush.msk.msra.mxu1 %vm149_vm3, %v3390_v42  ;;  %4191 = vmatpush.msk.msra.mxu0 %vm149_vm3, %v3390_v42 }
 0x6c1   :  { %9119 = vst [vmem:[#allocation162_spill] sm:$0xff] %v7092_v53  ;;  %v7094_v19 = vpop.permute.xlu0 %2298  ;;  %v3389_v53 = vld [vmem:[%s8843_s11 + $0x18] sm:$0xff]  ;;  %4258 = vmatpush.msk.msra.mxu3 %vm149_vm3, %v3390_v42  ;;  %4257 = vmatpush.msk.msra.mxu2 %vm149_vm3, %v3390_v42 }
 0x6c2   :  { %9120 = vst [vmem:[#allocation163_spill] sm:$0xff] %v7094_v19  ;;  %4259 = vmatpush.msra.mxu1 %v3389_v53  ;;  %3603 = vmatpush.msra.mxu0 %v3389_v53 }
 0x6c3   :  { %4261 = vmatpush.msra.mxu3 %v3389_v53  ;;  %4260 = vmatpush.msra.mxu2 %v3389_v53  ;;  %v3387_v53 = vld [vmem:[%s8843_s11 + $0x8] sm:$0xff] }
 0x6c4   :  { %2484 = vrot.lane.b32.xlu2 %v6494_v15, %s4481_s19 }
 0x6c6   :  { %2779 = vrot.lane.b32.xlu1 %v6512_v46, %s4495_s0  ;;  %v7100_v9 = vpop.permute.xlu2 %2302 }
 0x6c7   :  { %9121 = vst [vmem:[#allocation164_spill] sm:$0xff] %v7100_v9  ;;  %2564 = vrot.lane.b32.xlu0 %v6701_v51, %s4496_s1  ;;  %v3388_v51 = vld [vmem:[%s8843_s11 + $0x10] sm:$0xff] }
 0x6c8   :  { %v7104_v11 = vpop.permute.xlu1 %2312  ;;  %4262 = vmatpush.msra.mxu1 %v3388_v51  ;;  %3604 = vmatpush.msra.mxu0 %v3388_v51 }
 0x6c9   :  { %9122 = vst [vmem:[#allocation165_spill] sm:$0xff] %v7104_v11  ;;  %v7112_v14 = vpop.permute.xlu0 %2304  ;;  %4264 = vmatpush.msra.mxu3 %v3388_v51  ;;  %4263 = vmatpush.msra.mxu2 %v3388_v51  ;;  %v9133_v11 = vld [vmem:[#allocation12_spill] sm:$0xff] }
 0x6ca   :  { %9123 = vst [vmem:[#allocation166_spill] sm:$0xff] %v7112_v14  ;;  %4265 = vmatpush.msra.mxu1 %v3387_v53  ;;  %3605 = vmatpush.msra.mxu0 %v3387_v53 }
 0x6cb   :  { %4267 = vmatpush.msra.mxu3 %v3387_v53  ;;  %4266 = vmatpush.msra.mxu2 %v3387_v53  ;;  %v9130_v53 = vld [vmem:[#allocation11_spill] sm:$0xff] }
 0x6cc   :  { %2562 = vrot.lane.b32.xlu2 %v6767_v16, %s4496_s1  ;;  %v4380_v9 = vunpack.i.h.bf16 %v9130_v53 }
 0x6ce   :  { %2849 = vrot.lane.b32.xlu1 %v6728_v40, %s4484_s20  ;;  %v7122_v15 = vpop.permute.xlu2 %2308 }
 0x6cf   :  { %9124 = vst [vmem:[#allocation167_spill] sm:$0xff] %v7122_v15  ;;  %2865 = vrot.lane.b32.xlu0 %v6875_v13, %s4484_s20  ;;  %v3386_v15 = vld [vmem:[%s8843_s11] sm:$0xff] }
 0x6d0   :  { %v7129_v42 = vpop.permute.xlu1 %2318  ;;  %4268 = vmatpush.msra.mxu1 %v3386_v15  ;;  %3606 = vmatpush.msra.mxu0 %v3386_v15 }
 0x6d1   :  { %9125 = vst [vmem:[#allocation168_spill] sm:$0xff] %v7129_v42  ;;  %v7131_v16 = vpop.permute.xlu0 %2310  ;;  %4270 = vmatpush.msra.mxu3 %v3386_v15  ;;  %4269 = vmatpush.msra.mxu2 %v3386_v15 }
 0x6d2   :  { %9126 = vst [vmem:[#allocation169_spill] sm:$0xff] %v7131_v16  ;;  %v9140_v16 = vld [vmem:[#allocation9_spill] sm:$0xff] }
 0x6d3   :  { %v4375_v20 = vunpack.i.h.bf16 %v9140_v16 }
 0x6d4   :  { %2462 = vrot.lane.b32.xlu2 %v6426_v38, %s4481_s19 }
 0x6d6   :  { %2781 = vrot.lane.b32.xlu1 %v6609_v63, %s4495_s0  ;;  %v7143_v14 = vpop.permute.xlu2 %2314 }
 0x6d7   :  { %9127 = vst [vmem:[#allocation170_spill] sm:$0xff] %v7143_v14  ;;  %2845 = vrot.lane.b32.xlu0 %v6667_v23, %s4484_s20  ;;  %v9132_v23 = vld [vmem:[#allocation8_spill] sm:$0xff]  ;;  %v2937_v14 = vsel %vm1335_vm10, %v5859_v55, %v6818_v34 }
 0x6d8   :  { %v2764_v51 = vpop.permute.xlu1 %2763 }
 0x6d9   :  { %v7147_v42 = vpop.permute.xlu0 %2316 }
 0x6da   :  { %9128 = vst [vmem:[#allocation171_spill] sm:$0xff] %v7147_v42  ;;  %v2932_v42 = vsel %vm1335_vm10, %v9132_v23, %v4380_v9  ;;  %v9134_v9 = vld [vmem:[#allocation14_spill] sm:$0xff] }
 0x6db   :  { %v7173_v19 = vsel %vm72_vm5, %v2932_v42, %v9133_v11  ;;  %v7180_v23 = vunpack.i.l.bf16 %v9134_v9  ;;  %v9135_v42 = vld [vmem:[#allocation13_spill] sm:$0xff] }
 0x6dc   :  { %2775 = vrot.lane.b32.xlu2 %v6583_v27, %s4495_s0  ;;  %v3009_v55 = vsel %vm2999_vm0, %v7173_v19, %v6396_v30  ;;  %v7187_v24 = vunpack.i.l.bf16 %v9135_v42  ;;  %v9138_v30 = vld [vmem:[#allocation15_spill] sm:$0xff] }
 0x6de   :  { %2871 = vrot.lane.b32.xlu1 %v6901_v43, %s4484_s20  ;;  %v7153_v38 = vpop.permute.xlu2 %2320 }
 0x6df   :  { %9129 = vst [vmem:[#allocation172_spill] sm:$0xff] %v7153_v38  ;;  %2867 = vrot.lane.b32.xlu0 %v6809_v12, %s4484_s20 }
 0x6e0   :  { %v7158_v15 = vpop.permute.xlu1 %2765 }
 0x6e1   :  { %v7160_v17 = vpop.permute.xlu0 %2322 }
 0x6e2   :  { %9131 = vst [vmem:[#allocation11_spill] sm:$0xff] %v7160_v17  ;;  %v2971_v17 = vsel %vm72_vm5, %v2937_v14, %v7034_v8  ;;  %v7190_v14 = vunpack.i.l.bf16 %v9136_v41 }
 0x6e4   :  { %2755 = vrot.lane.b32.xlu2 %v6418_v60, %s4495_s0 }
 0x6e6   :  { %2618 = vrot.lane.b32.xlu1 %v6880_v57, %s4496_s1  ;;  %v2475_v38 = vpop.permute.xlu2 %2474 }
 0x6e7   :  { %2488 = vrot.lane.b32.xlu0 %v6583_v27, %s4481_s19  ;;  %v3073_v57 = vsel %vm440_vm8, %v3009_v55, %v2475_v38  ;;  %v3010_v27 = vsel %vm2999_vm0, %v2971_v17, %v7180_v23  ;;  %v9139_v17 = vld [vmem:[#allocation16_spill] sm:$0xff] }
 0x6e8   :  { %v2579_v34 = vpop.permute.xlu1 %2578  ;;  %v3074_v55 = vsel %vm440_vm8, %v3010_v27, %v7190_v14  ;;  %v4379_v27 = vunpack.i.l.bf16 %v9130_v53  ;;  %v9141_v53 = vld [vmem:[#allocation7_spill] sm:$0xff]  ;;  %v7246_v16 = vunpack.i.h.bf16 %v9139_v17 }
 0x6e9   :  { %v2577_v11 = vpop.permute.xlu0 %2576 }
 0x6ea   :  { %v3138_v8 = vsel %vm3128_vm1, %v3073_v57, %v2577_v11  ;;  %v7209_v11 = vunpack.i.l.bf16 %v9139_v17 }
 0x6eb   :  { %v3202_v5 = vsel %vm1109_vm14, %v3138_v8, %v9138_v30  ;;  %v2938_v8 = vsel %vm1335_vm10, %v5983_v56, %v6814_v39 }
 0x6ec   :  { %2777 = vrot.lane.b32.xlu2 %v6520_v1, %s4495_s0  ;;  %v3267_v38 = vsel %vm3257_vm2, %v3202_v5, %v7187_v24  ;;  %v2972_v5 = vsel %vm72_vm5, %v2938_v8, %v7020_v44  ;;  %v3139_v39 = vsel %vm3128_vm1, %v3074_v55, %v7209_v11  ;;  %v7233_v44 = vunpack.i.h.bf16 %v9136_v41 }
 0x6ed   :  { %v3331_v57 = vsel %vm448_vm9, %v3267_v38, %v7196_v31  ;;  %v7223_v38 = vunpack.i.h.bf16 %v9134_v9  ;;  %v2931_v9 = vsel %vm1335_vm10, %v9141_v53, %v4379_v27 }
 0x6ee   :  { %2761 = vrot.lane.b32.xlu1 %v6440_v49, %s4495_s0  ;;  %v2854_v48 = vpop.permute.xlu2 %2853  ;;  %4201 = vmatmul.msk.f32.vlgmr.msra.gmra.mxu1 %vm3395_vm4, %v3331_v57  ;;  %v7252_v41 = vsel %vm72_vm5, %v2931_v9, %v4375_v20  ;;  %v9145_v9 = vld [vmem:[#allocation10_spill] sm:$0xff] }
 0x6ef   :  { %2468 = vrot.lane.b32.xlu0 %v6418_v60, %s4481_s19  ;;  %v3011_v57 = vsel %vm2999_vm0, %v2972_v5, %v7223_v38  ;;  %v3203_v60 = vsel %vm1109_vm14, %v3139_v39, %v6455_v26  ;;  %v9142_v39 = vld [vmem:[#allocation69_spill] sm:$0xff] }
 0x6f0   :  { %v7227_v56 = vpop.permute.xlu1 %2480  ;;  %v3268_v8 = vsel %vm3257_vm2, %v3203_v60, %v2764_v51  ;;  %v3075_v55 = vsel %vm440_vm8, %v3011_v57, %v7233_v44  ;;  %v9143_v60 = vld [vmem:[#allocation102_spill] sm:$0xff] }
 0x6f1   :  { %v2477_v49 = vpop.permute.xlu0 %2476  ;;  %v3332_v5 = vsel %vm448_vm9, %v3268_v8, %v2854_v48  ;;  %v3140_v48 = vsel %vm3128_vm1, %v3075_v55, %v7246_v16 }
 0x6f2   :  { %v3204_v57 = vsel %vm1109_vm14, %v3140_v48, %v9142_v39  ;;  %v7291_v48 = vunpack.i.h.bf16 %v9137_v62 }
 0x6f3   :  { %v3269_v20 = vsel %vm3257_vm2, %v3204_v57, %v7158_v15  ;;  %v7280_v15 = vunpack.i.h.bf16 %v9135_v42  ;;  %v2939_v42 = vsel %vm1335_vm10, %v5977_v29, %v6831_v25 }
 0x6f4   :  { %2757 = vrot.lane.b32.xlu2 %v6507_v47, %s4495_s0  ;;  %v3012_v47 = vsel %vm2999_vm0, %v7252_v41, %v6310_v2  ;;  %v2973_v39 = vsel %vm72_vm5, %v2939_v42, %v7040_v33 }
 0x6f5   :  { %v3076_v17 = vsel %vm440_vm8, %v3012_v47, %v2477_v49  ;;  %v9144_v49 = vld [vmem:[#allocation110_spill] sm:$0xff]  ;;  %v3014_v29 = vsel %vm2999_vm0, %v2973_v39, %v7180_v23 }
 0x6f6   :  { %2594 = vrot.lane.b32.xlu1 %v6774_v35, %s4496_s1  ;;  %v2856_v26 = vpop.permute.xlu2 %2855  ;;  %4202 = vmatmul.msk.f32.gmra.mxu1 %vm3395_vm4, %v3332_v5 }
 0x6f7   :  { %2592 = vrot.lane.b32.xlu0 %v6809_v12, %s4496_s1  ;;  %v3141_v12 = vsel %vm3128_vm1, %v3076_v17, %v2579_v34  ;;  %v3333_v2 = vsel %vm448_vm9, %v3269_v20, %v2856_v26  ;;  %v9146_v34 = vld [vmem:[#allocation49_spill] sm:$0xff] }
 0x6f8   :  { %v7261_v51 = vpop.permute.xlu1 %2584  ;;  %v3205_v8 = vsel %vm1109_vm14, %v3141_v12, %v9145_v9  ;;  %v9147_v20 = vld [vmem:[#allocation81_spill] sm:$0xff] }
 0x6f9   :  { %v2581_v27 = vpop.permute.xlu0 %2580  ;;  %v3270_v47 = vsel %vm3257_vm2, %v3205_v8, %v7280_v15  ;;  %v9148_v12 = vld [vmem:[#allocation21_spill] sm:$0xff] }
 0x6fa   :  { %v3334_v57 = vsel %vm448_vm9, %v3270_v47, %v7291_v48 }
 0x6fc   :  { %2590 = vrot.lane.b32.xlu2 %v6875_v13, %s4496_s1  ;;  %v3013_v13 = vsel %vm2999_vm0, %v7173_v19, %v9146_v34 }
 0x6fe   :  { %2789 = vrot.lane.b32.xlu1 %v9143_v60, %s4495_s0  ;;  %v2479_v53 = vpop.permute.xlu2 %2478  ;;  %4203 = vmatmul.msk.f32.gmra.mxu1 %vm3395_vm4, %v3333_v2  ;;  %v2940_v2 = vsel %vm1335_vm10, %v9148_v12, %v6841_v22  ;;  %v9152_v12 = vld [vmem:[#allocation60_spill] sm:$0xff] }
 0x6ff   :  { %2801 = vrot.lane.b32.xlu0 %v9144_v49, %s4495_s0  ;;  %v3077_v5 = vsel %vm440_vm8, %v3013_v13, %v2479_v53  ;;  %v2974_v53 = vsel %vm72_vm5, %v2940_v2, %v7046_v21  ;;  %v9149_v13 = vld [vmem:[#allocation123_spill] sm:$0xff]  ;;  %v9150_v21 = vld [vmem:[#allocation74_spill] sm:$0xff] }
 0x700   :  { %v7285_v55 = vpop.permute.xlu1 %2861  ;;  %v3142_v17 = vsel %vm3128_vm1, %v3077_v5, %v2581_v27 }
 0x701   :  { %v2858_v26 = vpop.permute.xlu0 %2857  ;;  %v3206_v25 = vsel %vm1109_vm14, %v3142_v17, %v9138_v30 }
 0x702   :  { %v3271_v27 = vsel %vm3257_vm2, %v3206_v25, %v7187_v24 }
 0x703   :  { %v3335_v8 = vsel %vm448_vm9, %v3271_v27, %v7196_v31  ;;  %v9151_v27 = vld [vmem:[#allocation79_spill] sm:$0xff] }
 0x704   :  { %2490 = vrot.lane.b32.xlu2 %v6520_v1, %s4481_s19 }
 0x706   :  { %2494 = vrot.lane.b32.xlu1 %v6609_v63, %s4481_s19  ;;  %v2768_v62 = vpop.permute.xlu2 %2767  ;;  %4204 = vmatmul.msk.f32.gmra.mxu1 %vm3395_vm4, %v3334_v57  ;;  %v3078_v63 = vsel %vm440_vm8, %v3014_v29, %v7190_v14 }
 0x707   :  { %2787 = vrot.lane.b32.xlu0 %v9147_v20, %s4495_s0  ;;  %v3143_v34 = vsel %vm3128_vm1, %v3078_v63, %v7209_v11 }
 0x708   :  { %v7312_v1 = vpop.permute.xlu1 %2863  ;;  %v3207_v47 = vsel %vm1109_vm14, %v3143_v34, %v9150_v21  ;;  %v9153_v34 = vld [vmem:[#allocation65_spill] sm:$0xff] }
 0x709   :  { %v2860_v33 = vpop.permute.xlu0 %2859  ;;  %v3272_v17 = vsel %vm3257_vm2, %v3207_v47, %v2768_v62 }
 0x70a   :  { %v3336_v57 = vsel %vm448_vm9, %v3272_v17, %v2858_v26  ;;  %v3016_v26 = vsel %vm2999_vm0, %v7252_v41, %v9152_v12 }
 0x70c   :  { %2572 = vrot.lane.b32.xlu2 %v6795_v18, %s4496_s1  ;;  %v3015_v18 = vsel %vm2999_vm0, %v2974_v53, %v7223_v38  ;;  %v3080_v53 = vsel %vm440_vm8, %v3016_v26, %v7227_v56  ;;  %v9154_v56 = vld [vmem:[#allocation47_spill] sm:$0xff] }
 0x70d   :  { %v3079_v39 = vsel %vm440_vm8, %v3015_v18, %v7233_v44  ;;  %v3017_v18 = vsel %vm2999_vm0, %v7173_v19, %v9154_v56 }
 0x70e   :  { %2606 = vrot.lane.b32.xlu1 %v9149_v13, %s4496_s1  ;;  %v2770_v5 = vpop.permute.xlu2 %2769  ;;  %4205 = vmatmul.msk.f32.gmra.mxu1 %vm3395_vm4, %v3335_v8  ;;  %v3144_v25 = vsel %vm3128_vm1, %v3079_v39, %v7246_v16  ;;  %v9155_v39 = vld [vmem:[#allocation125_spill] sm:$0xff] }
 0x70f   :  { %2877 = vrot.lane.b32.xlu0 %v9149_v13, %s4484_s20  ;;  %v3208_v63 = vsel %vm1109_vm14, %v3144_v25, %v9151_v27  ;;  %v9157_v27 = vld [vmem:[#allocation48_spill] sm:$0xff] }
 0x710   :  { %v2461_v22 = vpop.permute.xlu1 %2460  ;;  %v3273_v2 = vsel %vm3257_vm2, %v3208_v63, %v2770_v5  ;;  %v3000_v63 = vsel %vm2999_vm0, %v7252_v41, %v9157_v27 }
 0x711   :  { %v2483_v42 = vpop.permute.xlu0 %2482  ;;  %v3064_v26 = vsel %vm440_vm8, %v3000_v63, %v2461_v22 }
 0x714   :  { %2869 = vrot.lane.b32.xlu2 %v6774_v35, %s4484_s20 }
 0x716   :  { %2608 = vrot.lane.b32.xlu1 %v6946_v37, %s4496_s1  ;;  %v2583_v29 = vpop.permute.xlu2 %2582  ;;  %4206 = vmatmul.msk.f32.gmra.mxu1 %vm3395_vm4, %v3336_v57  ;;  %v9156_v57 = vld [vmem:[#allocation28_spill] sm:$0xff] }
 0x717   :  { %2851 = vrot.lane.b32.xlu0 %v6693_v54, %s4484_s20  ;;  %v3145_v8 = vsel %vm3128_vm1, %v3080_v53, %v2583_v29  ;;  %v3337_v54 = vsel %vm448_vm9, %v3273_v2, %v2860_v33  ;;  %v3081_v33 = vsel %vm440_vm8, %v3017_v18, %v2483_v42  ;;  %v2941_v25 = vsel %vm1335_vm10, %v9156_v57, %v9155_v39  ;;  %v9158_v2 = vld [vmem:[#allocation99_spill] sm:$0xff]  ;;  %v9161_v39 = vld [vmem:[#allocation26_spill] sm:$0xff] }
 0x718   :  { %v7351_v62 = vpop.permute.xlu1 %2588  ;;  %v3209_v5 = vsel %vm1109_vm14, %v3145_v8, %v9145_v9  ;;  %v3146_v29 = vsel %vm3128_vm1, %v3081_v33, %v7261_v51  ;;  %v2975_v42 = vsel %vm72_vm5, %v2941_v25, %v7032_v32  ;;  %v9159_v33 = vld [vmem:[#allocation91_spill] sm:$0xff] }
 0x719   :  { %v2772_v35 = vpop.permute.xlu0 %2771  ;;  %v3274_v17 = vsel %vm3257_vm2, %v3209_v5, %v7280_v15  ;;  %v3210_v8 = vsel %vm1109_vm14, %v3146_v29, %v9138_v30  ;;  %v3018_v32 = vsel %vm2999_vm0, %v2975_v42, %v7180_v23 }
 0x71a   :  { %v3338_v12 = vsel %vm448_vm9, %v3274_v17, %v7291_v48  ;;  %v3082_v18 = vsel %vm440_vm8, %v3018_v32, %v7190_v14  ;;  %v9160_v17 = vld [vmem:[#allocation127_spill] sm:$0xff]  ;;  %v9163_v32 = vld [vmem:[#allocation86_spill] sm:$0xff] }
 0x71b   :  { %v2942_v57 = vsel %vm1335_vm10, %v9161_v39, %v9160_v17  ;;  %v3147_v27 = vsel %vm3128_vm1, %v3082_v18, %v7209_v11  ;;  %v9165_v18 = vld [vmem:[#allocation64_spill] sm:$0xff] }
 0x71c   :  { %2759 = vrot.lane.b32.xlu2 %v9153_v34, %s4495_s0  ;;  %v2976_v29 = vsel %vm72_vm5, %v2942_v57, %v7052_v58  ;;  %v9166_v57 = vld [vmem:[#allocation55_spill] sm:$0xff] }
 0x71e   :  { %2895 = vrot.lane.b32.xlu1 %v6907_v0, %s4484_s20  ;;  %v7367_v13 = vpop.permute.xlu2 %2484  ;;  %4207 = vmatmul.msk.f32.gmra.mxu1 %vm3395_vm4, %v3337_v54 }
 0x71f   :  { %2472 = vrot.lane.b32.xlu0 %v9153_v34, %s4481_s19 }
 0x720   :  { %v7377_v21 = vpop.permute.xlu1 %2847 }
 0x721   :  { %v2774_v47 = vpop.permute.xlu0 %2773 }
 0x724   :  { %2891 = vrot.lane.b32.xlu2 %v6982_v6, %s4484_s20 }
 0x726   :  { %2520 = vrot.lane.b32.xlu1 %v9158_v2, %s4481_s19  ;;  %v2563_v53 = vpop.permute.xlu2 %2562  ;;  %4208 = vmatmul.msk.f32.gmra.mxu1 %vm3395_vm4, %v3338_v12  ;;  %v3019_v12 = vsel %vm2999_vm0, %v2976_v29, %v7223_v38  ;;  %v9167_v29 = vld [vmem:[#allocation118_spill] sm:$0xff] }
 0x727   :  { %v3129_v51 = vsel %vm3128_vm1, %v3064_v26, %v2563_v53  ;;  %2574 = vrot.lane.b32.xlu0 %v6728_v40, %s4496_s1  ;;  %v3275_v40 = vsel %vm3257_vm2, %v3210_v8, %v7187_v24  ;;  %v9162_v26 = vld [vmem:[#allocation62_spill] sm:$0xff]  ;;  %v3083_v8 = vsel %vm440_vm8, %v3019_v12, %v7233_v44 }
 0x728   :  { %v7407_v34 = vpop.permute.xlu1 %2570  ;;  %v3193_v22 = vsel %vm1109_vm14, %v3129_v51, %v9145_v9  ;;  %v3339_v25 = vsel %vm448_vm9, %v3275_v40, %v7196_v31  ;;  %v3211_v58 = vsel %vm1109_vm14, %v3147_v27, %v9162_v26 }
 0x729   :  { %v3258_v54 = vsel %vm3257_vm2, %v3193_v22, %v7280_v15  ;;  %v2587_v5 = vpop.permute.xlu0 %2586  ;;  %v3276_v51 = vsel %vm3257_vm2, %v3211_v58, %v2772_v35  ;;  %v9164_v35 = vld [vmem:[#allocation39_spill] sm:$0xff] }
 0x72a   :  { %v3322_v56 = vsel %vm448_vm9, %v3258_v54, %v7291_v48  ;;  %v3148_v54 = vsel %vm3128_vm1, %v3083_v8, %v7246_v16 }
 0x72b   :  { %4192 = vmatmul.msk.f32.vlgmr.msra.gmra.mxu0 %vm3395_vm4, %v3322_v56  ;;  %v3212_v17 = vsel %vm1109_vm14, %v3148_v54, %v9165_v18 }
 0x72c   :  { %2516 = vrot.lane.b32.xlu2 %v9159_v33, %s4481_s19  ;;  %v3277_v12 = vsel %vm3257_vm2, %v3212_v17, %v2774_v47 }
 0x72e   :  { %2881 = vrot.lane.b32.xlu1 %v6887_v7, %s4484_s20  ;;  %v2463_v63 = vpop.permute.xlu2 %2462  ;;  %4209 = vmatmul.msk.f32.gmra.mxu1 %vm3395_vm4, %v3339_v25  ;;  %v3020_v25 = vsel %vm2999_vm0, %v7252_v41, %v9166_v57 }
 0x72f   :  { %2879 = vrot.lane.b32.xlu0 %v6946_v37, %s4484_s20  ;;  %v3340_v37 = vsel %vm448_vm9, %v3276_v51, %v7285_v55  ;;  %v3084_v58 = vsel %vm440_vm8, %v3020_v25, %v7367_v13 }
 0x730   :  { %v7436_v42 = vpop.permute.xlu1 %2470  ;;  %v3149_v8 = vsel %vm3128_vm1, %v3084_v58, %v2587_v5 }
 0x731   :  { %v2487_v53 = vpop.permute.xlu0 %2486  ;;  %v3213_v13 = vsel %vm1109_vm14, %v3149_v8, %v9145_v9 }
 0x732   :  { %v3278_v57 = vsel %vm3257_vm2, %v3213_v13, %v7280_v15  ;;  %v9177_v13 = vld [vmem:[#allocation100_spill] sm:$0xff] }
 0x734   :  { %2492 = vrot.lane.b32.xlu2 %v6512_v46, %s4481_s19  ;;  %v3001_v46 = vsel %vm2999_vm0, %v7173_v19, %v9164_v35  ;;  %v9170_v35 = vld [vmem:[#allocation6_spill] sm:$0xff] }
 0x735   :  { %v3065_v55 = vsel %vm440_vm8, %v3001_v46, %v2463_v63  ;;  %v3021_v46 = vsel %vm2999_vm0, %v7173_v19, %v9170_v35 }
 0x736   :  { %2793 = vrot.lane.b32.xlu1 %v9163_v32, %s4495_s0  ;;  %v7451_v22 = vpop.permute.xlu2 %2775  ;;  %4210 = vmatmul.msk.f32.gmra.mxu1 %vm3395_vm4, %v3340_v37  ;;  %v9169_v37 = vld [vmem:[#allocation76_spill] sm:$0xff] }
 0x737   :  { %2504 = vrot.lane.b32.xlu0 %v9147_v20, %s4481_s19  ;;  %v9168_v20 = vld [vmem:[#allocation20_spill] sm:$0xff] }
 0x738   :  { %v7461_v56 = vpop.permute.xlu1 %2779  ;;  %v2933_v27 = vsel %vm1335_vm10, %v9168_v20, %v9167_v29 }
 0x739   :  { %v2565_v40 = vpop.permute.xlu0 %2564  ;;  %v2967_v63 = vsel %vm72_vm5, %v2933_v27, %v7016_v50  ;;  %v3341_v50 = vsel %vm448_vm9, %v3277_v12, %v7312_v1  ;;  %v9173_v27 = vld [vmem:[#allocation88_spill] sm:$0xff] }
 0x73a   :  { %v3130_v39 = vsel %vm3128_vm1, %v3065_v55, %v2565_v40  ;;  %v9171_v55 = vld [vmem:[#allocation120_spill] sm:$0xff]  ;;  %v9172_v40 = vld [vmem:[#allocation19_spill] sm:$0xff] }
 0x73b   :  { %v3194_v26 = vsel %vm1109_vm14, %v3130_v39, %v9138_v30  ;;  %v2934_v1 = vsel %vm1335_vm10, %v9172_v40, %v9171_v55  ;;  %v3085_v39 = vsel %vm440_vm8, %v3021_v46, %v2487_v53  ;;  %v3342_v53 = vsel %vm448_vm9, %v3278_v57, %v7291_v48  ;;  %v9174_v12 = vld [vmem:[#allocation24_spill] sm:$0xff]  ;;  %v9178_v40 = vld [vmem:[#allocation129_spill] sm:$0xff] }
 0x73c   :  { %2518 = vrot.lane.b32.xlu2 %v9144_v49, %s4481_s19  ;;  %v3259_v51 = vsel %vm3257_vm2, %v3194_v26, %v7187_v24  ;;  %v3002_v49 = vsel %vm2999_vm0, %v2967_v63, %v7180_v23  ;;  %v3150_v29 = vsel %vm3128_vm1, %v3085_v39, %v7351_v62  ;;  %v9175_v63 = vld [vmem:[#allocation89_spill] sm:$0xff] }
 0x73d   :  { %v3323_v47 = vsel %vm448_vm9, %v3259_v51, %v7196_v31  ;;  %v3066_v17 = vsel %vm440_vm8, %v3002_v49, %v7190_v14  ;;  %v3214_v8 = vsel %vm1109_vm14, %v3150_v29, %v9138_v30  ;;  %v9176_v49 = vld [vmem:[#allocation114_spill] sm:$0xff] }
 0x73e   :  { %2498 = vrot.lane.b32.xlu1 %v9169_v37, %s4481_s19  ;;  %v2756_v54 = vpop.permute.xlu2 %2755  ;;  %4193 = vmatmul.msk.f32.gmra.mxu0 %vm3395_vm4, %v3323_v47  ;;  %v3131_v20 = vsel %vm3128_vm1, %v3066_v17, %v7209_v11 }
 0x73f   :  { %4211 = vmatmul.msk.f32.gmra.mxu1 %vm3395_vm4, %v3341_v50  ;;  %2803 = vrot.lane.b32.xlu0 %v9158_v2, %s4495_s0  ;;  %v2968_v2 = vsel %vm72_vm5, %v2934_v1, %v7022_v28  ;;  %v3195_v58 = vsel %vm1109_vm14, %v3131_v20, %v9175_v63  ;;  %v9179_v1 = vld [vmem:[#allocation30_spill] sm:$0xff] }
 0x740   :  { %v7499_v5 = vpop.permute.xlu1 %2849  ;;  %v3003_v25 = vsel %vm2999_vm0, %v2968_v2, %v7223_v38  ;;  %v2944_v17 = vsel %vm1335_vm10, %v9179_v1, %v9178_v40 }
 0x741   :  { %v2866_v18 = vpop.permute.xlu0 %2865  ;;  %v3067_v62 = vsel %vm440_vm8, %v3003_v25, %v7233_v44  ;;  %v2978_v39 = vsel %vm72_vm5, %v2944_v17, %v7044_v45  ;;  %v9187_v17 = vld [vmem:[#allocation78_spill] sm:$0xff] }
 0x742   :  { %v3132_v50 = vsel %vm3128_vm1, %v3067_v62, %v7246_v16 }
 0x743   :  { %v3196_v35 = vsel %vm1109_vm14, %v3132_v50, %v9177_v13 }
 0x744   :  { %2620 = vrot.lane.b32.xlu2 %v6982_v6, %s4496_s1  ;;  %v2943_v6 = vsel %vm1335_vm10, %v9174_v12, %v6871_v10  ;;  %v3260_v10 = vsel %vm3257_vm2, %v3195_v58, %v2756_v54  ;;  %v9181_v12 = vld [vmem:[#allocation84_spill] sm:$0xff] }
 0x745   :  { %v2977_v26 = vsel %vm72_vm5, %v2943_v6, %v7058_v52  ;;  %v3279_v52 = vsel %vm3257_vm2, %v3214_v8, %v7187_v24  ;;  %v9182_v58 = vld [vmem:[#allocation52_spill] sm:$0xff] }
 0x746   :  { %2508 = vrot.lane.b32.xlu1 %v9173_v27, %s4481_s19  ;;  %v2778_v28 = vpop.permute.xlu2 %2777  ;;  %v3343_v55 = vsel %vm448_vm9, %v3279_v52, %v7196_v31 }
 0x747   :  { %4212 = vmatmul.msk.f32.gmra.mxu1 %vm3395_vm4, %v3342_v53  ;;  %2506 = vrot.lane.b32.xlu0 %v9143_v60, %s4481_s19  ;;  %v3022_v60 = vsel %vm2999_vm0, %v2977_v26, %v7180_v23  ;;  %v3023_v53 = vsel %vm2999_vm0, %v2978_v39, %v7223_v38  ;;  %v9188_v39 = vld [vmem:[#allocation42_spill] sm:$0xff] }
 0x748   :  { %v7538_v51 = vpop.permute.xlu1 %2781  ;;  %v3086_v54 = vsel %vm440_vm8, %v3022_v60, %v7190_v14  ;;  %v3087_v62 = vsel %vm440_vm8, %v3023_v53, %v7233_v44  ;;  %v9184_v60 = vld [vmem:[#allocation96_spill] sm:$0xff] }
 0x749   :  { %v2846_v47 = vpop.permute.xlu0 %2845  ;;  %v3151_v25 = vsel %vm3128_vm1, %v3086_v54, %v7209_v11  ;;  %v3152_v8 = vsel %vm3128_vm1, %v3087_v62, %v7246_v16  ;;  %v9185_v54 = vld [vmem:[#allocation124_spill] sm:$0xff] }
 0x74a   :  { %v3324_v37 = vsel %vm448_vm9, %v3260_v10, %v2846_v47  ;;  %v3215_v6 = vsel %vm1109_vm14, %v3151_v25, %v9181_v12  ;;  %v9183_v47 = vld [vmem:[#allocation94_spill] sm:$0xff]  ;;  %v3005_v25 = vsel %vm2999_vm0, %v7173_v19, %v9188_v39 }
 0x74b   :  { %4194 = vmatmul.msk.f32.gmra.mxu0 %vm3395_vm4, %v3324_v37  ;;  %v3280_v45 = vsel %vm3257_vm2, %v3215_v6, %v7451_v22  ;;  %v3024_v22 = vsel %vm2999_vm0, %v7252_v41, %v9182_v58 }
 0x74c   :  { %2596 = vrot.lane.b32.xlu2 %v6901_v43, %s4496_s1  ;;  %v9180_v43 = vld [vmem:[#allocation97_spill] sm:$0xff]  ;;  %v3344_v26 = vsel %vm448_vm9, %v3280_v45, %v2866_v18  ;;  %v3216_v18 = vsel %vm1109_vm14, %v3152_v8, %v9183_v47  ;;  %v9192_v8 = vld [vmem:[#allocation119_spill] sm:$0xff] }
 0x74d   :  { %v9190_v45 = vld [vmem:[#allocation29_spill] sm:$0xff] }
 0x74e   :  { %2807 = vrot.lane.b32.xlu1 %v9176_v49, %s4495_s0  ;;  %v2758_v46 = vpop.permute.xlu2 %2757  ;;  %v2945_v62 = vsel %vm1335_vm10, %v9190_v45, %v6884_v36  ;;  %v9193_v36 = vld [vmem:[#allocation23_spill] sm:$0xff] }
 0x74f   :  { %v3261_v2 = vsel %vm3257_vm2, %v3196_v35, %v2758_v46  ;;  %4213 = vmatmul.msk.f32.gmra.mxu1 %vm3395_vm4, %v3343_v55  ;;  %2805 = vrot.lane.b32.xlu0 %v9180_v43, %s4495_s0  ;;  %v9186_v35 = vld [vmem:[#allocation54_spill] sm:$0xff]  ;;  %v2979_v58 = vsel %vm72_vm5, %v2945_v62, %v7064_v61 }
 0x750   :  { %v7570_v57 = vpop.permute.xlu1 %2871  ;;  %v3325_v20 = vsel %vm448_vm9, %v3261_v2, %v7377_v21  ;;  %v3026_v61 = vsel %vm2999_vm0, %v2979_v58, %v7180_v23 }
 0x751   :  { %v2868_v29 = vpop.permute.xlu0 %2867 }
 0x753   :  { %4195 = vmatmul.msk.f32.gmra.mxu0 %vm3395_vm4, %v3325_v20  ;;  %v3069_v20 = vsel %vm440_vm8, %v3005_v25, %v7436_v42  ;;  %v9191_v42 = vld [vmem:[#allocation58_spill] sm:$0xff] }
 0x754   :  { %2893 = vrot.lane.b32.xlu2 %v6935_v59, %s4484_s20 }
 0x756   :  { %2510 = vrot.lane.b32.xlu1 %v9163_v32, %s4481_s19  ;;  %v2591_v21 = vpop.permute.xlu2 %2590 }
 0x757   :  { %4214 = vmatmul.msk.f32.gmra.mxu1 %vm3395_vm4, %v3344_v26  ;;  %2622 = vrot.lane.b32.xlu0 %v6935_v59, %s4496_s1  ;;  %v3281_v59 = vsel %vm3257_vm2, %v3216_v18, %v2778_v28  ;;  %v3004_v28 = vsel %vm2999_vm0, %v7252_v41, %v9186_v35  ;;  %v3025_v26 = vsel %vm2999_vm0, %v7173_v19, %v9191_v42  ;;  %v9202_v42 = vld [vmem:[#allocation34_spill] sm:$0xff] }
 0x758   :  { %v7593_v63 = vpop.permute.xlu1 %2618  ;;  %v3345_v52 = vsel %vm448_vm9, %v3281_v59, %v2868_v29  ;;  %v3090_v35 = vsel %vm440_vm8, %v3026_v61, %v7190_v14  ;;  %v9205_v61 = vld [vmem:[#allocation128_spill] sm:$0xff] }
 0x759   :  { %v2489_v10 = vpop.permute.xlu0 %2488  ;;  %v3155_v45 = vsel %vm3128_vm1, %v3090_v35, %v7209_v11  ;;  %v9207_v35 = vld [vmem:[#allocation121_spill] sm:$0xff] }
 0x75a   :  { %v3088_v32 = vsel %vm440_vm8, %v3024_v22, %v2489_v10  ;;  %v2935_v10 = vsel %vm1335_vm10, %v9193_v36, %v9192_v8  ;;  %v9203_v36 = vld [vmem:[#allocation161_spill] sm:$0xff] }
 0x75b   :  { %v3153_v37 = vsel %vm3128_vm1, %v3088_v32, %v2591_v21  ;;  %v2969_v18 = vsel %vm72_vm5, %v2935_v10, %v7008_v3 }
 0x75c   :  { %2791 = vrot.lane.b32.xlu2 %v9173_v27, %s4495_s0  ;;  %v3217_v27 = vsel %vm1109_vm14, %v3153_v37, %v9145_v9  ;;  %v3006_v3 = vsel %vm2999_vm0, %v2969_v18, %v7180_v23 }
 0x75d   :  { %v3282_v1 = vsel %vm3257_vm2, %v3217_v27, %v7280_v15  ;;  %v3070_v25 = vsel %vm440_vm8, %v3006_v3, %v7190_v14 }
 0x75e   :  { %2783 = vrot.lane.b32.xlu1 %v9184_v60, %s4495_s0  ;;  %v2491_v50 = vpop.permute.xlu2 %2490  ;;  %v3346_v12 = vsel %vm448_vm9, %v3282_v1, %v7291_v48  ;;  %v9197_v1 = vld [vmem:[#allocation126_spill] sm:$0xff]  ;;  %v3135_v58 = vsel %vm3128_vm1, %v3070_v25, %v7209_v11 }
 0x75f   :  { %4215 = vmatmul.msk.f32.gmra.mxu1 %vm3395_vm4, %v3345_v52  ;;  %2598 = vrot.lane.b32.xlu0 %v9185_v54, %s4496_s1  ;;  %v3089_v32 = vsel %vm440_vm8, %v3025_v26, %v2491_v50  ;;  %v9208_v25 = vld [vmem:[#allocation122_spill] sm:$0xff] }
 0x760   :  { %v7613_v13 = vpop.permute.xlu1 %2761 }
 0x761   :  { %v2469_v46 = vpop.permute.xlu0 %2468 }
 0x762   :  { %v3068_v55 = vsel %vm440_vm8, %v3004_v28, %v2469_v46  ;;  %v9194_v28 = vld [vmem:[#allocation83_spill] sm:$0xff] }
 0x763   :  { %v3133_v40 = vsel %vm3128_vm1, %v3068_v55, %v7407_v34  ;;  %v9189_v34 = vld [vmem:[#allocation104_spill] sm:$0xff]  ;;  %v9196_v55 = vld [vmem:[#allocation25_spill] sm:$0xff] }
 0x764   :  { %2496 = vrot.lane.b32.xlu2 %v9187_v17, %s4481_s19  ;;  %v3197_v2 = vsel %vm1109_vm14, %v3133_v40, %v9145_v9 }
 0x765   :  { %v3262_v29 = vsel %vm3257_vm2, %v3197_v2, %v7280_v15  ;;  %v9198_v2 = vld [vmem:[#allocation57_spill] sm:$0xff] }
 0x766   :  { %2809 = vrot.lane.b32.xlu1 %v9189_v34, %s4495_s0  ;;  %v2573_v53 = vpop.permute.xlu2 %2572  ;;  %v3326_v6 = vsel %vm448_vm9, %v3262_v29, %v7291_v48  ;;  %v2958_v39 = vsel %vm1335_vm10, %v9198_v2, %v6978_v4  ;;  %v9199_v29 = vld [vmem:[#allocation157_spill] sm:$0xff] }
 0x767   :  { %v3134_v21 = vsel %vm3128_vm1, %v3069_v20, %v2573_v53  ;;  %4216 = vmatmul.msk.f32.gmra.mxu1 %vm3395_vm4, %v3346_v12  ;;  %2522 = vrot.lane.b32.xlu0 %v9180_v43, %s4481_s19  ;;  %v9200_v12 = vld [vmem:[#allocation169_spill] sm:$0xff] }
 0x768   :  { %v7654_v22 = vpop.permute.xlu1 %2594  ;;  %4196 = vmatmul.msk.f32.gmra.mxu0 %vm3395_vm4, %v3326_v6  ;;  %v3198_v43 = vsel %vm1109_vm14, %v3134_v21, %v9138_v30  ;;  %v2992_v6 = vsel %vm72_vm5, %v2958_v39, %v9200_v12  ;;  %v9201_v21 = vld [vmem:[#allocation138_spill] sm:$0xff] }
 0x769   :  { %v2593_v47 = vpop.permute.xlu0 %2592  ;;  %v3263_v54 = vsel %vm3257_vm2, %v3198_v43, %v7187_v24  ;;  %v2951_v4 = vsel %vm1335_vm10, %v9202_v42, %v9201_v21  ;;  %v9204_v43 = vld [vmem:[#allocation72_spill] sm:$0xff]  ;;  %v9212_v42 = vld [vmem:[#allocation137_spill] sm:$0xff] }
 0x76a   :  { %v3154_v59 = vsel %vm3128_vm1, %v3089_v32, %v2593_v47  ;;  %v3327_v17 = vsel %vm448_vm9, %v3263_v54, %v7196_v31  ;;  %v2985_v10 = vsel %vm72_vm5, %v2951_v4, %v9203_v36  ;;  %v3051_v32 = vsel %vm2999_vm0, %v2992_v6, %v7223_v38  ;;  %v9210_v6 = vld [vmem:[#allocation154_spill] sm:$0xff] }
 0x76b   :  { %v3218_v37 = vsel %vm1109_vm14, %v3154_v59, %v9138_v30  ;;  %v7670_v52 = vpop.f32.mrf.mxu1  ;;  %v3219_v47 = vsel %vm1109_vm14, %v3155_v45, %v9204_v43  ;;  %v9211_v45 = vld [vmem:[#allocation80_spill] sm:$0xff] }
 0x76c   :  { %2624 = vrot.lane.b32.xlu2 %v6907_v0, %s4496_s1  ;;  %v3283_v50 = vsel %vm3257_vm2, %v3218_v37, %v7187_v24  ;;  %v9195_v0 = vld [vmem:[#allocation132_spill] sm:$0xff]  ;;  %v3284_v18 = vsel %vm3257_vm2, %v3219_v47, %v7461_v56  ;;  %v9206_v37 = vld [vmem:[#allocation75_spill] sm:$0xff] }
 0x76d   :  { %v3347_v27 = vsel %vm448_vm9, %v3283_v50, %v7196_v31  ;;  %v2946_v40 = vsel %vm1335_vm10, %v9196_v55, %v9195_v0  ;;  %v3199_v50 = vsel %vm1109_vm14, %v3135_v58, %v9206_v37 }
 0x76e   :  { %2785 = vrot.lane.b32.xlu1 %v9194_v28, %s4495_s0  ;;  %v2870_v46 = vpop.permute.xlu2 %2869  ;;  %v2980_v20 = vsel %vm72_vm5, %v2946_v40, %v9199_v29  ;;  %v9209_v29 = vld [vmem:[#allocation22_spill] sm:$0xff] }
 0x76f   :  { %4217 = vmatmul.msk.f32.gmra.mxu1 %vm3395_vm4, %v3347_v27  ;;  %2883 = vrot.lane.b32.xlu0 %v9197_v1, %s4484_s20  ;;  %v3027_v26 = vsel %vm2999_vm0, %v2980_v20, %v7223_v38  ;;  %v3348_v3 = vsel %vm448_vm9, %v3284_v18, %v2870_v46  ;;  %v3038_v27 = vsel %vm2999_vm0, %v2985_v10, %v7180_v23 }
 0x770   :  { %v7701_v53 = vpop.permute.xlu1 %2789  ;;  %4197 = vmatmul.msk.f32.gmra.mxu0 %vm3395_vm4, %v3327_v17  ;;  %v3091_v59 = vsel %vm440_vm8, %v3027_v26, %v7233_v44  ;;  %v3102_v17 = vsel %vm440_vm8, %v3038_v27, %v7190_v14  ;;  %v2936_v20 = vsel %vm1335_vm10, %v9209_v29, %v9208_v25  ;;  %v9213_v26 = vld [vmem:[#allocation105_spill] sm:$0xff] }
 0x771   :  { %v2802_v62 = vpop.permute.xlu0 %2801  ;;  %v3156_v46 = vsel %vm3128_vm1, %v3091_v59, %v7246_v16  ;;  %v3167_v36 = vsel %vm3128_vm1, %v3102_v17, %v7209_v11  ;;  %v9215_v59 = vld [vmem:[#allocation85_spill] sm:$0xff]  ;;  %v9218_v17 = vld [vmem:[#allocation70_spill] sm:$0xff] }
 0x772   :  { %v3220_v21 = vsel %vm1109_vm14, %v3156_v46, %v9211_v45 }
 0x773   :  { %v7715_v8 = vpop.f32.mrf.mxu1  ;;  %v3285_v4 = vsel %vm3257_vm2, %v3220_v21, %v7538_v51 }
 0x774   :  { %2610 = vrot.lane.b32.xlu2 %v6887_v7, %s4496_s1  ;;  %v3115_v7 = vsel %vm440_vm8, %v3051_v32, %v7233_v44  ;;  %v9214_v32 = vld [vmem:[#allocation151_spill] sm:$0xff]  ;;  %v3349_v47 = vsel %vm448_vm9, %v3285_v4, %v7570_v57 }
 0x775   :  { %v3180_v39 = vsel %vm3128_vm1, %v3115_v7, %v7246_v16  ;;  %v9216_v7 = vld [vmem:[#allocation142_spill] sm:$0xff] }
 0x776   :  { %2875 = vrot.lane.b32.xlu1 %v9205_v61, %s4484_s20  ;;  %v2760_v54 = vpop.permute.xlu2 %2759  ;;  %v3244_v58 = vsel %vm1109_vm14, %v3180_v39, %v9213_v26 }
 0x777   :  { %v3264_v56 = vsel %vm3257_vm2, %v3199_v50, %v2760_v54  ;;  %4218 = vmatmul.msk.f32.gmra.mxu1 %vm3395_vm4, %v3348_v3  ;;  %2600 = vrot.lane.b32.xlu0 %v9207_v35, %s4496_s1  ;;  %v3309_v10 = vsel %vm3257_vm2, %v3244_v58, %v2802_v62  ;;  %v3231_v62 = vsel %vm1109_vm14, %v3167_v36, %v9215_v59  ;;  %v9217_v35 = vld [vmem:[#allocation67_spill] sm:$0xff] }
 0x778   :  { %v7742_v0 = vpop.permute.xlu1 %2494  ;;  %v3328_v55 = vsel %vm448_vm9, %v3264_v56, %v7499_v5  ;;  %v2970_v5 = vsel %vm72_vm5, %v2936_v20, %v9210_v6  ;;  %v9220_v58 = vld [vmem:[#allocation107_spill] sm:$0xff] }
 0x779   :  { %4198 = vmatmul.msk.f32.gmra.mxu0 %vm3395_vm4, %v3328_v55  ;;  %v2788_v40 = vpop.permute.xlu0 %2787  ;;  %v3007_v18 = vsel %vm2999_vm0, %v2970_v5, %v7223_v38  ;;  %v3052_v55 = vsel %vm2999_vm0, %v7252_v41, %v9217_v35 }
 0x77a   :  { %v3296_v50 = vsel %vm3257_vm2, %v3231_v62, %v2788_v40  ;;  %v3071_v54 = vsel %vm440_vm8, %v3007_v18, %v7233_v44  ;;  %v9223_v62 = vld [vmem:[#allocation163_spill] sm:$0xff] }
 0x77b   :  { %v7756_v12 = vpop.f32.mrf.mxu1  ;;  %v3136_v56 = vsel %vm3128_vm1, %v3071_v54, %v7246_v16 }
 0x77c   :  { %2873 = vrot.lane.b32.xlu2 %v9212_v42, %s4484_s20  ;;  %v3200_v39 = vsel %vm1109_vm14, %v3136_v56, %v9218_v17  ;;  %v9226_v56 = vld [vmem:[#allocation46_spill] sm:$0xff] }
 0x77d   :  { %v3265_v20 = vsel %vm3257_vm2, %v3200_v39, %v7613_v13  ;;  %v3008_v35 = vsel %vm2999_vm0, %v7252_v41, %v9226_v56  ;;  %v7867_v39 = vld [vmem:[%s8844_s12] ss:$0 sm:$0xff] }
 0x77e   :  { %2626 = vrot.lane.b32.xlu1 %v9214_v32, %s4496_s1  ;;  %v2892_v43 = vpop.permute.xlu2 %2891 }
 0x77f   :  { %v3373_v51 = vsel %vm448_vm9, %v3309_v10, %v2892_v43  ;;  %4219 = vmatmul.msk.f32.gmra.mxu1 %vm3395_vm4, %v3349_v47  ;;  %2897 = vrot.lane.b32.xlu0 %v9214_v32, %s4484_s20  ;;  %v9221_v47 = vld [vmem:[#allocation140_spill] sm:$0xff] }
 0x780   :  { %v7783_v37 = vpop.permute.xlu1 %2606  ;;  %4243 = vmatmul.msk.f32.vlgmr.msra.gmra.mxu3 %vm3395_vm4, %v3373_v51 }
 0x781   :  { %v2878_v57 = vpop.permute.xlu0 %2877 }
 0x782   :  { %v3360_v3 = vsel %vm448_vm9, %v3296_v50, %v2878_v57  ;;  %v9225_v57 = vld [vmem:[#allocation134_spill] sm:$0xff] }
 0x783   :  { %v7790_v27 = vpop.f32.mrf.mxu1  ;;  %4230 = vmatmul.msk.f32.vlgmr.msra.gmra.mxu2 %vm3395_vm4, %v3360_v3 }
 0x784   :  { %2899 = vrot.lane.b32.xlu2 %v9216_v7, %s4484_s20 }
 0x786   :  { %2602 = vrot.lane.b32.xlu1 %v9212_v42, %s4496_s1  ;;  %v2517_v46 = vpop.permute.xlu2 %2516 }
 0x787   :  { %v3116_v40 = vsel %vm440_vm8, %v3052_v55, %v2517_v46  ;;  %2612 = vrot.lane.b32.xlu0 %v9197_v1, %s4496_s1 }
 0x788   :  { %v7807_v25 = vpop.permute.xlu1 %2608  ;;  %v3181_v29 = vsel %vm3128_vm1, %v3116_v40, %v7593_v63  ;;  %v9219_v63 = vld [vmem:[#allocation66_spill] sm:$0xff] }
 0x789   :  { %v3245_v6 = vsel %vm1109_vm14, %v3181_v29, %v9145_v9  ;;  %v2852_v5 = vpop.permute.xlu0 %2851  ;;  %v3028_v13 = vsel %vm2999_vm0, %v7252_v41, %v9219_v63 }
 0x78a   :  { %v3310_v45 = vsel %vm3257_vm2, %v3245_v6, %v7280_v15  ;;  %v3329_v1 = vsel %vm448_vm9, %v3265_v20, %v2852_v5  ;;  %v9227_v6 = vld [vmem:[#allocation93_spill] sm:$0xff] }
 0x78b   :  { %v3374_v21 = vsel %vm448_vm9, %v3310_v45, %v7291_v48  ;;  %4199 = vmatmul.msk.f32.gmra.mxu0 %vm3395_vm4, %v3329_v1  ;;  %v3647_v42 = vpop.f32.mrf.mxu1  ;;  %v9228_v1 = vld [vmem:[#allocation73_spill] sm:$0xff] }
 0x78c   :  { %2524 = vrot.lane.b32.xlu2 %v9176_v49, %s4481_s19  ;;  %4244 = vmatmul.msk.f32.gmra.mxu3 %vm3395_vm4, %v3374_v21  ;;  %v3053_v21 = vsel %vm2999_vm0, %v7173_v19, %v9228_v1  ;;  %v3648_v56 = vadd.f32 %v7867_v39, %v3647_v42  ;;  %v3645_v42 = vadd.f32 %v7867_v39, %v7790_v27 }
 0x78d   :  { %v3642_v27 = vadd.f32 %v7867_v39, %v7756_v12 }
 0x78e   :  { %2526 = vrot.lane.b32.xlu1 %v9189_v34, %s4481_s19  ;;  %v2493_v4 = vpop.permute.xlu2 %2492  ;;  %v9222_v34 = vld [vmem:[#allocation31_spill] sm:$0xff] }
 0x78f   :  { %v3092_v26 = vsel %vm440_vm8, %v3028_v13, %v2493_v4  ;;  %2795 = vrot.lane.b32.xlu0 %v9220_v58, %s4495_s0  ;;  %v2952_v18 = vsel %vm1335_vm10, %v9222_v34, %v9221_v47  ;;  %v9231_v34 = vld [vmem:[#allocation155_spill] sm:$0xff] }
 0x790   :  { %v7832_v36 = vpop.permute.xlu1 %2895  ;;  %v3157_v49 = vsel %vm3128_vm1, %v3092_v26, %v7654_v22  ;;  %v2986_v50 = vsel %vm72_vm5, %v2952_v18, %v9223_v62  ;;  %v9224_v22 = vld [vmem:[#allocation145_spill] sm:$0xff] }
 0x791   :  { %v3221_v10 = vsel %vm1109_vm14, %v3157_v49, %v9145_v9  ;;  %v2473_v32 = vpop.permute.xlu0 %2472  ;;  %v3039_v3 = vsel %vm2999_vm0, %v2986_v50, %v7223_v38  ;;  %v9229_v49 = vld [vmem:[#allocation131_spill] sm:$0xff] }
 0x792   :  { %v3286_v43 = vsel %vm3257_vm2, %v3221_v10, %v7280_v15  ;;  %v3072_v46 = vsel %vm440_vm8, %v3008_v35, %v2473_v32  ;;  %v3103_v17 = vsel %vm440_vm8, %v3039_v3, %v7233_v44  ;;  %v9230_v10 = vld [vmem:[#allocation33_spill] sm:$0xff] }
 0x793   :  { %v3350_v51 = vsel %vm448_vm9, %v3286_v43, %v7291_v48  ;;  %v3650_v59 = vpop.f32.mrf.mxu1  ;;  %v3168_v63 = vsel %vm3128_vm1, %v3103_v17, %v7246_v16  ;;  %v2947_v32 = vsel %vm1335_vm10, %v9230_v10, %v9229_v49  ;;  %v3639_v10 = vadd.f32 %v7867_v39, %v7715_v8 }
 0x794   :  { %2885 = vrot.lane.b32.xlu2 %v9224_v22, %s4484_s20  ;;  %4220 = vmatmul.msk.f32.gmra.mxu1 %vm3395_vm4, %v3350_v51  ;;  %v3651_v43 = vadd.f32 %v7867_v39, %v3650_v59  ;;  %v2981_v18 = vsel %vm72_vm5, %v2947_v32, %v9231_v34  ;;  %v9232_v51 = vld [vmem:[#allocation108_spill] sm:$0xff]  ;;  %v9240_v32 = vld [vmem:[#allocation71_spill] sm:$0xff]  ;;  %v3636_v8 = vadd.f32 %v7867_v39, %v7670_v52 }
 0x796   :  { %2887 = vrot.lane.b32.xlu1 %v9225_v57, %s4484_s20  ;;  %v2519_v54 = vpop.permute.xlu2 %2518 }
 0x797   :  { %2500 = vrot.lane.b32.xlu0 %v9184_v60, %s4481_s19  ;;  %v3117_v4 = vsel %vm440_vm8, %v3053_v21, %v2519_v54  ;;  %v9237_v21 = vld [vmem:[#allocation133_spill] sm:$0xff] }
 0x798   :  { %v7859_v55 = vpop.permute.xlu1 %2520 }
 0x799   :  { %v2575_v40 = vpop.permute.xlu0 %2574 }
 0x79a   :  { %v3137_v29 = vsel %vm3128_vm1, %v3072_v46, %v2575_v40  ;;  %v3030_v46 = vsel %vm2999_vm0, %v2981_v18, %v7180_v23  ;;  %v9234_v40 = vld [vmem:[#allocation37_spill] sm:$0xff] }
 0x79b   :  { %v3201_v60 = vsel %vm1109_vm14, %v3137_v29, %v9145_v9  ;;  %v3653_v20 = vpop.f32.mrf.mxu1  ;;  %v9235_v29 = vld [vmem:[#allocation56_spill] sm:$0xff] }
 0x79c   :  { %2797 = vrot.lane.b32.xlu2 %v9227_v6, %s4495_s0  ;;  %v3266_v5 = vsel %vm3257_vm2, %v3201_v60, %v7280_v15  ;;  %v3654_v45 = vadd.f32 %v7867_v39, %v3653_v20  ;;  %v3029_v60 = vsel %vm2999_vm0, %v7173_v19, %v9235_v29  ;;  %v9236_v20 = vld [vmem:[#allocation165_spill] sm:$0xff] }
 0x79d   :  { %v3330_v13 = vsel %vm448_vm9, %v3266_v5, %v7291_v48  ;;  %v3093_v1 = vsel %vm440_vm8, %v3029_v60, %v7742_v0 }
 0x79e   :  { %2604 = vrot.lane.b32.xlu1 %v9205_v61, %s4496_s1  ;;  %v2621_v26 = vpop.permute.xlu2 %2620  ;;  %4200 = vmatmul.msk.f32.gmra.mxu0 %vm3395_vm4, %v3330_v13  ;;  %v3232_v61 = vsel %vm1109_vm14, %v3168_v63, %v9232_v51  ;;  %v9238_v63 = vld [vmem:[#allocation32_spill] sm:$0xff] }
 0x79f   :  { %v3182_v47 = vsel %vm3128_vm1, %v3117_v4, %v2621_v26  ;;  %4329 = vmatpush.lsf.msrb.mxu3 %v3654_v45  ;;  %2628 = vrot.lane.b32.xlu0 %v9216_v7, %s4496_s1  ;;  %v3297_v59 = vsel %vm3257_vm2, %v3232_v61, %v7701_v53  ;;  %v9233_v53 = vld [vmem:[#allocation147_spill] sm:$0xff]  ;;  %v3094_v45 = vsel %vm440_vm8, %v3030_v46, %v7190_v14  ;;  %v9239_v26 = vld [vmem:[#allocation158_spill] sm:$0xff] }
 0x7a0   :  { %v7899_v62 = vpop.permute.xlu1 %2881  ;;  %v3246_v50 = vsel %vm1109_vm14, %v3182_v47, %v9138_v30  ;;  %v2959_v17 = vsel %vm1335_vm10, %v9234_v40, %v9233_v53  ;;  %v2948_v13 = vsel %vm1335_vm10, %v9238_v63, %v9237_v21  ;;  %v3159_v34 = vsel %vm3128_vm1, %v3094_v45, %v7209_v11  ;;  %v9243_v45 = vld [vmem:[#allocation38_spill] sm:$0xff]  ;;  %v9244_v21 = vld [vmem:[#allocation139_spill] sm:$0xff]  ;;  %v9245_v63 = vld [vmem:[#allocation36_spill] sm:$0xff] }
 0x7a1   :  { %v3311_v54 = vsel %vm3257_vm2, %v3246_v50, %v7187_v24  ;;  %4330 = vmatpush.lsf.msrb.mxu3 %v3651_v43  ;;  %v2880_v3 = vpop.permute.xlu0 %2879  ;;  %v2993_v5 = vsel %vm72_vm5, %v2959_v17, %v9236_v20  ;;  %v2982_v0 = vsel %vm72_vm5, %v2948_v13, %v9239_v26  ;;  %v3040_v43 = vsel %vm2999_vm0, %v7252_v41, %v9240_v32 }
 0x7a2   :  { %v3375_v7 = vsel %vm448_vm9, %v3311_v54, %v7196_v31  ;;  %v3361_v35 = vsel %vm448_vm9, %v3297_v59, %v2880_v3  ;;  %v3031_v50 = vsel %vm2999_vm0, %v2982_v0, %v7223_v38  ;;  %v3223_v3 = vsel %vm1109_vm14, %v3159_v34, %v9145_v9  ;;  %v9247_v0 = vld [vmem:[#allocation159_spill] sm:$0xff] }
 0x7a3   :  { %4245 = vmatmul.msk.f32.gmra.mxu3 %vm3395_vm4, %v3375_v7  ;;  %4231 = vmatmul.msk.f32.gmra.mxu2 %vm3395_vm4, %v3361_v35  ;;  %v7958_v18 = vpop.f32.mrf.mxu1  ;;  %v3288_v46 = vsel %vm3257_vm2, %v3223_v3, %v7280_v15  ;;  %v2953_v13 = vsel %vm1335_vm10, %v9245_v63, %v9244_v21 }
 0x7a4   :  { %2502 = vrot.lane.b32.xlu2 %v9194_v28, %s4481_s19  ;;  %4331 = vmatpush.lsf.msrb.mxu3 %v3648_v56  ;;  %v3095_v56 = vsel %vm440_vm8, %v3031_v50, %v7233_v44  ;;  %v3352_v60 = vsel %vm448_vm9, %v3288_v46, %v7291_v48  ;;  %v9250_v46 = vld [vmem:[#allocation82_spill] sm:$0xff] }
 0x7a5   :  { %v3160_v29 = vsel %vm3128_vm1, %v3095_v56, %v7246_v16 }
 0x7a6   :  { %2412 = vrot.lane.b32.xlu1 %v9198_v2, %s4494_s26  ;;  %v2597_v28 = vpop.permute.xlu2 %2596  ;;  %4332 = vmatpush.lsf.msrb.mxu3 %v3645_v42  ;;  %v3054_v2 = vsel %vm2999_vm0, %v2993_v5, %v7180_v23  ;;  %v9241_v42 = vld [vmem:[#allocation77_spill] sm:$0xff]  ;;  %v9242_v5 = vld [vmem:[#allocation148_spill] sm:$0xff] }
 0x7a7   :  { %v3158_v4 = vsel %vm3128_vm1, %v3093_v1, %v2597_v28  ;;  %2614 = vrot.lane.b32.xlu0 %v9224_v22, %s4496_s1  ;;  %v3118_v59 = vsel %vm440_vm8, %v3054_v2, %v7190_v14  ;;  %v2960_v1 = vsel %vm1335_vm10, %v9243_v45, %v9242_v5  ;;  %v2987_v2 = vsel %vm72_vm5, %v2953_v13, %v9247_v0  ;;  %v9252_v45 = vld [vmem:[#allocation87_spill] sm:$0xff]  ;;  %v9253_v0 = vld [vmem:[#allocation61_spill] sm:$0xff] }
 0x7a8   :  { %v7945_v49 = vpop.permute.xlu1 %2793  ;;  %v3222_v12 = vsel %vm1109_vm14, %v3158_v4, %v9138_v30  ;;  %4333 = vmatpush.lsf.msrb.mxu3 %v3642_v27  ;;  %v3183_v35 = vsel %vm3128_vm1, %v3118_v59, %v7209_v11  ;;  %v3224_v27 = vsel %vm1109_vm14, %v3160_v29, %v9138_v30  ;;  %v9246_v4 = vld [vmem:[#allocation170_spill] sm:$0xff]  ;;  %v3042_v34 = vsel %vm2999_vm0, %v2987_v2, %v7180_v23 }
 0x7a9   :  { %v3287_v22 = vsel %vm3257_vm2, %v3222_v12, %v7187_v24  ;;  %v2505_v47 = vpop.permute.xlu0 %2504  ;;  %v2994_v26 = vsel %vm72_vm5, %v2960_v1, %v9246_v4  ;;  %v3056_v1 = vsel %vm2999_vm0, %v7252_v41, %v9252_v45  ;;  %v3032_v2 = vsel %vm2999_vm0, %v7252_v41, %v9253_v0 }
 0x7aa   :  { %v3351_v51 = vsel %vm448_vm9, %v3287_v22, %v7196_v31  ;;  %4334 = vmatpush.lsf.msrb.mxu3 %v3639_v10  ;;  %v3104_v61 = vsel %vm440_vm8, %v3040_v43, %v2505_v47  ;;  %v3289_v10 = vsel %vm3257_vm2, %v3224_v27, %v7187_v24  ;;  %v3055_v32 = vsel %vm2999_vm0, %v2994_v26, %v7223_v38  ;;  %v9249_v22 = vld [vmem:[#allocation112_spill] sm:$0xff] }
 0x7ab   :  { %4221 = vmatmul.msk.f32.gmra.mxu1 %vm3395_vm4, %v3351_v51  ;;  %v3169_v54 = vsel %vm3128_vm1, %v3104_v61, %v7783_v37  ;;  %v8007_v28 = vpop.f32.mrf.mxu1  ;;  %v3041_v47 = vsel %vm2999_vm0, %v7173_v19, %v9249_v22  ;;  %v3353_v61 = vsel %vm448_vm9, %v3289_v10, %v7196_v31  ;;  %v3119_v50 = vsel %vm440_vm8, %v3055_v32, %v7233_v44 }
 0x7ac   :  { %2512 = vrot.lane.b32.xlu2 %v9220_v58, %s4481_s19  ;;  %4335 = vmatpush.lsf.msrb.mxu3 %v3636_v8  ;;  %v3233_v52 = vsel %vm1109_vm14, %v3169_v54, %v9145_v9  ;;  %v3106_v54 = vsel %vm440_vm8, %v3042_v34, %v7190_v14  ;;  %v3120_v63 = vsel %vm440_vm8, %v3056_v1, %v7859_v55  ;;  %v9255_v34 = vld [vmem:[#allocation51_spill] sm:$0xff]  ;;  %v9258_v1 = vld [vmem:[#allocation98_spill] sm:$0xff] }
 0x7ad   :  { %v3298_v7 = vsel %vm3257_vm2, %v3233_v52, %v7280_v15 }
 0x7ae   :  { %2710 = vrot.lane.b32.xlu1 %v9234_v40, %s4492_s24  ;;  %v2894_v37 = vpop.permute.xlu2 %2893  ;;  %v3362_v58 = vsel %vm448_vm9, %v3298_v7, %v7291_v48  ;;  %v3247_v40 = vsel %vm1109_vm14, %v3183_v35, %v9241_v42  ;;  %v9251_v42 = vld [vmem:[#allocation90_spill] sm:$0xff] }
 0x7af   :  { %2616 = vrot.lane.b32.xlu0 %v9225_v57, %s4496_s1  ;;  %4232 = vmatmul.msk.f32.gmra.mxu2 %vm3395_vm4, %v3362_v58  ;;  %v3171_v58 = vsel %vm3128_vm1, %v3106_v54, %v7209_v11  ;;  %v8108_v54 = vpop.f32.mrf.mxu0 }
 0x7b0   :  { %v7993_v53 = vpop.permute.xlu1 %2498 }
 0x7b1   :  { %v2804_v17 = vpop.permute.xlu0 %2803 }
 0x7b2   :  { %v3312_v20 = vsel %vm3257_vm2, %v3247_v40, %v2804_v17  ;;  %v3235_v40 = vsel %vm1109_vm14, %v3171_v58, %v9251_v42 }
 0x7b3   :  { %4222 = vmatmul.msk.f32.gmra.mxu1 %vm3395_vm4, %v3352_v60  ;;  %v3376_v57 = vsel %vm448_vm9, %v3312_v20, %v2894_v37  ;;  %v8050_v7 = vpop.f32.mrf.mxu1 }
 0x7b4   :  { %2514 = vrot.lane.b32.xlu2 %v9227_v6, %s4481_s19  ;;  %4246 = vmatmul.msk.f32.gmra.mxu3 %vm3395_vm4, %v3376_v57  ;;  %v9248_v6 = vld [vmem:[#allocation130_spill] sm:$0xff] }
 0x7b6   :  { %v2792_v12 = vpop.permute.xlu2 %2791 }
 0x7b7   :  { %2889 = vrot.lane.b32.xlu0 %v9248_v6, %s4484_s20  ;;  %v3300_v60 = vsel %vm3257_vm2, %v3235_v40, %v2792_v12 }
 0x7b8   :  { %v8027_v43 = vpop.permute.xlu1 %2508  ;;  %v3364_v5 = vsel %vm448_vm9, %v3300_v60, %v7899_v62 }
 0x7b9   :  { %v2507_v51 = vpop.permute.xlu0 %2506 }
 0x7ba   :  { %v3105_v8 = vsel %vm440_vm8, %v3041_v47, %v2507_v51  ;;  %v9254_v47 = vld [vmem:[#allocation141_spill] sm:$0xff] }
 0x7bb   :  { %4223 = vmatmul.msk.f32.gmra.mxu1 %vm3395_vm4, %v3353_v61  ;;  %v3170_v59 = vsel %vm3128_vm1, %v3105_v8, %v7807_v25  ;;  %v3184_v25 = vsel %vm3128_vm1, %v3119_v50, %v7246_v16  ;;  %v2954_v51 = vsel %vm1335_vm10, %v9255_v34, %v9254_v47  ;;  %v9256_v8 = vld [vmem:[#allocation164_spill] sm:$0xff]  ;;  %v9262_v47 = vld [vmem:[#allocation171_spill] sm:$0xff] }
 0x7bc   :  { %2799 = vrot.lane.b32.xlu2 %v9159_v33, %s4495_s0  ;;  %v3234_v3 = vsel %vm1109_vm14, %v3170_v59, %v9138_v30  ;;  %v3248_v17 = vsel %vm1109_vm14, %v3184_v25, %v9250_v46  ;;  %v8076_v27 = vpop.f32.mrf.mxu1  ;;  %v2988_v50 = vsel %vm72_vm5, %v2954_v51, %v9256_v8 }
 0x7bd   :  { %v3299_v52 = vsel %vm3257_vm2, %v3234_v3, %v7187_v24 }
 0x7be   :  { %v2497_v56 = vpop.permute.xlu2 %2496  ;;  %v3363_v37 = vsel %vm448_vm9, %v3299_v52, %v7196_v31  ;;  %v3043_v52 = vsel %vm2999_vm0, %v2988_v50, %v7223_v38 }
 0x7bf   :  { %4233 = vmatmul.msk.f32.gmra.mxu2 %vm3395_vm4, %v3363_v37  ;;  %v3096_v10 = vsel %vm440_vm8, %v3032_v2, %v2497_v56  ;;  %v9257_v37 = vld [vmem:[#allocation116_spill] sm:$0xff] }
 0x7c0   :  { %v8059_v33 = vpop.permute.xlu1 %2807  ;;  %v3057_v25 = vsel %vm2999_vm0, %v7173_v19, %v9257_v37 }
 0x7c1   :  { %v2806_v35 = vpop.permute.xlu0 %2805 }
 0x7c2   :  { %v3313_v29 = vsel %vm3257_vm2, %v3248_v17, %v2806_v35  ;;  %v3107_v35 = vsel %vm440_vm8, %v3043_v52, %v7233_v44 }
 0x7c3   :  { %v3377_v20 = vsel %vm448_vm9, %v3313_v29, %v7832_v36  ;;  %v3172_v60 = vsel %vm3128_vm1, %v3107_v35, %v7246_v16 }
 0x7c4   :  { %4247 = vmatmul.msk.f32.gmra.mxu3 %vm3395_vm4, %v3377_v20  ;;  %v8096_v32 = vpop.f32.mrf.mxu1  ;;  %v8132_v20 = vpop.f32.mrf.mxu0 }
 0x7c6   :  { %v2625_v57 = vpop.permute.xlu2 %2624 }
 0x7c7   :  { %4234 = vmatmul.msk.f32.gmra.mxu2 %vm3395_vm4, %v3364_v5 }
 0x7c8   :  { %v8078_v21 = vpop.permute.xlu1 %2510 }
 0x7c9   :  { %v2623_v36 = vpop.permute.xlu0 %2622 }
 0x7ca   :  { %v3185_v13 = vsel %vm3128_vm1, %v3120_v63, %v2623_v36  ;;  %v9259_v63 = vld [vmem:[#allocation92_spill] sm:$0xff] }
 0x7cb   :  { %v3249_v4 = vsel %vm1109_vm14, %v3185_v13, %v9145_v9  ;;  %v3236_v36 = vsel %vm1109_vm14, %v3172_v60, %v9259_v63 }
 0x7cc   :  { %v3314_v62 = vsel %vm3257_vm2, %v3249_v4, %v7280_v15  ;;  %v8126_v40 = vpop.f32.mrf.mxu1 }
 0x7cd   :  { %v3378_v26 = vsel %vm448_vm9, %v3314_v62, %v7291_v48  ;;  %v3301_v62 = vsel %vm3257_vm2, %v3236_v36, %v7945_v49  ;;  %v8162_v49 = vpop.f32.mrf.mxu0 }
 0x7ce   :  { %4248 = vmatmul.msk.f32.gmra.mxu3 %vm3395_vm4, %v3378_v26  ;;  %v2611_v55 = vpop.permute.xlu2 %2610 }
 0x7d0   :  { %v8093_v12 = vpop.permute.xlu1 %2783 }
 0x7d1   :  { %v2599_v6 = vpop.permute.xlu0 %2598 }
 0x7d2   :  { %v3161_v22 = vsel %vm3128_vm1, %v3096_v10, %v2599_v6  ;;  %v9260_v10 = vld [vmem:[#allocation150_spill] sm:$0xff]  ;;  %v9261_v6 = vld [vmem:[#allocation41_spill] sm:$0xff] }
 0x7d3   :  { %v3225_v61 = vsel %vm1109_vm14, %v3161_v22, %v9145_v9  ;;  %v2961_v22 = vsel %vm1335_vm10, %v9261_v6, %v9260_v10  ;;  %v9270_v10 = vld [vmem:[#allocation135_spill] sm:$0xff] }
 0x7d4   :  { %v3290_v59 = vsel %vm3257_vm2, %v3225_v61, %v7280_v15  ;;  %v2995_v34 = vsel %vm72_vm5, %v2961_v22, %v9262_v47  ;;  %v9264_v61 = vld [vmem:[#allocation27_spill] sm:$0xff]  ;;  %v8167_v50 = vpop.f32.mrf.mxu1 }
 0x7d5   :  { %v3354_v3 = vsel %vm448_vm9, %v3290_v59, %v7291_v48  ;;  %v9265_v59 = vld [vmem:[#allocation160_spill] sm:$0xff]  ;;  %v3058_v52 = vsel %vm2999_vm0, %v2995_v34, %v7180_v23  ;;  %v9271_v6 = vld [vmem:[#allocation35_spill] sm:$0xff] }
 0x7d6   :  { %4224 = vmatmul.msk.f32.gmra.mxu1 %vm3395_vm4, %v3354_v3  ;;  %v8122_v46 = vpop.permute.xlu2 %2873  ;;  %v3122_v60 = vsel %vm440_vm8, %v3058_v52, %v7190_v14  ;;  %v2950_v22 = vsel %vm1335_vm10, %v9271_v6, %v9270_v10  ;;  %v9272_v34 = vld [vmem:[#allocation156_spill] sm:$0xff] }
 0x7d8   :  { %v8115_v56 = vpop.permute.xlu1 %2809 }
 0x7d9   :  { %v2523_v58 = vpop.permute.xlu0 %2522 }
 0x7da   :  { %v3121_v17 = vsel %vm440_vm8, %v3057_v25, %v2523_v58  ;;  %v9266_v25 = vld [vmem:[#allocation68_spill] sm:$0xff] }
 0x7db   :  { %v3186_v42 = vsel %vm3128_vm1, %v3121_v17, %v2625_v57  ;;  %v3044_v57 = vsel %vm2999_vm0, %v7252_v41, %v9258_v1  ;;  %v3033_v58 = vsel %vm2999_vm0, %v7173_v19, %v9266_v25  ;;  %v9267_v1 = vld [vmem:[#allocation149_spill] sm:$0xff] }
 0x7dc   :  { %v3250_v29 = vsel %vm1109_vm14, %v3186_v42, %v9138_v30  ;;  %v3108_v13 = vsel %vm440_vm8, %v3044_v57, %v8027_v43  ;;  %v3097_v17 = vsel %vm440_vm8, %v3033_v58, %v7993_v53  ;;  %v9268_v57 = vld [vmem:[#allocation44_spill] sm:$0xff]  ;;  %v8219_v52 = vpop.f32.mrf.mxu1 }
 0x7dd   :  { %v3315_v5 = vsel %vm3257_vm2, %v3250_v29, %v7187_v24  ;;  %v3173_v26 = vsel %vm3128_vm1, %v3108_v13, %v2611_v55  ;;  %v9263_v55 = vld [vmem:[#allocation136_spill] sm:$0xff]  ;;  %v2962_v63 = vsel %vm1335_vm10, %v9268_v57, %v9267_v1 }
 0x7de   :  { %v3379_v45 = vsel %vm448_vm9, %v3315_v5, %v7196_v31  ;;  %v3237_v43 = vsel %vm1109_vm14, %v3173_v26, %v9145_v9  ;;  %v8160_v51 = vpop.permute.xlu2 %2899  ;;  %v2949_v8 = vsel %vm1335_vm10, %v9264_v61, %v9263_v55  ;;  %v9269_v53 = vld [vmem:[#allocation168_spill] sm:$0xff]  ;;  %v8213_v61 = vpop.f32.mrf.mxu0 }
 0x7df   :  { %4249 = vmatmul.msk.f32.gmra.mxu3 %vm3395_vm4, %v3379_v45  ;;  %v2983_v3 = vsel %vm72_vm5, %v2949_v8, %v9265_v59  ;;  %v3302_v37 = vsel %vm3257_vm2, %v3237_v43, %v7280_v15  ;;  %v2996_v13 = vsel %vm72_vm5, %v2962_v63, %v9269_v53  ;;  %v2984_v43 = vsel %vm72_vm5, %v2950_v22, %v9272_v34  ;;  %v9273_v8 = vld [vmem:[#allocation95_spill] sm:$0xff]  ;;  %v9276_v1 = vld [vmem:[#allocation40_spill] sm:$0xff]  ;;  %v9280_v22 = vld [vmem:[#allocation101_spill] sm:$0xff] }
 0x7e0   :  { %v8146_v4 = vpop.permute.xlu1 %2785  ;;  %v3034_v29 = vsel %vm2999_vm0, %v2983_v3, %v7180_v23  ;;  %v3366_v45 = vsel %vm448_vm9, %v3302_v37, %v7291_v48  ;;  %v3059_v55 = vsel %vm2999_vm0, %v2996_v13, %v7223_v38 }
 0x7e1   :  { %v2884_v0 = vpop.permute.xlu0 %2883  ;;  %v3098_v26 = vsel %vm440_vm8, %v3034_v29, %v7190_v14 }
 0x7e2   :  { %v3365_v2 = vsel %vm448_vm9, %v3301_v62, %v2884_v0  ;;  %v3187_v0 = vsel %vm3128_vm1, %v3122_v60, %v7209_v11  ;;  %v3163_v3 = vsel %vm3128_vm1, %v3098_v26, %v7209_v11  ;;  %v9274_v60 = vld [vmem:[#allocation5_spill] sm:$0xff]  ;;  %v9278_v26 = vld [vmem:[#allocation103_spill] sm:$0xff] }
 0x7e3   :  { %4235 = vmatmul.msk.f32.gmra.mxu2 %vm3395_vm4, %v3365_v2  ;;  %v3251_v59 = vsel %vm1109_vm14, %v3187_v0, %v9273_v8  ;;  %v3045_v0 = vsel %vm2999_vm0, %v7173_v19, %v9278_v26  ;;  %v9285_v26 = vld [vmem:[#allocation109_spill] sm:$0xff] }
 0x7e4   :  { %v3316_v25 = vsel %vm3257_vm2, %v3251_v59, %v8059_v33  ;;  %v3109_v59 = vsel %vm440_vm8, %v3045_v0, %v8078_v21 }
 0x7e6   :  { %v2525_v47 = vpop.permute.xlu2 %2524  ;;  %v8251_v10 = vpop.f32.mrf.mxu0 }
 0x7e8   :  { %v8178_v35 = vpop.permute.xlu1 %2875 }
 0x7e9   :  { %v2601_v42 = vpop.permute.xlu0 %2600 }
 0x7ea   :  { %v3162_v5 = vsel %vm3128_vm1, %v3097_v17, %v2601_v42  ;;  %v3035_v17 = vsel %vm2999_vm0, %v2984_v43, %v7223_v38  ;;  %v3123_v42 = vsel %vm440_vm8, %v3059_v55, %v7233_v44 }
 0x7eb   :  { %v3226_v36 = vsel %vm1109_vm14, %v3162_v5, %v9138_v30  ;;  %4236 = vmatmul.msk.f32.gmra.mxu2 %vm3395_vm4, %v3366_v45  ;;  %v3227_v5 = vsel %vm1109_vm14, %v3163_v3, %v9274_v60  ;;  %v9275_v45 = vld [vmem:[#allocation144_spill] sm:$0xff]  ;;  %v3099_v63 = vsel %vm440_vm8, %v3035_v17, %v7233_v44  ;;  %v3188_v13 = vsel %vm3128_vm1, %v3123_v42, %v7246_v16  ;;  %v8265_v17 = vpop.f32.mrf.mxu1  ;;  %v9281_v60 = vld [vmem:[#allocation106_spill] sm:$0xff] }
 0x7ec   :  { %v3291_v62 = vsel %vm3257_vm2, %v3226_v36, %v7187_v24  ;;  %v2955_v57 = vsel %vm1335_vm10, %v9276_v1, %v9275_v45  ;;  %v3292_v33 = vsel %vm3257_vm2, %v3227_v5, %v8093_v12  ;;  %v9277_v36 = vld [vmem:[#allocation166_spill] sm:$0xff]  ;;  %v3252_v34 = vsel %vm1109_vm14, %v3188_v13, %v9280_v22 }
 0x7ed   :  { %v3355_v2 = vsel %vm448_vm9, %v3291_v62, %v7196_v31  ;;  %v2989_v53 = vsel %vm72_vm5, %v2955_v57, %v9277_v36  ;;  %v3356_v62 = vsel %vm448_vm9, %v3292_v33, %v8122_v46  ;;  %v3164_v46 = vsel %vm3128_vm1, %v3099_v63, %v7246_v16  ;;  %v9282_v57 = vld [vmem:[#allocation143_spill] sm:$0xff]  ;;  %v9283_v33 = vld [vmem:[#allocation50_spill] sm:$0xff] }
 0x7ee   :  { %4225 = vmatmul.msk.f32.gmra.mxu1 %vm3395_vm4, %v3355_v2  ;;  %v9279_v2 = vld [vmem:[#allocation111_spill] sm:$0xff]  ;;  %v3046_v6 = vsel %vm2999_vm0, %v2989_v53, %v7180_v23  ;;  %v2886_v55 = vpop.permute.xlu2 %2885  ;;  %v3317_v3 = vsel %vm3257_vm2, %v3252_v34, %v8115_v56  ;;  %v3228_v5 = vsel %vm1109_vm14, %v3164_v46, %v9281_v60  ;;  %v2956_v63 = vsel %vm1335_vm10, %v9283_v33, %v9282_v57  ;;  %v9284_v36 = vld [vmem:[#allocation162_spill] sm:$0xff] }
 0x7ef   :  { %v3060_v12 = vsel %vm2999_vm0, %v7252_v41, %v9279_v2  ;;  %v3293_v56 = vsel %vm3257_vm2, %v3228_v5, %v8146_v4  ;;  %v2990_v53 = vsel %vm72_vm5, %v2956_v63, %v9284_v36  ;;  %v9288_v60 = vld [vmem:[#allocation43_spill] sm:$0xff] }
 0x7f0   :  { %v2627_v37 = vpop.permute.xlu1 %2626  ;;  %v3124_v43 = vsel %vm440_vm8, %v3060_v12, %v2525_v47  ;;  %v3110_v47 = vsel %vm440_vm8, %v3046_v6, %v7190_v14  ;;  %v3357_v45 = vsel %vm448_vm9, %v3293_v56, %v8178_v35  ;;  %v3047_v12 = vsel %vm2999_vm0, %v2990_v53, %v7223_v38  ;;  %v9289_v56 = vld [vmem:[#allocation172_spill] sm:$0xff] }
 0x7f1   :  { %v2898_v58 = vpop.permute.xlu0 %2897  ;;  %v3175_v4 = vsel %vm3128_vm1, %v3110_v47, %v7209_v11  ;;  %v9287_v47 = vld [vmem:[#allocation152_spill] sm:$0xff] }
 0x7f2   :  { %v3380_v29 = vsel %vm448_vm9, %v3316_v25, %v2898_v58  ;;  %v3189_v25 = vsel %vm3128_vm1, %v3124_v43, %v2627_v37  ;;  %v3239_v0 = vsel %vm1109_vm14, %v3175_v4, %v9285_v26  ;;  %v3111_v43 = vsel %vm440_vm8, %v3047_v12, %v7233_v44  ;;  %v9291_v26 = vld [vmem:[#allocation63_spill] sm:$0xff] }
 0x7f3   :  { %4250 = vmatmul.msk.f32.gmra.mxu3 %vm3395_vm4, %v3380_v29  ;;  %v3381_v29 = vsel %vm448_vm9, %v3317_v3, %v8160_v51  ;;  %v3253_v37 = vsel %vm1109_vm14, %v3189_v25, %v9145_v9  ;;  %v8308_v46 = vpop.f32.mrf.mxu1  ;;  %v3176_v3 = vsel %vm3128_vm1, %v3111_v43, %v7246_v16  ;;  %v2963_v5 = vsel %vm1335_vm10, %v9288_v60, %v9287_v47  ;;  %v9295_v60 = vld [vmem:[#allocation11_spill] sm:$0xff] }
 0x7f4   :  { %v3318_v35 = vsel %vm3257_vm2, %v3253_v37, %v7280_v15  ;;  %v9290_v37 = vld [vmem:[#allocation113_spill] sm:$0xff] }
 0x7f5   :  { %v3382_v34 = vsel %vm448_vm9, %v3318_v35, %v7291_v48 }
 0x7f6   :  { %4226 = vmatmul.msk.f32.gmra.mxu1 %vm3395_vm4, %v3356_v62  ;;  %v8298_v62 = vpop.f32.mrf.mxu0  ;;  %v2798_v6 = vpop.permute.xlu2 %2797 }
 0x7f8   :  { %v2603_v8 = vpop.permute.xlu1 %2602 }
 0x7f9   :  { %v2613_v58 = vpop.permute.xlu0 %2612 }
 0x7fa   :  { %v3174_v42 = vsel %vm3128_vm1, %v3109_v59, %v2613_v58  ;;  %v9286_v58 = vld [vmem:[#allocation59_spill] sm:$0xff] }
 0x7fb   :  { %v3238_v21 = vsel %vm1109_vm14, %v3174_v42, %v9138_v30  ;;  %4251 = vmatmul.msk.f32.gmra.mxu3 %vm3395_vm4, %v3381_v29  ;;  %v3036_v42 = vsel %vm2999_vm0, %v7252_v41, %v9286_v58  ;;  %v8336_v35 = vpop.f32.mrf.mxu1  ;;  %v9294_v58 = vld [vmem:[#allocation45_spill] sm:$0xff] }
 0x7fc   :  { %v3303_v51 = vsel %vm3257_vm2, %v3238_v21, %v7187_v24 }
 0x7fd   :  { %v3367_v1 = vsel %vm448_vm9, %v3303_v51, %v7196_v31  ;;  %v3240_v51 = vsel %vm1109_vm14, %v3176_v3, %v9290_v37 }
 0x7fe   :  { %4227 = vmatmul.msk.f32.gmra.mxu1 %vm3395_vm4, %v3357_v45  ;;  %4237 = vmatmul.msk.f32.gmra.mxu2 %vm3395_vm4, %v3367_v1  ;;  %v3626_v45 = vpop.f32.mrf.mxu0  ;;  %v3305_v57 = vsel %vm3257_vm2, %v3240_v51, %v2798_v6  ;;  %v2503_v33 = vpop.permute.xlu2 %2502 }
 0x800   :  { %v2527_v13 = vpop.permute.xlu1 %2526 }
 0x801   :  { %v2796_v2 = vpop.permute.xlu0 %2795 }
 0x802   :  { %v3304_v22 = vsel %vm3257_vm2, %v3239_v0, %v2796_v2  ;;  %v3037_v0 = vsel %vm2999_vm0, %v7173_v19, %v9291_v26  ;;  %v9292_v2 = vld [vmem:[#allocation115_spill] sm:$0xff] }
 0x803   :  { %4252 = vmatmul.msk.f32.gmra.mxu3 %vm3395_vm4, %v3382_v34  ;;  %v3368_v59 = vsel %vm448_vm9, %v3304_v22, %v2886_v55  ;;  %v2997_v55 = vsel %vm72_vm5, %v2963_v5, %v9289_v56  ;;  %v3061_v12 = vsel %vm2999_vm0, %v7173_v19, %v9292_v2  ;;  %v3101_v6 = vsel %vm440_vm8, %v3037_v0, %v2503_v33 }
 0x804   :  { %v3062_v53 = vsel %vm2999_vm0, %v2997_v55, %v7180_v23  ;;  %v3125_v43 = vsel %vm440_vm8, %v3061_v12, %v2527_v13 }
 0x805   :  { %v3126_v34 = vsel %vm440_vm8, %v3062_v53, %v7190_v14  ;;  %v8382_v53 = vpop.f32.mrf.mxu1 }
 0x806   :  { %4238 = vmatmul.msk.f32.gmra.mxu2 %vm3395_vm4, %v3368_v59  ;;  %v3191_v37 = vsel %vm3128_vm1, %v3126_v34, %v7209_v11 }
 0x808   :  { %v2888_v25 = vpop.permute.xlu1 %2887 }
 0x809   :  { %v2501_v29 = vpop.permute.xlu0 %2500  ;;  %v3369_v4 = vsel %vm448_vm9, %v3305_v57, %v2888_v25  ;;  %v9293_v25 = vld [vmem:[#allocation153_spill] sm:$0xff]  ;;  %v2513_v57 = vpop.permute.xlu2 %2512 }
 0x80a   :  { %v3100_v21 = vsel %vm440_vm8, %v3036_v42, %v2501_v29  ;;  %v2964_v42 = vsel %vm1335_vm10, %v9294_v58, %v9293_v25  ;;  %v9298_v25 = vld [vmem:[#allocation53_spill] sm:$0xff] }
 0x80b   :  { %v3165_v1 = vsel %vm3128_vm1, %v3100_v21, %v2603_v8  ;;  %v2998_v5 = vsel %vm72_vm5, %v2964_v42, %v9295_v60  ;;  %v3629_v21 = vpop.f32.mrf.mxu0  ;;  %v8410_v42 = vpop.f32.mrf.mxu3 }
 0x80c   :  { %v3229_v63 = vsel %vm1109_vm14, %v3165_v1, %v9145_v9  ;;  %v3063_v1 = vsel %vm2999_vm0, %v2998_v5, %v7223_v38  ;;  %v3627_v5 = vadd.f32 %v7867_v39, %v3626_v45 }
 0x80d   :  { %v3294_v36 = vsel %vm3257_vm2, %v3229_v63, %v7280_v15  ;;  %v3255_v63 = vsel %vm1109_vm14, %v3191_v37, %v9145_v9  ;;  %v3127_v38 = vsel %vm440_vm8, %v3063_v1, %v7233_v44  ;;  %v3624_v37 = vadd.f32 %v7867_v39, %v8298_v62 }
 0x80e   :  { %4239 = vmatmul.msk.f32.gmra.mxu2 %vm3395_vm4, %v3369_v4  ;;  %v3358_v8 = vsel %vm448_vm9, %v3294_v36, %v7291_v48  ;;  %v9296_v4 = vld [vmem:[#allocation117_spill] sm:$0xff]  ;;  %v3320_v2 = vsel %vm3257_vm2, %v3255_v63, %v7280_v15  ;;  %v3192_v44 = vsel %vm3128_vm1, %v3127_v38, %v7246_v16  ;;  %v3621_v1 = vadd.f32 %v7867_v39, %v8251_v10 }
 0x80f   :  { %4228 = vmatmul.msk.f32.gmra.mxu1 %vm3395_vm4, %v3358_v8  ;;  %v3048_v36 = vsel %vm2999_vm0, %v7252_v41, %v9296_v4  ;;  %v3615_v63 = vadd.f32 %v7867_v39, %v8162_v49 }
 0x810   :  { %v2605_v22 = vpop.permute.xlu1 %2604  ;;  %v3112_v8 = vsel %vm440_vm8, %v3048_v36, %v2513_v57  ;;  %v3612_v36 = vadd.f32 %v7867_v39, %v8132_v20 }
 0x811   :  { %v3166_v59 = vsel %vm3128_vm1, %v3101_v6, %v2605_v22  ;;  %v2629_v3 = vpop.permute.xlu0 %2628  ;;  %v3692_v60 = vpop.f32.mrf.mxu1 }
 0x812   :  { %v3230_v29 = vsel %vm1109_vm14, %v3166_v59, %v9138_v30  ;;  %v3190_v47 = vsel %vm3128_vm1, %v3125_v43, %v2629_v3  ;;  %v3384_v59 = vsel %vm448_vm9, %v3320_v2, %v7291_v48  ;;  %v9297_v3 = vld [vmem:[#allocation146_spill] sm:$0xff] }
 0x813   :  { %v3254_v56 = vsel %vm1109_vm14, %v3190_v47, %v9138_v30  ;;  %v3295_v13 = vsel %vm3257_vm2, %v3230_v29, %v7187_v24  ;;  %v2957_v58 = vsel %vm1335_vm10, %v9298_v25, %v9297_v3  ;;  %v3630_v29 = vadd.f32 %v7867_v39, %v3629_v21  ;;  %v2515_v47 = vpop.permute.xlu2 %2514 }
 0x814   :  { %v3319_v55 = vsel %vm3257_vm2, %v3254_v56, %v7187_v24  ;;  %v3359_v33 = vsel %vm448_vm9, %v3295_v13, %v7196_v31  ;;  %v3684_v3 = vadd.f32 %v7867_v39, %v8308_v46 }
 0x815   :  { %v3383_v51 = vsel %vm448_vm9, %v3319_v55, %v7196_v31 }
 0x816   :  { %4253 = vmatmul.msk.f32.gmra.mxu3 %vm3395_vm4, %v3383_v51 }
 0x817   :  { %4229 = vmatmul.msk.f32.gmra.mxu1 %vm3395_vm4, %v3359_v33 }
 0x818   :  { %v2413_v12 = vpop.permute.xlu1 %2412 }
 0x819   :  { %v2615_v26 = vpop.permute.xlu0 %2614 }
 0x81a   :  { %v3177_v0 = vsel %vm3128_vm1, %v3112_v8, %v2615_v26  ;;  %v3609_v8 = vadd.f32 %v7867_v39, %v8108_v54 }
 0x81b   :  { %v3241_v6 = vsel %vm1109_vm14, %v3177_v0, %v9145_v9  ;;  %v3632_v22 = vpop.f32.mrf.mxu0  ;;  %v3049_v9 = vsel %vm2999_vm0, %v7173_v19, %v2413_v12  ;;  %v2800_v38 = vpop.permute.xlu2 %2799 }
 0x81c   :  { %v3633_v41 = vadd.f32 %v7867_v39, %v3632_v22  ;;  %v3306_v34 = vsel %vm3257_vm2, %v3241_v6, %v7280_v15  ;;  %v9299_v15 = vld [vmem:[#allocation167_spill] sm:$0xff]  ;;  %v3113_v56 = vsel %vm440_vm8, %v3049_v9, %v2515_v47  ;;  %v3722_v0 = vpop.f32.mrf.mxu2  ;;  %v8706_v22 = vld [vmem:[#allocation2 + $0xc8] sm:$0xff] }
 0x81d   :  { %v3370_v43 = vsel %vm448_vm9, %v3306_v34, %v7291_v48  ;;  %v2991_v16 = vsel %vm72_vm5, %v2957_v58, %v9299_v15  ;;  %v3256_v48 = vsel %vm1109_vm14, %v3192_v44, %v9138_v30  ;;  %v8457_v20 = vadd.f32 %v7867_v39, %v3722_v0  ;;  %9302 = vst [vmem:[#allocation14_spill] sm:$0xff] %v8706_v22 }
 0x81e   :  { %4240 = vmatmul.msk.f32.gmra.mxu2 %vm3395_vm4, %v3370_v43  ;;  %4254 = vmatmul.msk.f32.gmra.mxu3 %vm3395_vm4, %v3384_v59  ;;  %v3050_v13 = vsel %vm2999_vm0, %v2991_v16, %v7180_v23  ;;  %v3321_v21 = vsel %vm3257_vm2, %v3256_v48, %v7187_v24  ;;  %v3693_v44 = vadd.f32 %v7867_v39, %v3692_v60 }
 0x81f   :  { %4336 = vmatpush.lsf.msrb.mxu3 %v3633_v41  ;;  %v3114_v23 = vsel %vm440_vm8, %v3050_v13, %v7190_v14  ;;  %v3385_v62 = vsel %vm448_vm9, %v3321_v21, %v7196_v31  ;;  %v3690_v43 = vadd.f32 %v7867_v39, %v8382_v53  ;;  %v3687_v59 = vadd.f32 %v7867_v39, %v8336_v35 }
 0x820   :  { %v2711_v33 = vpop.permute.xlu1 %2710  ;;  %v3179_v14 = vsel %vm3128_vm1, %v3114_v23, %v7209_v11  ;;  %v3681_v58 = vadd.f32 %v7867_v39, %v8265_v17  ;;  %v3678_v35 = vadd.f32 %v7867_v39, %v8219_v52  ;;  %v3675_v16 = vadd.f32 %v7867_v39, %v8167_v50 }
 0x821   :  { %4337 = vmatpush.lsf.msrb.mxu3 %v3630_v29  ;;  %v2617_v19 = vpop.permute.xlu0 %2616  ;;  %v3672_v17 = vadd.f32 %v7867_v39, %v8126_v40  ;;  %v3669_v29 = vadd.f32 %v7867_v39, %v8096_v32  ;;  %v3666_v52 = vadd.f32 %v7867_v39, %v8076_v27  ;;  %v3663_v40 = vadd.f32 %v7867_v39, %v8050_v7  ;;  %v8691_v32 = vld [vmem:[#allocation2 + $0x100] sm:$0xff] }
 0x822   :  { %v3178_v55 = vsel %vm3128_vm1, %v3113_v56, %v2617_v19  ;;  %v3657_v27 = vadd.f32 %v7867_v39, %v7958_v18  ;;  %v8687_v18 = vld [vmem:[#allocation2] sm:$0xff] }
 0x823   :  { %v3242_v51 = vsel %vm1109_vm14, %v3178_v55, %v9138_v30  ;;  %4338 = vmatpush.lsf.msrb.mxu3 %v3627_v5  ;;  %v8440_v30 = vpop.f32.mrf.mxu3  ;;  %v3660_v5 = vadd.f32 %v7867_v39, %v8007_v28 }
 0x824   :  { %v3307_v45 = vsel %vm3257_vm2, %v3242_v51, %v7187_v24  ;;  %v3618_v24 = vadd.f32 %v7867_v39, %v8213_v61 }
 0x825   :  { %4339 = vmatpush.lsf.msrb.mxu3 %v3624_v37  ;;  %v3371_v57 = vsel %vm448_vm9, %v3307_v45, %v7196_v31  ;;  %v3243_v31 = vsel %vm1109_vm14, %v3179_v14, %v2711_v33  ;;  %v8524_v45 = vld [vmem:[#allocation2 + $0xf0] sm:$0xff] }
 0x826   :  { %4241 = vmatmul.msk.f32.gmra.mxu2 %vm3395_vm4, %v3371_v57  ;;  %4255 = vmatmul.msk.f32.gmra.mxu3 %vm3395_vm4, %v3385_v62  ;;  %v3308_v61 = vsel %vm3257_vm2, %v3243_v31, %v2800_v38  ;;  %v3725_v25 = vpop.f32.mrf.mxu2  ;;  %v8541_v31 = vld [vmem:[#allocation2 + $0xc0] sm:$0xff]  ;;  %v8685_v33 = vld [vmem:[#allocation2 + $0x110] sm:$0xff] }
 0x827   :  { %4340 = vmatpush.lsf.msrb.mxu3 %v3621_v1  ;;  %v8477_v15 = vadd.f32 %v7867_v39, %v3725_v25 }
 0x828   :  { %v3695_v10 = vpop.f32.mrf.mxu1 }
 0x829   :  { %4341 = vmatpush.lsf.msrb.mxu3 %v3618_v24  ;;  %v2890_v4 = vpop.permute.xlu0 %2889  ;;  %v3696_v34 = vadd.f32 %v7867_v39, %v3695_v10  ;;  %v8535_v24 = vld [vmem:[#allocation2 + $0xe0] sm:$0xff]  ;;  %v8538_v10 = vld [vmem:[#allocation2 + $0xd0] sm:$0xff] }
 0x82a   :  { %v3372_v11 = vsel %vm448_vm9, %v3308_v61, %v2890_v4 }
 0x82b   :  { %4342 = vmatpush.lsf.msrb.mxu3 %v3615_v63  ;;  %v8454_v49 = vpop.f32.mrf.mxu3 }
 0x82d   :  { %4343 = vmatpush.lsf.msrb.mxu3 %v3612_v36 }
 0x82e   :  { %4242 = vmatmul.msk.f32.gmra.mxu2 %vm3395_vm4, %v3372_v11 }
 0x82f   :  { %4344 = vmatpush.lsf.msrb.mxu3 %v3609_v8  ;;  %v8683_v8 = vld [vmem:[#allocation2 + $0x10] sm:$0xff] }
 0x830   :  { %v3698_v26 = vpop.f32.mrf.mxu1  ;;  %4345 = vllmr.1.mxu3 }
 0x831   :  { %v3699_v41 = vadd.f32 %v7867_v39, %v3698_v26  ;;  %3928 = vmatpush.msra.mxu3 %v8524_v45  ;;  %v8552_v26 = vld [vmem:[#allocation2 + $0xb0] sm:$0xff] }
 0x832   :  { %v3728_v48 = vpop.f32.mrf.mxu2 }
 0x833   :  { %v8495_v60 = vadd.f32 %v7867_v39, %v3728_v48  ;;  %3929 = vmatpush.msra.mxu3 %v8535_v24  ;;  %v8584_v48 = vld [vmem:[#allocation2 + $0x90] sm:$0xff] }
 0x835   :  { %3930 = vmatpush.msra.mxu3 %v8538_v10 }
 0x837   :  { %v3770_v2 = vpop.f32.mrf.mxu3  ;;  %3931 = vmatpush.msra.mxu3 %v8541_v31 }
 0x838   :  { %v3701_v12 = vpop.f32.mrf.mxu1  ;;  %v8460_v6 = vadd.f32 %v7867_v39, %v3770_v2 }
 0x839   :  { %v3702_v54 = vadd.f32 %v7867_v39, %v3701_v12  ;;  %3932 = vmatpush.msra.mxu3 %v8552_v26 }
 0x83b   :  { %4301 = vmatpush.lsf.msrb.mxu2 %v3702_v54 }
 0x83d   :  { %4302 = vmatpush.lsf.msrb.mxu2 %v3699_v41 }
 0x83f   :  { %4303 = vmatpush.lsf.msrb.mxu2 %v3696_v34 }
 0x841   :  { %4304 = vmatpush.lsf.msrb.mxu2 %v3693_v44 }
 0x842   :  { %v8508_v19 = vpop.f32.mrf.mxu2 }
 0x843   :  { %4305 = vmatpush.lsf.msrb.mxu2 %v3690_v43  ;;  %v8677_v43 = vld [vmem:[#allocation2 + $0x120] sm:$0xff] }
 0x845   :  { %4306 = vmatpush.lsf.msrb.mxu2 %v3687_v59  ;;  %v8568_v59 = vld [vmem:[#allocation2 + $0xa0] sm:$0xff] }
 0x846   :  { %3933 = vmatpush.msra.mxu3 %v8568_v59 }
 0x847   :  { %4307 = vmatpush.lsf.msrb.mxu2 %v3684_v3  ;;  %v3773_v9 = vpop.f32.mrf.mxu3  ;;  %v8571_v3 = vld [vmem:[#allocation2 + $0x1f0] sm:$0xff] }
 0x848   :  { %v8480_v53 = vadd.f32 %v7867_v39, %v3773_v9  ;;  %3934 = vmatpush.msra.mxu3 %v8584_v48 }
 0x849   :  { %4308 = vmatpush.lsf.msrb.mxu2 %v3681_v58 }
 0x84a   :  { %v8510_v56 = vpop.f32.mrf.mxu2 }
 0x84b   :  { %4309 = vmatpush.lsf.msrb.mxu2 %v3678_v35 }
 0x84d   :  { %4310 = vmatpush.lsf.msrb.mxu2 %v3675_v16 }
 0x84f   :  { %4311 = vmatpush.lsf.msrb.mxu2 %v3672_v17 }
 0x851   :  { %4312 = vmatpush.lsf.msrb.mxu2 %v3669_v29  ;;  %v3776_v47 = vpop.f32.mrf.mxu3 }
 0x852   :  { %v8498_v50 = vadd.f32 %v7867_v39, %v3776_v47 }
 0x853   :  { %4313 = vmatpush.lsf.msrb.mxu2 %v3666_v52  ;;  %v3704_v63 = vpop.f32.mrf.mxu1  ;;  %v8586_v52 = vld [vmem:[#allocation2 + $0x1e0] sm:$0xff] }
 0x854   :  { %v3705_v12 = vadd.f32 %v7867_v39, %v3704_v63 }
 0x855   :  { %4314 = vmatpush.lsf.msrb.mxu2 %v3663_v40  ;;  %v8675_v40 = vld [vmem:[#allocation2 + $0x20] sm:$0xff] }
 0x857   :  { %4315 = vmatpush.lsf.msrb.mxu2 %v3660_v5  ;;  %v8595_v5 = vld [vmem:[#allocation2 + $0x1d0] sm:$0xff] }
 0x859   :  { %4316 = vmatpush.lsf.msrb.mxu2 %v3657_v27  ;;  %v8597_v27 = vld [vmem:[#allocation2 + $0x1c0] sm:$0xff] }
 0x85a   :  { %4317 = vllmr.1.mxu2 }
 0x85b   :  { %3948 = vmatpush.msra.mxu2 %v8571_v3 }
 0x85d   :  { %3949 = vmatpush.msra.mxu2 %v8586_v52 }
 0x85f   :  { %3950 = vmatpush.msra.mxu2 %v8595_v5 }
 0x861   :  { %3951 = vmatpush.msra.mxu2 %v8597_v27 }
 0x862   :  { %v8512_v13 = vpop.f32.mrf.mxu3 }
 0x866   :  { %v3737_v7 = vpop.f32.mrf.mxu2 }
 0x867   :  { %v8517_v28 = vadd.f32 %v7867_v39, %v3737_v7  ;;  %v8599_v7 = vld [vmem:[#allocation2 + $0x80] sm:$0xff] }
 0x868   :  { %3935 = vmatpush.msra.mxu3 %v8599_v7 }
 0x86b   :  { %v3707_v11 = vpop.f32.mrf.mxu1 }
 0x86c   :  { %v3708_v35 = vadd.f32 %v7867_v39, %v3707_v11  ;;  %v8622_v11 = vld [vmem:[%s8844_s12] ss:$0 sm:$0xff] }
 0x86e   :  { %v3740_v21 = vpop.f32.mrf.mxu2 }
 0x86f   :  { %v8528_v57 = vadd.f32 %v7867_v39, %v3740_v21  ;;  %v8604_v21 = vld [vmem:[#allocation2 + $0x1b0] sm:$0xff] }
 0x870   :  { %3952 = vmatpush.msra.mxu2 %v8604_v21 }
 0x873   :  { %v3710_v25 = vpop.f32.mrf.mxu1 }
 0x876   :  { %v8514_v55 = vpop.f32.mrf.mxu3 }
 0x87b   :  { %v3713_v63 = vpop.f32.mrf.mxu1 }
 0x87e   :  { %v3785_v37 = vpop.f32.mrf.mxu3 }
 0x87f   :  { %v8520_v51 = vadd.f32 %v7867_v39, %v3785_v37 }
 0x881   :  { %v3743_v1 = vpop.f32.mrf.mxu2 }
 0x882   :  { %v8545_v38 = vadd.f32 %v7867_v39, %v3743_v1  ;;  %v3711_v1 = vadd.f32 %v7867_v39, %v3710_v25  ;;  %v3762_v25 = vadd.f32 %v8622_v11, %v8410_v42  ;;  %v8658_v42 = vld [vmem:[#allocation2 + $0x150] sm:$0xff] }
 0x886   :  { %v3788_v23 = vpop.f32.mrf.mxu3 }
 0x887   :  { %v8531_v62 = vadd.f32 %v7867_v39, %v3788_v23 }
 0x889   :  { %v3746_v14 = vpop.f32.mrf.mxu2 }
 0x88a   :  { %v8557_v54 = vadd.f32 %v7867_v39, %v3746_v14  ;;  %v8610_v14 = vld [vmem:[#allocation2 + $0x1a0] sm:$0xff] }
 0x88b   :  { %3953 = vmatpush.msra.mxu2 %v8610_v14 }
 0x891   :  { %v3749_v4 = vpop.f32.mrf.mxu2 }
 0x892   :  { %v8576_v16 = vadd.f32 %v7867_v39, %v3749_v4  ;;  %v8615_v4 = vadd.f32 %v7867_v39, %v8514_v55  ;;  %v8633_v55 = vld [vmem:[#allocation2 + $0x180] sm:$0xff] }
 0x899   :  { %v3791_v36 = vpop.f32.mrf.mxu3 }
 0x89a   :  { %v8548_v61 = vadd.f32 %v7867_v39, %v3791_v36 }
 0x8a1   :  { %v3752_v0 = vpop.f32.mrf.mxu2  ;;  %v3794_v2 = vpop.f32.mrf.mxu3 }
 0x8a2   :  { %v8560_v41 = vadd.f32 %v7867_v39, %v3752_v0  ;;  %v8563_v34 = vadd.f32 %v7867_v39, %v3794_v2  ;;  %v8626_v0 = vadd.f32 %v8622_v11, %v8512_v13  ;;  %v8629_v2 = vld [vmem:[#allocation2 + $0x190] sm:$0xff] }
 0x8a3   :  { %3954 = vmatpush.msra.mxu2 %v8629_v2  ;;  %v8641_v13 = vld [vmem:[#allocation2 + $0x170] sm:$0xff] }
 0x8a4   :  { %v4406_v44 = vpack.i.bf16 %v8560_v41, %v3705_v12  ;;  %v8637_v12 = vld [vmem:[#allocation2 + $0x60] sm:$0xff] }
 0x8a5   :  { %3955 = vmatpush.msra.mxu2 %v8633_v55 }
 0x8a6   :  { %4407 = vxpose.xlu1.b32.start [1/16] (narrow) %v4406_v44, 8  ;;  %v3714_v44 = vadd.f32 %v8622_v11, %v3713_v63  ;;  %v8664_v63 = vld [vmem:[#allocation2 + $0x140] sm:$0xff] }
 0x8a7   :  { %3956 = vmatpush.msra.mxu2 %v8641_v13 }
 0x8a9   :  { %v3755_v58 = vpop.f32.mrf.mxu2  ;;  %v3797_v9 = vpop.f32.mrf.mxu3 }
 0x8aa   :  { %v8579_v17 = vadd.f32 %v7867_v39, %v3755_v58  ;;  %v8582_v29 = vadd.f32 %v7867_v39, %v3797_v9  ;;  %v8648_v58 = vld [vmem:[#allocation2 + $0x160] sm:$0xff]  ;;  %v3716_v9 = vpop.f32.mrf.mxu1 }
 0x8ab   :  { %3957 = vmatpush.msra.mxu2 %v8648_v58 }
 0x8ac   :  { %v4408_v47 = vpack.i.bf16 %v8579_v17, %v3708_v35  ;;  %4274 = vmatpush.lsf.msrb.mxu0 %v8582_v29  ;;  %v4412_v35 = vpack.i.bf16 %v3762_v25, %v3714_v44  ;;  %v8669_v44 = vld [vmem:[#allocation2 + $0x30] sm:$0xff] }
 0x8ad   :  { %3958 = vmatpush.msra.mxu2 %v8658_v42 }
 0x8ae   :  { %4275 = vmatpush.lsf.msrb.mxu0 %v8563_v34  ;;  %4409 = vxpose.xlu1.b32.cont [2/16] (narrow) %v4408_v47, 8  ;;  %v3768_v47 = vadd.f32 %v8622_v11, %v8454_v49  ;;  %v3717_v49 = vadd.f32 %v8622_v11, %v3716_v9 }
 0x8af   :  { %3959 = vmatpush.msra.mxu2 %v8664_v63 }
 0x8b0   :  { %4276 = vmatpush.lsf.msrb.mxu0 %v8548_v61 }
 0x8b1   :  { %v3758_v37 = vpop.f32.mrf.mxu2 }
 0x8b2   :  { %v3759_v23 = vadd.f32 %v7867_v39, %v3758_v37  ;;  %4277 = vmatpush.lsf.msrb.mxu0 %v8531_v62  ;;  %v8631_v39 = vld [vmem:[#allocation2 + $0x70] sm:$0xff]  ;;  %v3719_v9 = vpop.f32.mrf.mxu1 }
 0x8b3   :  { %3936 = vmatpush.msra.mxu3 %v8631_v39  ;;  %v8656_v37 = vld [vmem:[#allocation2 + $0x50] sm:$0xff] }
 0x8b4   :  { %v4410_v36 = vpack.i.bf16 %v3759_v23, %v3711_v1  ;;  %4278 = vmatpush.lsf.msrb.mxu0 %v8520_v51  ;;  %v8660_v1 = vld [vmem:[#allocation2 + $0x40] sm:$0xff] }
 0x8b5   :  { %3937 = vmatpush.msra.mxu3 %v8637_v12 }
 0x8b6   :  { %4279 = vmatpush.lsf.msrb.mxu0 %v8615_v4  ;;  %4411 = vxpose.xlu1.b32.cont [3/16] (narrow) %v4410_v36, 8  ;;  %v3765_v36 = vadd.f32 %v8622_v11, %v8440_v30 }
 0x8b7   :  { %3938 = vmatpush.msra.mxu3 %v8656_v37 }
 0x8b8   :  { %4280 = vmatpush.lsf.msrb.mxu0 %v8626_v0  ;;  %v4414_v30 = vpack.i.bf16 %v3765_v36, %v3717_v49  ;;  %v8700_v49 = vld [vmem:[#allocation2 + $0xe8] sm:$0xff] }
 0x8b9   :  { %3939 = vmatpush.msra.mxu3 %v8660_v1 }
 0x8ba   :  { %4281 = vmatpush.lsf.msrb.mxu0 %v8498_v50 }
 0x8bb   :  { %3940 = vmatpush.msra.mxu3 %v8669_v44 }
 0x8bc   :  { %4282 = vmatpush.lsf.msrb.mxu0 %v8480_v53 }
 0x8bd   :  { %3941 = vmatpush.msra.mxu3 %v8675_v40 }
 0x8be   :  { %4283 = vmatpush.lsf.msrb.mxu0 %v8460_v6  ;;  %4413 = vxpose.xlu1.b32.cont [4/16] (narrow) %v4412_v35, 8  ;;  %v8671_v35 = vld [vmem:[#allocation2 + $0x130] sm:$0xff] }
 0x8bf   :  { %3960 = vmatpush.msra.mxu2 %v8671_v35  ;;  %3942 = vmatpush.msra.mxu3 %v8683_v8 }
 0x8c0   :  { %4284 = vmatpush.lsf.msrb.mxu0 %v3768_v47 }
 0x8c1   :  { %3961 = vmatpush.msra.mxu2 %v8677_v43  ;;  %3943 = vmatpush.msra.mxu3 %v8687_v18 }
 0x8c2   :  { %4285 = vmatpush.lsf.msrb.mxu0 %v3765_v36  ;;  %v8695_v36 = vld [vmem:[#allocation2 + $0xf8] sm:$0xff]  ;;  %4346 = vmatmul.lmr.bf16.vlgmr.msra.gmra.1.mxu3 }
 0x8c3   :  { %3962 = vmatpush.msra.mxu2 %v8685_v33  ;;  %9300 = vst [vmem:[#allocation8_spill] sm:$0xff] %v8695_v36  ;;  %3968 = vmatpush.msra.mxu3 %v8695_v36  ;;  %v8709_v36 = vld [vmem:[#allocation2 + $0xb8] sm:$0xff] }
 0x8c4   :  { %4286 = vmatpush.lsf.msrb.mxu0 %v3762_v25  ;;  %v3720_v25 = vadd.f32 %v8622_v11, %v3719_v9  ;;  %v3859_v9 = vld [vmem:[#allocation2 + $0x1d8] sm:$0xff] }
 0x8c5   :  { %3963 = vmatpush.msra.mxu2 %v8691_v32  ;;  %3969 = vmatpush.msra.mxu3 %v8700_v49 }
 0x8c6   :  { %4415 = vxpose.xlu1.b32.cont [5/16] (narrow) %v4414_v30, 8  ;;  %4287 = vmatpush.lsf.msrb.mxu0 %v3759_v23  ;;  %v3863_v23 = vld [vmem:[#allocation2 + $0x1f8] sm:$0xff]  ;;  %v3861_v30 = vld [vmem:[#allocation2 + $0x1e8] sm:$0xff]  ;;  %v4416_v46 = vpack.i.bf16 %v3768_v47, %v3720_v25 }
 0x8c7   :  { %4318 = vmatmul.lmr.bf16.vlgmr.msra.gmra.1.mxu2  ;;  %v3855_v47 = vld [vmem:[#allocation2 + $0x1b8] sm:$0xff]  ;;  %v8712_v25 = vld [vmem:[#allocation2 + $0xa8] sm:$0xff] }
 0x8c8   :  { %4288 = vmatpush.lsf.msrb.mxu0 %v8579_v17  ;;  %3988 = vmatpush.msra.mxu2 %v3863_v23  ;;  %v8704_v17 = vld [vmem:[#allocation2 + $0xd8] sm:$0xff] }
 0x8c9   :  { %9301 = vst [vmem:[#allocation12_spill] sm:$0xff] %v8704_v17  ;;  %3970 = vmatpush.msra.mxu3 %v8704_v17  ;;  %v3849_v17 = vld [vmem:[#allocation2 + $0x188] sm:$0xff] }
 0x8ca   :  { %4289 = vmatpush.lsf.msrb.mxu0 %v8560_v41  ;;  %3989 = vmatpush.msra.mxu2 %v3861_v30  ;;  %v3857_v41 = vld [vmem:[#allocation2 + $0x1c8] sm:$0xff] }
 0x8cb   :  { %4290 = vllmr.1.mxu0  ;;  %3971 = vmatpush.msra.mxu3 %v8706_v22  ;;  %v3851_v22 = vld [vmem:[#allocation2 + $0x198] sm:$0xff] }
 0x8cc   :  { %4132 = vmatpush.msra.mxu0 %v3863_v23  ;;  %3990 = vmatpush.msra.mxu2 %v3859_v9  ;;  %v9303_v23 = vpack.i.bf16 %v8460_v6, %v8457_v20  ;;  %v8727_v20 = vld [vmem:[#allocation2 + $0x68] sm:$0xff] }
 0x8cd   :  { %3972 = vmatpush.msra.mxu3 %v8709_v36  ;;  %v3845_v6 = vld [vmem:[#allocation2 + $0x168] sm:$0xff] }
 0x8ce   :  { %4417 = vxpose.xlu1.b32.cont [6/16] (narrow) %v4416_v46, 8  ;;  %4133 = vmatpush.msra.mxu0 %v3861_v30  ;;  %v3853_v46 = vld [vmem:[#allocation2 + $0x1a8] sm:$0xff]  ;;  %v8719_v30 = vld [vmem:[#allocation2 + $0x98] sm:$0xff] }
 0x8cf   :  { %3991 = vmatpush.msra.mxu2 %v3857_v41  ;;  %3973 = vmatpush.msra.mxu3 %v8712_v25  ;;  %9304 = vst [vmem:[#allocation13_spill] sm:$0xff] %v8719_v30 }
 0x8d0   :  { %4134 = vmatpush.msra.mxu0 %v3859_v9  ;;  %v8721_v9 = vld [vmem:[#allocation2 + $0x88] sm:$0xff] }
 0x8d1   :  { %3992 = vmatpush.msra.mxu2 %v3855_v47  ;;  %9305 = vst [vmem:[#allocation18_spill] sm:$0xff] %v8721_v9  ;;  %3974 = vmatpush.msra.mxu3 %v8719_v30  ;;  %v3841_v30 = vld [vmem:[#allocation2 + $0x148] sm:$0xff] }
 0x8d2   :  { %4135 = vmatpush.msra.mxu0 %v3857_v41  ;;  %v8724_v41 = vld [vmem:[#allocation2 + $0x78] sm:$0xff] }
 0x8d3   :  { %3993 = vmatpush.msra.mxu2 %v3853_v46  ;;  %3975 = vmatpush.msra.mxu3 %v8721_v9  ;;  %v3843_v9 = vld [vmem:[#allocation2 + $0x158] sm:$0xff] }
 0x8d4   :  { %4136 = vmatpush.msra.mxu0 %v3855_v47  ;;  %v3847_v47 = vld [vmem:[#allocation2 + $0x178] sm:$0xff] }
 0x8d5   :  { %3994 = vmatpush.msra.mxu2 %v3851_v22  ;;  %3976 = vmatpush.msra.mxu3 %v8724_v41 }
 0x8d6   :  { %4419 = vxpose.xlu1.b32.cont [7/16] (narrow) %v9303_v23, 8  ;;  %4137 = vmatpush.msra.mxu0 %v3853_v46  ;;  %v9306_v46 = vpack.i.bf16 %v8480_v53, %v8477_v15  ;;  %v8734_v23 = vld [vmem:[#allocation2 + $0x58] sm:$0xff]  ;;  %v8742_v15 = vld [vmem:[#allocation2 + $0x28] sm:$0xff] }
 0x8d7   :  { %3995 = vmatpush.msra.mxu2 %v3849_v17  ;;  %3977 = vmatpush.msra.mxu3 %v8727_v20  ;;  %9307 = vst [vmem:[#allocation17_spill] sm:$0xff] %v8734_v23  ;;  %v3837_v53 = vld [vmem:[#allocation2 + $0x128] sm:$0xff] }
 0x8d8   :  { %4138 = vmatpush.msra.mxu0 %v3851_v22  ;;  %v8736_v22 = vld [vmem:[#allocation2 + $0x48] sm:$0xff] }
 0x8d9   :  { %3996 = vmatpush.msra.mxu2 %v3847_v47  ;;  %9308 = vst [vmem:[#allocation15_spill] sm:$0xff] %v8736_v22  ;;  %3978 = vmatpush.msra.mxu3 %v8734_v23  ;;  %v3833_v23 = vld [vmem:[#allocation2 + $0x108] sm:$0xff] }
 0x8da   :  { %4139 = vmatpush.msra.mxu0 %v3849_v17  ;;  %v8739_v17 = vld [vmem:[#allocation2 + $0x38] sm:$0xff] }
 0x8db   :  { %3997 = vmatpush.msra.mxu2 %v3845_v6  ;;  %3979 = vmatpush.msra.mxu3 %v8736_v22  ;;  %v3835_v22 = vld [vmem:[#allocation2 + $0x118] sm:$0xff] }
 0x8dc   :  { %4140 = vmatpush.msra.mxu0 %v3847_v47  ;;  %v3839_v47 = vld [vmem:[#allocation2 + $0x138] sm:$0xff] }
 0x8dd   :  { %3998 = vmatpush.msra.mxu2 %v3843_v9  ;;  %3980 = vmatpush.msra.mxu3 %v8739_v17 }
 0x8de   :  { %4421 = vxpose.xlu1.b32.cont [8/16] (narrow) %v9306_v46, 8  ;;  %4141 = vmatpush.msra.mxu0 %v3845_v6  ;;  %v9309_v6 = vpack.i.bf16 %v8498_v50, %v8495_v60  ;;  %v8749_v46 = vld [vmem:[#allocation2 + $0x18] sm:$0xff]  ;;  %v3735_v50 = vadd.f32 %v8622_v11, %v8510_v56  ;;  %v9310_v56 = vpack.i.bf16 %v8520_v51, %v8517_v28 }
 0x8df   :  { %3999 = vmatpush.msra.mxu2 %v3841_v30  ;;  %3981 = vmatpush.msra.mxu3 %v8742_v15  ;;  %v9311_v28 = vpack.i.bf16 %v8531_v62, %v8528_v57  ;;  %v9312_v51 = vpack.i.bf16 %v8548_v61, %v8545_v38  ;;  %v9314_v57 = vpack.i.bf16 %v8582_v29, %v8576_v16  ;;  %v9319_v38 = vld [vmem:[#allocation18_spill] sm:$0xff]  ;;  %v9320_v61 = vld [vmem:[#allocation17_spill] sm:$0xff] }
 0x8e0   :  { %4142 = vmatpush.msra.mxu0 %v3843_v9  ;;  %v8751_v9 = vld [vmem:[#allocation2 + $0x8] sm:$0xff] }
 0x8e1   :  { %4000 = vmatpush.msra.mxu2 %v3839_v47  ;;  %3982 = vmatpush.msra.mxu3 %v8749_v46 }
 0x8e2   :  { %4143 = vmatpush.msra.mxu0 %v3841_v30  ;;  %v3732_v30 = vadd.f32 %v8622_v11, %v8508_v19  ;;  %v4426_v19 = vpack.i.bf16 %v8615_v4, %v3735_v50 }
 0x8e3   :  { %4001 = vmatpush.msra.mxu2 %v3837_v53  ;;  %3983 = vmatpush.msra.mxu3 %v8751_v9 }
 0x8e4   :  { %4144 = vmatpush.msra.mxu0 %v3839_v47  ;;  %4347 = vmatmul.lmr.bf16.vlgmr.msra.gmra.1.mxu3  ;;  %v4424_v60 = vpack.i.bf16 %v8626_v0, %v3732_v30 }
 0x8e5   :  { %4002 = vmatpush.msra.mxu2 %v3835_v22  ;;  %4072 = vmatpush.msra.mxu3 %v8524_v45  ;;  %v9313_v45 = vpack.i.bf16 %v8563_v34, %v8557_v54 }
 0x8e6   :  { %4423 = vxpose.xlu1.b32.cont [9/16] (narrow) %v9309_v6, 8  ;;  %4145 = vmatpush.msra.mxu0 %v3837_v53 }
 0x8e7   :  { %4003 = vmatpush.msra.mxu2 %v3833_v23  ;;  %4073 = vmatpush.msra.mxu3 %v8535_v24 }
 0x8e8   :  { %4146 = vmatpush.msra.mxu0 %v3835_v22  ;;  %4319 = vmatmul.lmr.bf16.vlgmr.msra.gmra.1.mxu2 }
 0x8e9   :  { %4092 = vmatpush.msra.mxu2 %v8571_v3  ;;  %4074 = vmatpush.msra.mxu3 %v8538_v10 }
 0x8ea   :  { %4147 = vmatpush.msra.mxu0 %v3833_v23 }
 0x8eb   :  { %4093 = vmatpush.msra.mxu2 %v8586_v52  ;;  %4075 = vmatpush.msra.mxu3 %v8541_v31  ;;  %v9318_v31 = vld [vmem:[#allocation13_spill] sm:$0xff] }
 0x8ec   :  { %4291 = vmatmul.lmr.bf16.vlgmr.msra.gmra.1.mxu0 }
 0x8ed   :  { %4094 = vmatpush.msra.mxu2 %v8595_v5  ;;  %4076 = vmatpush.msra.mxu3 %v8552_v26  ;;  %v9321_v26 = vld [vmem:[#allocation15_spill] sm:$0xff] }
 0x8ee   :  { %4425 = vxpose.xlu1.b32.cont [10/16] (narrow) %v4424_v60, 8 }
 0x8ef   :  { %4095 = vmatpush.msra.mxu2 %v8597_v27  ;;  %4077 = vmatpush.msra.mxu3 %v8568_v59 }
 0x8f1   :  { %4096 = vmatpush.msra.mxu2 %v8604_v21  ;;  %4078 = vmatpush.msra.mxu3 %v8584_v48 }
 0x8f3   :  { %4097 = vmatpush.msra.mxu2 %v8610_v14  ;;  %4079 = vmatpush.msra.mxu3 %v8599_v7 }
 0x8f5   :  { %4098 = vmatpush.msra.mxu2 %v8629_v2  ;;  %4080 = vmatpush.msra.mxu3 %v8631_v39 }
 0x8f6   :  { %4427 = vxpose.xlu1.b32.cont [11/16] (narrow) %v4426_v19, 8 }
 0x8f7   :  { %4099 = vmatpush.msra.mxu2 %v8633_v55  ;;  %4081 = vmatpush.msra.mxu3 %v8637_v12 }
 0x8f9   :  { %4100 = vmatpush.msra.mxu2 %v8641_v13  ;;  %4082 = vmatpush.msra.mxu3 %v8656_v37 }
 0x8fb   :  { %4101 = vmatpush.msra.mxu2 %v8648_v58  ;;  %4083 = vmatpush.msra.mxu3 %v8660_v1 }
 0x8fd   :  { %4102 = vmatpush.msra.mxu2 %v8658_v42  ;;  %4084 = vmatpush.msra.mxu3 %v8669_v44 }
 0x8fe   :  { %4429 = vxpose.xlu1.b32.cont [12/16] (narrow) %v9310_v56, 8 }
 0x8ff   :  { %4103 = vmatpush.msra.mxu2 %v8664_v63  ;;  %4085 = vmatpush.msra.mxu3 %v8675_v40 }
 0x901   :  { %4104 = vmatpush.msra.mxu2 %v8671_v35  ;;  %4086 = vmatpush.msra.mxu3 %v8683_v8 }
 0x903   :  { %4105 = vmatpush.msra.mxu2 %v8677_v43  ;;  %4087 = vmatpush.msra.mxu3 %v8687_v18  ;;  %v9315_v18 = vld [vmem:[#allocation8_spill] sm:$0xff] }
 0x905   :  { %4106 = vmatpush.msra.mxu2 %v8685_v33  ;;  %v9317_v33 = vld [vmem:[#allocation14_spill] sm:$0xff] }
 0x906   :  { %4431 = vxpose.xlu1.b32.cont [13/16] (narrow) %v9311_v28, 8 }
 0x907   :  { %4107 = vmatpush.msra.mxu2 %v8691_v32  ;;  %v9316_v32 = vld [vmem:[#allocation12_spill] sm:$0xff] }
 0x90e   :  { %4433 = vxpose.xlu1.b32.cont [14/16] (narrow) %v9312_v51, 8 }
 0x916   :  { %4435 = vxpose.xlu1.b32.cont [15/16] (narrow) %v9313_v45, 8 }
 0x91e   :  { %4437 = vxpose.xlu1.b32.end [16/16] (narrow) %v9314_v57, 8 }
 0x945   :  { %v3945_v8 = vpop.f32.mrf.mxu3 }
 0x94a   :  { %v4438_v62 = vpop.trf.xlu1  ;;  %v3965_v54 = vpop.f32.mrf.mxu2 }
 0x94b   :  { %v4442_v24 = vunpack.i.h.bf16 %v4438_v62  ;;  %v4439_v10 = vunpack.i.l.bf16 %v4438_v62  ;;  %v3966_v59 = vadd.f32 %v3965_v54, %v3945_v8 }
 0x94d   :  { %4088 = vmatmul.f32.vlgmr.msra.gmra.mxu3 %v4439_v10  ;;  %4108 = vmatmul.f32.vlgmr.msra.gmra.mxu2 %v4442_v24 }
 0x94e   :  { %4112 = vmatpush.msra.mxu3 %v9315_v18 }
 0x950   :  { %4113 = vmatpush.msra.mxu3 %v8700_v49 }
 0x952   :  { %4114 = vmatpush.msra.mxu3 %v9316_v32 }
 0x954   :  { %4115 = vmatpush.msra.mxu3 %v9317_v33 }
 0x956   :  { %4116 = vmatpush.msra.mxu3 %v8709_v36 }
 0x958   :  { %4117 = vmatpush.msra.mxu3 %v8712_v25 }
 0x95a   :  { %4118 = vmatpush.msra.mxu3 %v9318_v31 }
 0x95c   :  { %4119 = vmatpush.msra.mxu3 %v9319_v38 }
 0x95e   :  { %4120 = vmatpush.msra.mxu3 %v8724_v41 }
 0x960   :  { %4121 = vmatpush.msra.mxu3 %v8727_v20 }
 0x962   :  { %4122 = vmatpush.msra.mxu3 %v9320_v61 }
 0x964   :  { %4123 = vmatpush.msra.mxu3 %v9321_v26 }
 0x966   :  { %4124 = vmatpush.msra.mxu3 %v8739_v17 }
 0x967   :  { %v3985_v34 = vpop.f32.mrf.mxu3 }
 0x968   :  { %4125 = vmatpush.msra.mxu3 %v8742_v15 }
 0x969   :  { %v4149_v52 = vpop.f32.mrf.mxu0 }
 0x96a   :  { %4126 = vmatpush.msra.mxu3 %v8749_v46 }
 0x96b   :  { %v4005_v43 = vpop.f32.mrf.mxu2 }
 0x96c   :  { %4127 = vmatpush.msra.mxu3 %v8751_v9  ;;  %v4006_v3 = vadd.f32 %v4005_v43, %v3985_v34 }
 0x96d   :  { %4128 = vmatmul.f32.vlgmr.msra.gmra.mxu3 %v4439_v10 }
 0x96e   :  { %v4156_v16 = vrot.slane %v4006_v3, 4 }
 0x970   :  { %v4158_v29 = vsel %vm149_vm3, %v3966_v59, %v4156_v16 }
 0x971   :  { %4162 = vst [vmem:[%s8846_s14] sm:$0x77] %v4158_v29 }
 0x9d0   :  { %v4089_v48 = vpop.f32.mrf.mxu3  ;;  %v4109_v40 = vpop.f32.mrf.mxu2 }
 0x9d1   :  { %v4110_v7 = vadd.f32 %v4109_v40, %v4089_v48 }
 0x9f0   :  { %v4129_v5 = vpop.f32.mrf.mxu3 }
 0x9f1   :  { %v4150_v27 = vadd.f32 %v4149_v52, %v4129_v5 }
 0x9f3   :  { %v4157_v21 = vrot.slane %v4150_v27, 4 }
 0x9f5   :  { %v4159_v14 = vsel %vm149_vm3, %v4110_v7, %v4157_v21 }
 0x9f6   :  { %4163 = vst [vmem:[%s8846_s14 + $0x8] sm:$0x77] %v4159_v14 }
 0x9f7   :  { %4168 = vsyncpa [#allocation3], 1 }

</bundles_post_ra>
